<compile_context>
chip_gen: v6e
topology: v6e:2x2x1
jax: 0.10.0
libtpu: 0.0.40
codegen_flags: <defaults>
</compile_context>

<pallas_src>
import functools

import jax
import jax.numpy as jnp
from jax.experimental import pallas as pl
from jax.experimental.pallas import tpu as pltpu

KSIZE = 7
PAD = (KSIZE - 1) // 2  # 3


# ---------------------------------------------------------------------------
# Shared in-kernel helpers
# ---------------------------------------------------------------------------
def _fill_padded(pad_ref, mx, mn, H, W):
    """Write pooled maps (f32, (Bt, H*W)) into the 2-D zero-padded scratch.

    pad_ref: (2, Bt, H+2*PAD, W+2*PAD) f32.  Only the halo strips are
    (re)zeroed each step -- the interior is fully overwritten -- which stays
    correct under parallel / megacore scheduling (scratch is per-core).
    """
    _, Bt, Hp, Wp = pad_ref.shape
    zrow = jnp.zeros((2, Bt, PAD, Wp), jnp.float32)
    pad_ref[:, :, 0:PAD, :] = zrow
    pad_ref[:, :, PAD + H:Hp, :] = zrow
    zcol = jnp.zeros((2, Bt, H, PAD), jnp.float32)
    pad_ref[:, :, PAD:PAD + H, 0:PAD] = zcol
    pad_ref[:, :, PAD:PAD + H, PAD + W:Wp] = zcol
    for r in range(H):
        pad_ref[0, :, PAD + r, PAD:PAD + W] = mx[:, r * W:(r + 1) * W]
        pad_ref[1, :, PAD + r, PAD:PAD + W] = mn[:, r * W:(r + 1) * W]


def _conv7x7(pad_ref, w_ref, H, W):
    """Mask-free 7x7 conv (2 in-ch -> 1 out-ch) on the padded pooled maps.

    14 row-slab VMEM loads; the 7 horizontal taps per slab are in-register
    lane slices (no iota / %W / selects).  Returns (Bt, H, W) f32.
    """
    _, Bt, _, Wp = pad_ref.shape
    acc = jnp.zeros((Bt, H, W), jnp.float32)
    for c in range(2):
        for a in range(KSIZE):
            slab = pad_ref[c, :, a:a + H, :]                 # (Bt, H, Wp)
            for b2 in range(KSIZE):
                wgt = w_ref[c * KSIZE * KSIZE + a * KSIZE + b2]
                acc = acc + wgt * slab[:, :, b2:b2 + W]
    return acc


# ---------------------------------------------------------------------------
# Single-pass kernel (full-C batch blocks fit in the VMEM budget)
# ---------------------------------------------------------------------------
def _spatial_gate_kernel(x_ref, w_ref, o_ref, pad_ref, scale_ref, *, H, W):
    # x_ref/o_ref : (Bt, C, H*W) lane-dense blocks in VMEM
    # w_ref       : (2*7*7,) f32 in SMEM (flattened OIHW conv weight)
    # pad_ref     : (2, Bt, H+6, W+6) f32 scratch (zero-padded pooled maps)
    # scale_ref   : (Bt, H*W) f32 scratch (flattened sigmoid(conv) result)
    Bt, C, HW = x_ref.shape

    # Channel pooling: reduce straight from the VMEM block (no block-sized f32
    # temp kept live across the conv).  max is exact in the input dtype; mean
    # accumulates in f32.
    mx = jnp.max(x_ref[...], axis=1).astype(jnp.float32)                 # (Bt, HW)
    mn = jnp.sum(x_ref[...].astype(jnp.float32), axis=1) * (1.0 / C)     # (Bt, HW)

    # 7x7 conv + sigmoid on the tiny pooled maps (VPU work; 1 output channel
    # would waste the MXU, and the kernel is HBM-bound on x for large C).
    _fill_padded(pad_ref, mx, mn, H, W)
    sig = jax.nn.sigmoid(_conv7x7(pad_ref, w_ref, H, W))                 # (Bt, H, W)

    # Flatten the small (Bt, H, W) scale back to the lane-dense (Bt, HW)
    # layout through VMEM (H masked row stores + one contiguous load).
    for r in range(H):
        scale_ref[:, r * W:(r + 1) * W] = sig[:, r, :]
    scale = scale_ref[...].astype(x_ref.dtype)                           # (Bt, HW)

    # Gating: re-read x_ref here (short per-tile liveness) and multiply in the
    # input dtype (packed bf16 on v6e/v7x; unchanged f32 math for f32 inputs).
    o_ref[...] = (x_ref[...] * scale[:, None, :]).astype(o_ref.dtype)


# ---------------------------------------------------------------------------
# Two-pass fallback (channel-blocked) for very large C*HW (v7x 64 MiB VMEM)
# ---------------------------------------------------------------------------
def _scale_pass_kernel(x_ref, w_ref, s_ref, mx_ref, sm_ref, pad_ref, *, H, W, C):
    ci = pl.program_id(1)
    nc = pl.num_programs(1)

    @pl.when(ci == 0)
    def _():
        mx_ref[...] = jnp.full(mx_ref.shape, -jnp.inf, jnp.float32)
        sm_ref[...] = jnp.zeros(sm_ref.shape, jnp.float32)

    blk = x_ref[...]                                                      # (1, ct, HW)
    mx_ref[...] = jnp.maximum(mx_ref[...], jnp.max(blk, axis=1).astype(jnp.float32))
    sm_ref[...] = sm_ref[...] + jnp.sum(blk.astype(jnp.float32), axis=1)

    @pl.when(ci == nc - 1)
    def _():
        mn = sm_ref[...] * (1.0 / C)
        _fill_padded(pad_ref, mx_ref[...], mn, H, W)
        sig = jax.nn.sigmoid(_conv7x7(pad_ref, w_ref, H, W))              # (1, H, W)
        for r in range(H):
            s_ref[:, 0, r * W:(r + 1) * W] = sig[:, r, :]


def _gate_pass_kernel(x_ref, s_ref, o_ref):
    scale = s_ref[...].astype(x_ref.dtype)                                # (bt, 1, HW)
    o_ref[...] = (x_ref[...] * scale).astype(o_ref.dtype)


# ---------------------------------------------------------------------------
# Wrapper
# ---------------------------------------------------------------------------
def _vmem_capacity_bytes():
    try:
        return int(pltpu.get_tpu_info().vmem_capacity_bytes)
    except Exception:
        return 64 * 2 ** 20  # conservative (v7x-sized) default


def _largest_divisor_at_most(n, cap):
    cap = max(1, min(n, int(cap)))
    while n % cap:
        cap -= 1
    return cap


def _scale_pass(x_flat, w_flat, *, H, W, usable):
    B, C, HW = x_flat.shape
    Hp, Wp = H + 2 * PAD, W + 2 * PAD
    itemsize = x_flat.dtype.itemsize
    fixed = (2 * Hp * Wp + 12 * HW) * 4
    ct = _largest_divisor_at_most(C, max(1, (usable - fixed) // (2 * HW * itemsize)))
    return pl.pallas_call(
        functools.partial(_scale_pass_kernel, H=H, W=W, C=C),
        out_shape=jax.ShapeDtypeStruct((B, 1, HW), jnp.float32),
        grid=(B, C // ct),
        in_specs=[
            pl.BlockSpec((1, ct, HW), lambda b, c: (b, c, 0)),
            pl.BlockSpec(memory_space=pltpu.MemorySpace.SMEM),
        ],
        out_specs=pl.BlockSpec((1, 1, HW), lambda b, c: (b, 0, 0)),
        scratch_shapes=[
            pltpu.VMEM((1, HW), jnp.float32),            # running channel max
            pltpu.VMEM((1, HW), jnp.float32),            # running channel sum
            pltpu.VMEM((2, 1, Hp, Wp), jnp.float32),     # padded pooled maps
        ],
        compiler_params=pltpu.CompilerParams(
            dimension_semantics=("parallel", "arbitrary"),
            vmem_limit_bytes=usable,
        ),
    )(x_flat, w_flat)


def _gate_pass(x_flat, scale, *, usable):
    B, C, HW = x_flat.shape
    itemsize = x_flat.dtype.itemsize
    ct = _largest_divisor_at_most(
        C, max(1, (usable - 4 * HW * 4) // (4 * HW * itemsize)))
    return pl.pallas_call(
        _gate_pass_kernel,
        out_shape=jax.ShapeDtypeStruct((B, C, HW), x_flat.dtype),
        grid=(B, C // ct),
        in_specs=[
            pl.BlockSpec((1, ct, HW), lambda b, c: (b, c, 0)),
            pl.BlockSpec((1, 1, HW), lambda b, c: (b, 0, 0)),
        ],
        out_specs=pl.BlockSpec((1, ct, HW), lambda b, c: (b, c, 0)),
        compiler_params=pltpu.CompilerParams(
            dimension_semantics=("parallel", "parallel"),
            vmem_limit_bytes=usable,
        ),
    )(x_flat, scale)


def spatial_gate(x, w):
    """x: (B, C, H, W); w: (1, 2, 7, 7) conv weight (bias=False)."""
    B, C, H, W = x.shape
    HW = H * W
    Hp, Wp = H + 2 * PAD, W + 2 * PAD
    itemsize = x.dtype.itemsize

    x_flat = x.reshape(B, C, HW)                 # free view: merge trailing dims
    w_flat = w.reshape(-1).astype(jnp.float32)   # (98,) scalars for SMEM

    # Generation-aware VMEM budget: ~96 MiB usable on v5e/v6e (128 MiB
    # physical), ~48 MiB on v7x (64 MiB physical).
    vmem_cap = _vmem_capacity_bytes()
    usable = max(min(int(0.75 * vmem_cap), 100 * 2 ** 20), 24 * 2 ** 20)

    per_batch_block = C * HW * itemsize
    per_batch_extra = (2 * Hp * Wp + 10 * HW) * 4          # scratch + in-kernel temps
    per_batch_need = 4 * per_batch_block + per_batch_extra  # double-buffered in + out

    if per_batch_need <= usable:
        # Single pass: pooling + conv + gating with one HBM read and one HBM
        # write of x per element.
        bt = usable // per_batch_need
        bt = min(bt, B, max(1, B // 2))   # >= 2 grid steps: pipeline + v7x megacore
        bt = _largest_divisor_at_most(B, bt)
        out_flat = pl.pallas_call(
            functools.partial(_spatial_gate_kernel, H=H, W=W),
            out_shape=jax.ShapeDtypeStruct((B, C, HW), x.dtype),
            grid=(B // bt,),
            in_specs=[
                pl.BlockSpec((bt, C, HW), lambda b: (b, 0, 0)),
                pl.BlockSpec(memory_space=pltpu.MemorySpace.SMEM),
            ],
            out_specs=pl.BlockSpec((bt, C, HW), lambda b: (b, 0, 0)),
            scratch_shapes=[
                pltpu.VMEM((2, bt, Hp, Wp), jnp.float32),   # padded pooled maps
                pltpu.VMEM((bt, HW), jnp.float32),          # flattened scale
            ],
            compiler_params=pltpu.CompilerParams(
                dimension_semantics=("parallel",),
                vmem_limit_bytes=usable,
            ),
        )(x_flat, w_flat)
        return out_flat.reshape(B, C, H, W)

    # Fallback for very large C*HW (e.g. C=2048 at 56x56 on v7x): two-pass
    # scale-then-multiply with the channel dimension blocked so double
    # buffering never needs a full-C batch block resident.
    scale = _scale_pass(x_flat, w_flat, H=H, W=W, usable=usable)
    out_flat = _gate_pass(x_flat, scale, usable=usable)
    return out_flat.reshape(B, C, H, W)


# ---------------------------------------------------------------------------
# Pure-JAX reference matching the PyTorch forward
# ---------------------------------------------------------------------------
def spatial_gate_ref(x, w):
    mx = jnp.max(x, axis=1, keepdims=True)
    mn = jnp.mean(x, axis=1, keepdims=True)
    pooled = jnp.concatenate([mx, mn], axis=1)                   # (B, 2, H, W)
    out = jax.lax.conv_general_dilated(
        pooled, w, window_strides=(1, 1),
        padding=((PAD, PAD), (PAD, PAD)),
        dimension_numbers=("NCHW", "OIHW", "NCHW"))              # (B, 1, H, W)
    return x * jax.nn.sigmoid(out)


if __name__ == "__main__":
    key = jax.random.PRNGKey(0)
    kx, kw = jax.random.split(key)

    B, C, H, W = 2, 4, 16, 16
    x = jax.random.normal(kx, (B, C, H, W), dtype=jnp.float32)
    # Conv weight: (out=1, in=2, 7, 7), bias=False.
    w = jax.random.normal(kw, (1, 2, KSIZE, KSIZE), dtype=jnp.float32) * 0.1

    out = jax.block_until_ready(spatial_gate(x, w))
    ref = spatial_gate_ref(x, w)

    assert out.shape == x.shape
    assert jnp.allclose(out, ref, atol=1e-4, rtol=1e-4), "mismatch vs reference"

    print("KERNEL_OK")
</pallas_src>

<mosaic_0001>
module attributes {stable_mosaic.version = 11 : i64} {
  func.func @_spatial_gate_kernel(%arg0: i32, %arg1: memref<1x4x256xf32, #tpu.memory_space<vmem>>, %arg2: memref<98xf32, #tpu.memory_space<smem>>, %arg3: memref<1x4x256xf32, #tpu.memory_space<vmem>>, %arg4: memref<2x1x22x22xf32, #tpu.memory_space<vmem>>, %arg5: memref<1x256xf32, #tpu.memory_space<vmem>>) attributes {dimension_semantics = [#tpu.dimension_semantics<parallel>], iteration_bounds = array<i64: 2>, scalar_prefetch = 0 : i64, scratch_operands = 2 : i64, tpu.core_type = #tpu.core_type<tc>, window_params = [{transform_indices = @transform_0, window_bounds = array<i64: 1, 4, 256>}, {transform_indices = @transform_1, window_bounds = array<i64: 98>}, {transform_indices = @transform_2, window_bounds = array<i64: 1, 4, 256>}]} {
    %c0 = arith.constant 0 : index
    %c0_0 = arith.constant 0 : index
    %c0_1 = arith.constant 0 : index
    %0 = vector.load %arg1[%c0, %c0_0, %c0_1] : memref<1x4x256xf32, #tpu.memory_space<vmem>>, vector<1x4x256xf32>
    %cst = arith.constant dense<0xFF800000> : vector<1x256xf32>
    %1 = vector.multi_reduction <maximumf>, %0, %cst [1] : vector<1x4x256xf32> to vector<1x256xf32>
    %c0_2 = arith.constant 0 : index
    %c0_3 = arith.constant 0 : index
    %c0_4 = arith.constant 0 : index
    %2 = vector.load %arg1[%c0_2, %c0_3, %c0_4] : memref<1x4x256xf32, #tpu.memory_space<vmem>>, vector<1x4x256xf32>
    %cst_5 = arith.constant dense<0.000000e+00> : vector<1x256xf32>
    %3 = vector.multi_reduction <add>, %2, %cst_5 [1] : vector<1x4x256xf32> to vector<1x256xf32>
    %cst_6 = arith.constant 2.500000e-01 : f32
    %4 = vector.broadcast %cst_6 : f32 to vector<1x256xf32>
    %5 = arith.mulf %3, %4 : vector<1x256xf32>
    %cst_7 = arith.constant 0.000000e+00 : f32
    %6 = vector.broadcast %cst_7 : f32 to vector<2x1x3x22xf32>
    %c0_8 = arith.constant 0 : index
    %c0_9 = arith.constant 0 : index
    %c0_10 = arith.constant 0 : index
    %c0_11 = arith.constant 0 : index
    %7 = vector.load %arg4[%c0_8, %c0_9, %c0_10, %c0_11] : memref<2x1x22x22xf32, #tpu.memory_space<vmem>>, vector<2x1x3x22xf32>
    tpu.vector_store %arg4[%c0_8, %c0_9, %c0_10, %c0_11], %6 {strides = array<i32>} : memref<2x1x22x22xf32, #tpu.memory_space<vmem>>, vector<2x1x3x22xf32>,
    %c0_12 = arith.constant 0 : index
    %c0_13 = arith.constant 0 : index
    %c19 = arith.constant 19 : index
    %c0_14 = arith.constant 0 : index
    %8 = vector.load %arg4[%c0_12, %c0_13, %c19, %c0_14] : memref<2x1x22x22xf32, #tpu.memory_space<vmem>>, vector<2x1x3x22xf32>
    tpu.vector_store %arg4[%c0_12, %c0_13, %c19, %c0_14], %6 {strides = array<i32>} : memref<2x1x22x22xf32, #tpu.memory_space<vmem>>, vector<2x1x3x22xf32>,
    %cst_15 = arith.constant 0.000000e+00 : f32
    %9 = vector.broadcast %cst_15 : f32 to vector<2x1x16x3xf32>
    %c0_16 = arith.constant 0 : index
    %c0_17 = arith.constant 0 : index
    %c3 = arith.constant 3 : index
    %c0_18 = arith.constant 0 : index
    %10 = vector.load %arg4[%c0_16, %c0_17, %c3, %c0_18] : memref<2x1x22x22xf32, #tpu.memory_space<vmem>>, vector<2x1x16x3xf32>
    tpu.vector_store %arg4[%c0_16, %c0_17, %c3, %c0_18], %9 {strides = array<i32>} : memref<2x1x22x22xf32, #tpu.memory_space<vmem>>, vector<2x1x16x3xf32>,
    %c0_19 = arith.constant 0 : index
    %c0_20 = arith.constant 0 : index
    %c3_21 = arith.constant 3 : index
    %c19_22 = arith.constant 19 : index
    %11 = vector.load %arg4[%c0_19, %c0_20, %c3_21, %c19_22] : memref<2x1x22x22xf32, #tpu.memory_space<vmem>>, vector<2x1x16x3xf32>
    tpu.vector_store %arg4[%c0_19, %c0_20, %c3_21, %c19_22], %9 {strides = array<i32>} : memref<2x1x22x22xf32, #tpu.memory_space<vmem>>, vector<2x1x16x3xf32>,
    %12 = vector.extract_strided_slice %1 {offsets = [0, 0], sizes = [1, 16], strides = [1, 1]} : vector<1x256xf32> to vector<1x16xf32>
    %c0_23 = arith.constant 0 : index
    %c0_24 = arith.constant 0 : index
    %c3_25 = arith.constant 3 : index
    %c3_26 = arith.constant 3 : index
    %13 = vector.load %arg4[%c0_23, %c0_24, %c3_25, %c3_26] : memref<2x1x22x22xf32, #tpu.memory_space<vmem>>, vector<1x1x1x16xf32>
    %14 = vector.shape_cast %13 : vector<1x1x1x16xf32> to vector<1x16xf32>
    %15 = vector.shape_cast %12 : vector<1x16xf32> to vector<1x1x1x16xf32>
    tpu.vector_store %arg4[%c0_23, %c0_24, %c3_25, %c3_26], %15 {strides = array<i32>} : memref<2x1x22x22xf32, #tpu.memory_space<vmem>>, vector<1x1x1x16xf32>,
    %16 = vector.extract_strided_slice %5 {offsets = [0, 0], sizes = [1, 16], strides = [1, 1]} : vector<1x256xf32> to vector<1x16xf32>
    %c1 = arith.constant 1 : index
    %c0_27 = arith.constant 0 : index
    %c3_28 = arith.constant 3 : index
    %c3_29 = arith.constant 3 : index
    %17 = vector.load %arg4[%c1, %c0_27, %c3_28, %c3_29] : memref<2x1x22x22xf32, #tpu.memory_space<vmem>>, vector<1x1x1x16xf32>
    %18 = vector.shape_cast %17 : vector<1x1x1x16xf32> to vector<1x16xf32>
    %19 = vector.shape_cast %16 : vector<1x16xf32> to vector<1x1x1x16xf32>
    tpu.vector_store %arg4[%c1, %c0_27, %c3_28, %c3_29], %19 {strides = array<i32>} : memref<2x1x22x22xf32, #tpu.memory_space<vmem>>, vector<1x1x1x16xf32>,
    %20 = vector.extract_strided_slice %1 {offsets = [0, 16], sizes = [1, 16], strides = [1, 1]} : vector<1x256xf32> to vector<1x16xf32>
    %c0_30 = arith.constant 0 : index
    %c0_31 = arith.constant 0 : index
    %c4 = arith.constant 4 : index
    %c3_32 = arith.constant 3 : index
    %21 = vector.load %arg4[%c0_30, %c0_31, %c4, %c3_32] : memref<2x1x22x22xf32, #tpu.memory_space<vmem>>, vector<1x1x1x16xf32>
    %22 = vector.shape_cast %21 : vector<1x1x1x16xf32> to vector<1x16xf32>
    %23 = vector.shape_cast %20 : vector<1x16xf32> to vector<1x1x1x16xf32>
    tpu.vector_store %arg4[%c0_30, %c0_31, %c4, %c3_32], %23 {strides = array<i32>} : memref<2x1x22x22xf32, #tpu.memory_space<vmem>>, vector<1x1x1x16xf32>,
    %24 = vector.extract_strided_slice %5 {offsets = [0, 16], sizes = [1, 16], strides = [1, 1]} : vector<1x256xf32> to vector<1x16xf32>
    %c1_33 = arith.constant 1 : index
    %c0_34 = arith.constant 0 : index
    %c4_35 = arith.constant 4 : index
    %c3_36 = arith.constant 3 : index
    %25 = vector.load %arg4[%c1_33, %c0_34, %c4_35, %c3_36] : memref<2x1x22x22xf32, #tpu.memory_space<vmem>>, vector<1x1x1x16xf32>
    %26 = vector.shape_cast %25 : vector<1x1x1x16xf32> to vector<1x16xf32>
    %27 = vector.shape_cast %24 : vector<1x16xf32> to vector<1x1x1x16xf32>
    tpu.vector_store %arg4[%c1_33, %c0_34, %c4_35, %c3_36], %27 {strides = array<i32>} : memref<2x1x22x22xf32, #tpu.memory_space<vmem>>, vector<1x1x1x16xf32>,
    %28 = vector.extract_strided_slice %1 {offsets = [0, 32], sizes = [1, 16], strides = [1, 1]} : vector<1x256xf32> to vector<1x16xf32>
    %c0_37 = arith.constant 0 : index
    %c0_38 = arith.constant 0 : index
    %c5 = arith.constant 5 : index
    %c3_39 = arith.constant 3 : index
    %29 = vector.load %arg4[%c0_37, %c0_38, %c5, %c3_39] : memref<2x1x22x22xf32, #tpu.memory_space<vmem>>, vector<1x1x1x16xf32>
    %30 = vector.shape_cast %29 : vector<1x1x1x16xf32> to vector<1x16xf32>
    %31 = vector.shape_cast %28 : vector<1x16xf32> to vector<1x1x1x16xf32>
    tpu.vector_store %arg4[%c0_37, %c0_38, %c5, %c3_39], %31 {strides = array<i32>} : memref<2x1x22x22xf32, #tpu.memory_space<vmem>>, vector<1x1x1x16xf32>,
    %32 = vector.extract_strided_slice %5 {offsets = [0, 32], sizes = [1, 16], strides = [1, 1]} : vector<1x256xf32> to vector<1x16xf32>
    %c1_40 = arith.constant 1 : index
    %c0_41 = arith.constant 0 : index
    %c5_42 = arith.constant 5 : index
    %c3_43 = arith.constant 3 : index
    %33 = vector.load %arg4[%c1_40, %c0_41, %c5_42, %c3_43] : memref<2x1x22x22xf32, #tpu.memory_space<vmem>>, vector<1x1x1x16xf32>
    %34 = vector.shape_cast %33 : vector<1x1x1x16xf32> to vector<1x16xf32>
    %35 = vector.shape_cast %32 : vector<1x16xf32> to vector<1x1x1x16xf32>
    tpu.vector_store %arg4[%c1_40, %c0_41, %c5_42, %c3_43], %35 {strides = array<i32>} : memref<2x1x22x22xf32, #tpu.memory_space<vmem>>, vector<1x1x1x16xf32>,
    %36 = vector.extract_strided_slice %1 {offsets = [0, 48], sizes = [1, 16], strides = [1, 1]} : vector<1x256xf32> to vector<1x16xf32>
    %c0_44 = arith.constant 0 : index
    %c0_45 = arith.constant 0 : index
    %c6 = arith.constant 6 : index
    %c3_46 = arith.constant 3 : index
    %37 = vector.load %arg4[%c0_44, %c0_45, %c6, %c3_46] : memref<2x1x22x22xf32, #tpu.memory_space<vmem>>, vector<1x1x1x16xf32>
    %38 = vector.shape_cast %37 : vector<1x1x1x16xf32> to vector<1x16xf32>
    %39 = vector.shape_cast %36 : vector<1x16xf32> to vector<1x1x1x16xf32>
    tpu.vector_store %arg4[%c0_44, %c0_45, %c6, %c3_46], %39 {strides = array<i32>} : memref<2x1x22x22xf32, #tpu.memory_space<vmem>>, vector<1x1x1x16xf32>,
    %40 = vector.extract_strided_slice %5 {offsets = [0, 48], sizes = [1, 16], strides = [1, 1]} : vector<1x256xf32> to vector<1x16xf32>
    %c1_47 = arith.constant 1 : index
    %c0_48 = arith.constant 0 : index
    %c6_49 = arith.constant 6 : index
    %c3_50 = arith.constant 3 : index
    %41 = vector.load %arg4[%c1_47, %c0_48, %c6_49, %c3_50] : memref<2x1x22x22xf32, #tpu.memory_space<vmem>>, vector<1x1x1x16xf32>
    %42 = vector.shape_cast %41 : vector<1x1x1x16xf32> to vector<1x16xf32>
    %43 = vector.shape_cast %40 : vector<1x16xf32> to vector<1x1x1x16xf32>
    tpu.vector_store %arg4[%c1_47, %c0_48, %c6_49, %c3_50], %43 {strides = array<i32>} : memref<2x1x22x22xf32, #tpu.memory_space<vmem>>, vector<1x1x1x16xf32>,
    %44 = vector.extract_strided_slice %1 {offsets = [0, 64], sizes = [1, 16], strides = [1, 1]} : vector<1x256xf32> to vector<1x16xf32>
    %c0_51 = arith.constant 0 : index
    %c0_52 = arith.constant 0 : index
    %c7 = arith.constant 7 : index
    %c3_53 = arith.constant 3 : index
    %45 = vector.load %arg4[%c0_51, %c0_52, %c7, %c3_53] : memref<2x1x22x22xf32, #tpu.memory_space<vmem>>, vector<1x1x1x16xf32>
    %46 = vector.shape_cast %45 : vector<1x1x1x16xf32> to vector<1x16xf32>
    %47 = vector.shape_cast %44 : vector<1x16xf32> to vector<1x1x1x16xf32>
    tpu.vector_store %arg4[%c0_51, %c0_52, %c7, %c3_53], %47 {strides = array<i32>} : memref<2x1x22x22xf32, #tpu.memory_space<vmem>>, vector<1x1x1x16xf32>,
    %48 = vector.extract_strided_slice %5 {offsets = [0, 64], sizes = [1, 16], strides = [1, 1]} : vector<1x256xf32> to vector<1x16xf32>
    %c1_54 = arith.constant 1 : index
    %c0_55 = arith.constant 0 : index
    %c7_56 = arith.constant 7 : index
    %c3_57 = arith.constant 3 : index
    %49 = vector.load %arg4[%c1_54, %c0_55, %c7_56, %c3_57] : memref<2x1x22x22xf32, #tpu.memory_space<vmem>>, vector<1x1x1x16xf32>
    %50 = vector.shape_cast %49 : vector<1x1x1x16xf32> to vector<1x16xf32>
    %51 = vector.shape_cast %48 : vector<1x16xf32> to vector<1x1x1x16xf32>
    tpu.vector_store %arg4[%c1_54, %c0_55, %c7_56, %c3_57], %51 {strides = array<i32>} : memref<2x1x22x22xf32, #tpu.memory_space<vmem>>, vector<1x1x1x16xf32>,
    %52 = vector.extract_strided_slice %1 {offsets = [0, 80], sizes = [1, 16], strides = [1, 1]} : vector<1x256xf32> to vector<1x16xf32>
    %c0_58 = arith.constant 0 : index
    %c0_59 = arith.constant 0 : index
    %c8 = arith.constant 8 : index
    %c3_60 = arith.constant 3 : index
    %53 = vector.load %arg4[%c0_58, %c0_59, %c8, %c3_60] : memref<2x1x22x22xf32, #tpu.memory_space<vmem>>, vector<1x1x1x16xf32>
    %54 = vector.shape_cast %53 : vector<1x1x1x16xf32> to vector<1x16xf32>
    %55 = vector.shape_cast %52 : vector<1x16xf32> to vector<1x1x1x16xf32>
    tpu.vector_store %arg4[%c0_58, %c0_59, %c8, %c3_60], %55 {strides = array<i32>} : memref<2x1x22x22xf32, #tpu.memory_space<vmem>>, vector<1x1x1x16xf32>,
    %56 = vector.extract_strided_slice %5 {offsets = [0, 80], sizes = [1, 16], strides = [1, 1]} : vector<1x256xf32> to vector<1x16xf32>
    %c1_61 = arith.constant 1 : index
    %c0_62 = arith.constant 0 : index
    %c8_63 = arith.constant 8 : index
    %c3_64 = arith.constant 3 : index
    %57 = vector.load %arg4[%c1_61, %c0_62, %c8_63, %c3_64] : memref<2x1x22x22xf32, #tpu.memory_space<vmem>>, vector<1x1x1x16xf32>
    %58 = vector.shape_cast %57 : vector<1x1x1x16xf32> to vector<1x16xf32>
    %59 = vector.shape_cast %56 : vector<1x16xf32> to vector<1x1x1x16xf32>
    tpu.vector_store %arg4[%c1_61, %c0_62, %c8_63, %c3_64], %59 {strides = array<i32>} : memref<2x1x22x22xf32, #tpu.memory_space<vmem>>, vector<1x1x1x16xf32>,
    %60 = vector.extract_strided_slice %1 {offsets = [0, 96], sizes = [1, 16], strides = [1, 1]} : vector<1x256xf32> to vector<1x16xf32>
    %c0_65 = arith.constant 0 : index
    %c0_66 = arith.constant 0 : index
    %c9 = arith.constant 9 : index
    %c3_67 = arith.constant 3 : index
    %61 = vector.load %arg4[%c0_65, %c0_66, %c9, %c3_67] : memref<2x1x22x22xf32, #tpu.memory_space<vmem>>, vector<1x1x1x16xf32>
    %62 = vector.shape_cast %61 : vector<1x1x1x16xf32> to vector<1x16xf32>
    %63 = vector.shape_cast %60 : vector<1x16xf32> to vector<1x1x1x16xf32>
    tpu.vector_store %arg4[%c0_65, %c0_66, %c9, %c3_67], %63 {strides = array<i32>} : memref<2x1x22x22xf32, #tpu.memory_space<vmem>>, vector<1x1x1x16xf32>,
    %64 = vector.extract_strided_slice %5 {offsets = [0, 96], sizes = [1, 16], strides = [1, 1]} : vector<1x256xf32> to vector<1x16xf32>
    %c1_68 = arith.constant 1 : index
    %c0_69 = arith.constant 0 : index
    %c9_70 = arith.constant 9 : index
    %c3_71 = arith.constant 3 : index
    %65 = vector.load %arg4[%c1_68, %c0_69, %c9_70, %c3_71] : memref<2x1x22x22xf32, #tpu.memory_space<vmem>>, vector<1x1x1x16xf32>
    %66 = vector.shape_cast %65 : vector<1x1x1x16xf32> to vector<1x16xf32>
    %67 = vector.shape_cast %64 : vector<1x16xf32> to vector<1x1x1x16xf32>
    tpu.vector_store %arg4[%c1_68, %c0_69, %c9_70, %c3_71], %67 {strides = array<i32>} : memref<2x1x22x22xf32, #tpu.memory_space<vmem>>, vector<1x1x1x16xf32>,
    %68 = vector.extract_strided_slice %1 {offsets = [0, 112], sizes = [1, 16], strides = [1, 1]} : vector<1x256xf32> to vector<1x16xf32>
    %c0_72 = arith.constant 0 : index
    %c0_73 = arith.constant 0 : index
    %c10 = arith.constant 10 : index
    %c3_74 = arith.constant 3 : index
    %69 = vector.load %arg4[%c0_72, %c0_73, %c10, %c3_74] : memref<2x1x22x22xf32, #tpu.memory_space<vmem>>, vector<1x1x1x16xf32>
    %70 = vector.shape_cast %69 : vector<1x1x1x16xf32> to vector<1x16xf32>
    %71 = vector.shape_cast %68 : vector<1x16xf32> to vector<1x1x1x16xf32>
    tpu.vector_store %arg4[%c0_72, %c0_73, %c10, %c3_74], %71 {strides = array<i32>} : memref<2x1x22x22xf32, #tpu.memory_space<vmem>>, vector<1x1x1x16xf32>,
    %72 = vector.extract_strided_slice %5 {offsets = [0, 112], sizes = [1, 16], strides = [1, 1]} : vector<1x256xf32> to vector<1x16xf32>
    %c1_75 = arith.constant 1 : index
    %c0_76 = arith.constant 0 : index
    %c10_77 = arith.constant 10 : index
    %c3_78 = arith.constant 3 : index
    %73 = vector.load %arg4[%c1_75, %c0_76, %c10_77, %c3_78] : memref<2x1x22x22xf32, #tpu.memory_space<vmem>>, vector<1x1x1x16xf32>
    %74 = vector.shape_cast %73 : vector<1x1x1x16xf32> to vector<1x16xf32>
    %75 = vector.shape_cast %72 : vector<1x16xf32> to vector<1x1x1x16xf32>
    tpu.vector_store %arg4[%c1_75, %c0_76, %c10_77, %c3_78], %75 {strides = array<i32>} : memref<2x1x22x22xf32, #tpu.memory_space<vmem>>, vector<1x1x1x16xf32>,
    %76 = vector.extract_strided_slice %1 {offsets = [0, 128], sizes = [1, 16], strides = [1, 1]} : vector<1x256xf32> to vector<1x16xf32>
    %c0_79 = arith.constant 0 : index
    %c0_80 = arith.constant 0 : index
    %c11 = arith.constant 11 : index
    %c3_81 = arith.constant 3 : index
    %77 = vector.load %arg4[%c0_79, %c0_80, %c11, %c3_81] : memref<2x1x22x22xf32, #tpu.memory_space<vmem>>, vector<1x1x1x16xf32>
    %78 = vector.shape_cast %77 : vector<1x1x1x16xf32> to vector<1x16xf32>
    %79 = vector.shape_cast %76 : vector<1x16xf32> to vector<1x1x1x16xf32>
    tpu.vector_store %arg4[%c0_79, %c0_80, %c11, %c3_81], %79 {strides = array<i32>} : memref<2x1x22x22xf32, #tpu.memory_space<vmem>>, vector<1x1x1x16xf32>,
    %80 = vector.extract_strided_slice %5 {offsets = [0, 128], sizes = [1, 16], strides = [1, 1]} : vector<1x256xf32> to vector<1x16xf32>
    %c1_82 = arith.constant 1 : index
    %c0_83 = arith.constant 0 : index
    %c11_84 = arith.constant 11 : index
    %c3_85 = arith.constant 3 : index
    %81 = vector.load %arg4[%c1_82, %c0_83, %c11_84, %c3_85] : memref<2x1x22x22xf32, #tpu.memory_space<vmem>>, vector<1x1x1x16xf32>
    %82 = vector.shape_cast %81 : vector<1x1x1x16xf32> to vector<1x16xf32>
    %83 = vector.shape_cast %80 : vector<1x16xf32> to vector<1x1x1x16xf32>
    tpu.vector_store %arg4[%c1_82, %c0_83, %c11_84, %c3_85], %83 {strides = array<i32>} : memref<2x1x22x22xf32, #tpu.memory_space<vmem>>, vector<1x1x1x16xf32>,
    %84 = vector.extract_strided_slice %1 {offsets = [0, 144], sizes = [1, 16], strides = [1, 1]} : vector<1x256xf32> to vector<1x16xf32>
    %c0_86 = arith.constant 0 : index
    %c0_87 = arith.constant 0 : index
    %c12 = arith.constant 12 : index
    %c3_88 = arith.constant 3 : index
    %85 = vector.load %arg4[%c0_86, %c0_87, %c12, %c3_88] : memref<2x1x22x22xf32, #tpu.memory_space<vmem>>, vector<1x1x1x16xf32>
    %86 = vector.shape_cast %85 : vector<1x1x1x16xf32> to vector<1x16xf32>
    %87 = vector.shape_cast %84 : vector<1x16xf32> to vector<1x1x1x16xf32>
    tpu.vector_store %arg4[%c0_86, %c0_87, %c12, %c3_88], %87 {strides = array<i32>} : memref<2x1x22x22xf32, #tpu.memory_space<vmem>>, vector<1x1x1x16xf32>,
    %88 = vector.extract_strided_slice %5 {offsets = [0, 144], sizes = [1, 16], strides = [1, 1]} : vector<1x256xf32> to vector<1x16xf32>
    %c1_89 = arith.constant 1 : index
    %c0_90 = arith.constant 0 : index
    %c12_91 = arith.constant 12 : index
    %c3_92 = arith.constant 3 : index
    %89 = vector.load %arg4[%c1_89, %c0_90, %c12_91, %c3_92] : memref<2x1x22x22xf32, #tpu.memory_space<vmem>>, vector<1x1x1x16xf32>
    %90 = vector.shape_cast %89 : vector<1x1x1x16xf32> to vector<1x16xf32>
    %91 = vector.shape_cast %88 : vector<1x16xf32> to vector<1x1x1x16xf32>
    tpu.vector_store %arg4[%c1_89, %c0_90, %c12_91, %c3_92], %91 {strides = array<i32>} : memref<2x1x22x22xf32, #tpu.memory_space<vmem>>, vector<1x1x1x16xf32>,
    %92 = vector.extract_strided_slice %1 {offsets = [0, 160], sizes = [1, 16], strides = [1, 1]} : vector<1x256xf32> to vector<1x16xf32>
    %c0_93 = arith.constant 0 : index
    %c0_94 = arith.constant 0 : index
    %c13 = arith.constant 13 : index
    %c3_95 = arith.constant 3 : index
    %93 = vector.load %arg4[%c0_93, %c0_94, %c13, %c3_95] : memref<2x1x22x22xf32, #tpu.memory_space<vmem>>, vector<1x1x1x16xf32>
    %94 = vector.shape_cast %93 : vector<1x1x1x16xf32> to vector<1x16xf32>
    %95 = vector.shape_cast %92 : vector<1x16xf32> to vector<1x1x1x16xf32>
    tpu.vector_store %arg4[%c0_93, %c0_94, %c13, %c3_95], %95 {strides = array<i32>} : memref<2x1x22x22xf32, #tpu.memory_space<vmem>>, vector<1x1x1x16xf32>,
    %96 = vector.extract_strided_slice %5 {offsets = [0, 160], sizes = [1, 16], strides = [1, 1]} : vector<1x256xf32> to vector<1x16xf32>
    %c1_96 = arith.constant 1 : index
    %c0_97 = arith.constant 0 : index
    %c13_98 = arith.constant 13 : index
    %c3_99 = arith.constant 3 : index
    %97 = vector.load %arg4[%c1_96, %c0_97, %c13_98, %c3_99] : memref<2x1x22x22xf32, #tpu.memory_space<vmem>>, vector<1x1x1x16xf32>
    %98 = vector.shape_cast %97 : vector<1x1x1x16xf32> to vector<1x16xf32>
    %99 = vector.shape_cast %96 : vector<1x16xf32> to vector<1x1x1x16xf32>
    tpu.vector_store %arg4[%c1_96, %c0_97, %c13_98, %c3_99], %99 {strides = array<i32>} : memref<2x1x22x22xf32, #tpu.memory_space<vmem>>, vector<1x1x1x16xf32>,
    %100 = vector.extract_strided_slice %1 {offsets = [0, 176], sizes = [1, 16], strides = [1, 1]} : vector<1x256xf32> to vector<1x16xf32>
    %c0_100 = arith.constant 0 : index
    %c0_101 = arith.constant 0 : index
    %c14 = arith.constant 14 : index
    %c3_102 = arith.constant 3 : index
    %101 = vector.load %arg4[%c0_100, %c0_101, %c14, %c3_102] : memref<2x1x22x22xf32, #tpu.memory_space<vmem>>, vector<1x1x1x16xf32>
    %102 = vector.shape_cast %101 : vector<1x1x1x16xf32> to vector<1x16xf32>
    %103 = vector.shape_cast %100 : vector<1x16xf32> to vector<1x1x1x16xf32>
    tpu.vector_store %arg4[%c0_100, %c0_101, %c14, %c3_102], %103 {strides = array<i32>} : memref<2x1x22x22xf32, #tpu.memory_space<vmem>>, vector<1x1x1x16xf32>,
    %104 = vector.extract_strided_slice %5 {offsets = [0, 176], sizes = [1, 16], strides = [1, 1]} : vector<1x256xf32> to vector<1x16xf32>
    %c1_103 = arith.constant 1 : index
    %c0_104 = arith.constant 0 : index
    %c14_105 = arith.constant 14 : index
    %c3_106 = arith.constant 3 : index
    %105 = vector.load %arg4[%c1_103, %c0_104, %c14_105, %c3_106] : memref<2x1x22x22xf32, #tpu.memory_space<vmem>>, vector<1x1x1x16xf32>
    %106 = vector.shape_cast %105 : vector<1x1x1x16xf32> to vector<1x16xf32>
    %107 = vector.shape_cast %104 : vector<1x16xf32> to vector<1x1x1x16xf32>
    tpu.vector_store %arg4[%c1_103, %c0_104, %c14_105, %c3_106], %107 {strides = array<i32>} : memref<2x1x22x22xf32, #tpu.memory_space<vmem>>, vector<1x1x1x16xf32>,
    %108 = vector.extract_strided_slice %1 {offsets = [0, 192], sizes = [1, 16], strides = [1, 1]} : vector<1x256xf32> to vector<1x16xf32>
    %c0_107 = arith.constant 0 : index
    %c0_108 = arith.constant 0 : index
    %c15 = arith.constant 15 : index
    %c3_109 = arith.constant 3 : index
    %109 = vector.load %arg4[%c0_107, %c0_108, %c15, %c3_109] : memref<2x1x22x22xf32, #tpu.memory_space<vmem>>, vector<1x1x1x16xf32>
    %110 = vector.shape_cast %109 : vector<1x1x1x16xf32> to vector<1x16xf32>
    %111 = vector.shape_cast %108 : vector<1x16xf32> to vector<1x1x1x16xf32>
    tpu.vector_store %arg4[%c0_107, %c0_108, %c15, %c3_109], %111 {strides = array<i32>} : memref<2x1x22x22xf32, #tpu.memory_space<vmem>>, vector<1x1x1x16xf32>,
    %112 = vector.extract_strided_slice %5 {offsets = [0, 192], sizes = [1, 16], strides = [1, 1]} : vector<1x256xf32> to vector<1x16xf32>
    %c1_110 = arith.constant 1 : index
    %c0_111 = arith.constant 0 : index
    %c15_112 = arith.constant 15 : index
    %c3_113 = arith.constant 3 : index
    %113 = vector.load %arg4[%c1_110, %c0_111, %c15_112, %c3_113] : memref<2x1x22x22xf32, #tpu.memory_space<vmem>>, vector<1x1x1x16xf32>
    %114 = vector.shape_cast %113 : vector<1x1x1x16xf32> to vector<1x16xf32>
    %115 = vector.shape_cast %112 : vector<1x16xf32> to vector<1x1x1x16xf32>
    tpu.vector_store %arg4[%c1_110, %c0_111, %c15_112, %c3_113], %115 {strides = array<i32>} : memref<2x1x22x22xf32, #tpu.memory_space<vmem>>, vector<1x1x1x16xf32>,
    %116 = vector.extract_strided_slice %1 {offsets = [0, 208], sizes = [1, 16], strides = [1, 1]} : vector<1x256xf32> to vector<1x16xf32>
    %c0_114 = arith.constant 0 : index
    %c0_115 = arith.constant 0 : index
    %c16 = arith.constant 16 : index
    %c3_116 = arith.constant 3 : index
    %117 = vector.load %arg4[%c0_114, %c0_115, %c16, %c3_116] : memref<2x1x22x22xf32, #tpu.memory_space<vmem>>, vector<1x1x1x16xf32>
    %118 = vector.shape_cast %117 : vector<1x1x1x16xf32> to vector<1x16xf32>
    %119 = vector.shape_cast %116 : vector<1x16xf32> to vector<1x1x1x16xf32>
    tpu.vector_store %arg4[%c0_114, %c0_115, %c16, %c3_116], %119 {strides = array<i32>} : memref<2x1x22x22xf32, #tpu.memory_space<vmem>>, vector<1x1x1x16xf32>,
    %120 = vector.extract_strided_slice %5 {offsets = [0, 208], sizes = [1, 16], strides = [1, 1]} : vector<1x256xf32> to vector<1x16xf32>
    %c1_117 = arith.constant 1 : index
    %c0_118 = arith.constant 0 : index
    %c16_119 = arith.constant 16 : index
    %c3_120 = arith.constant 3 : index
    %121 = vector.load %arg4[%c1_117, %c0_118, %c16_119, %c3_120] : memref<2x1x22x22xf32, #tpu.memory_space<vmem>>, vector<1x1x1x16xf32>
    %122 = vector.shape_cast %121 : vector<1x1x1x16xf32> to vector<1x16xf32>
    %123 = vector.shape_cast %120 : vector<1x16xf32> to vector<1x1x1x16xf32>
    tpu.vector_store %arg4[%c1_117, %c0_118, %c16_119, %c3_120], %123 {strides = array<i32>} : memref<2x1x22x22xf32, #tpu.memory_space<vmem>>, vector<1x1x1x16xf32>,
    %124 = vector.extract_strided_slice %1 {offsets = [0, 224], sizes = [1, 16], strides = [1, 1]} : vector<1x256xf32> to vector<1x16xf32>
    %c0_121 = arith.constant 0 : index
    %c0_122 = arith.constant 0 : index
    %c17 = arith.constant 17 : index
    %c3_123 = arith.constant 3 : index
    %125 = vector.load %arg4[%c0_121, %c0_122, %c17, %c3_123] : memref<2x1x22x22xf32, #tpu.memory_space<vmem>>, vector<1x1x1x16xf32>
    %126 = vector.shape_cast %125 : vector<1x1x1x16xf32> to vector<1x16xf32>
    %127 = vector.shape_cast %124 : vector<1x16xf32> to vector<1x1x1x16xf32>
    tpu.vector_store %arg4[%c0_121, %c0_122, %c17, %c3_123], %127 {strides = array<i32>} : memref<2x1x22x22xf32, #tpu.memory_space<vmem>>, vector<1x1x1x16xf32>,
    %128 = vector.extract_strided_slice %5 {offsets = [0, 224], sizes = [1, 16], strides = [1, 1]} : vector<1x256xf32> to vector<1x16xf32>
    %c1_124 = arith.constant 1 : index
    %c0_125 = arith.constant 0 : index
    %c17_126 = arith.constant 17 : index
    %c3_127 = arith.constant 3 : index
    %129 = vector.load %arg4[%c1_124, %c0_125, %c17_126, %c3_127] : memref<2x1x22x22xf32, #tpu.memory_space<vmem>>, vector<1x1x1x16xf32>
    %130 = vector.shape_cast %129 : vector<1x1x1x16xf32> to vector<1x16xf32>
    %131 = vector.shape_cast %128 : vector<1x16xf32> to vector<1x1x1x16xf32>
    tpu.vector_store %arg4[%c1_124, %c0_125, %c17_126, %c3_127], %131 {strides = array<i32>} : memref<2x1x22x22xf32, #tpu.memory_space<vmem>>, vector<1x1x1x16xf32>,
    %132 = vector.extract_strided_slice %1 {offsets = [0, 240], sizes = [1, 16], strides = [1, 1]} : vector<1x256xf32> to vector<1x16xf32>
    %c0_128 = arith.constant 0 : index
    %c0_129 = arith.constant 0 : index
    %c18 = arith.constant 18 : index
    %c3_130 = arith.constant 3 : index
    %133 = vector.load %arg4[%c0_128, %c0_129, %c18, %c3_130] : memref<2x1x22x22xf32, #tpu.memory_space<vmem>>, vector<1x1x1x16xf32>
    %134 = vector.shape_cast %133 : vector<1x1x1x16xf32> to vector<1x16xf32>
    %135 = vector.shape_cast %132 : vector<1x16xf32> to vector<1x1x1x16xf32>
    tpu.vector_store %arg4[%c0_128, %c0_129, %c18, %c3_130], %135 {strides = array<i32>} : memref<2x1x22x22xf32, #tpu.memory_space<vmem>>, vector<1x1x1x16xf32>,
    %136 = vector.extract_strided_slice %5 {offsets = [0, 240], sizes = [1, 16], strides = [1, 1]} : vector<1x256xf32> to vector<1x16xf32>
    %c1_131 = arith.constant 1 : index
    %c0_132 = arith.constant 0 : index
    %c18_133 = arith.constant 18 : index
    %c3_134 = arith.constant 3 : index
    %137 = vector.load %arg4[%c1_131, %c0_132, %c18_133, %c3_134] : memref<2x1x22x22xf32, #tpu.memory_space<vmem>>, vector<1x1x1x16xf32>
    %138 = vector.shape_cast %137 : vector<1x1x1x16xf32> to vector<1x16xf32>
    %139 = vector.shape_cast %136 : vector<1x16xf32> to vector<1x1x1x16xf32>
    tpu.vector_store %arg4[%c1_131, %c0_132, %c18_133, %c3_134], %139 {strides = array<i32>} : memref<2x1x22x22xf32, #tpu.memory_space<vmem>>, vector<1x1x1x16xf32>,
    %cst_135 = arith.constant 0.000000e+00 : f32
    %140 = vector.broadcast %cst_135 : f32 to vector<1x16x16xf32>
    %c0_136 = arith.constant 0 : index
    %c0_137 = arith.constant 0 : index
    %c0_138 = arith.constant 0 : index
    %c0_139 = arith.constant 0 : index
    %141 = vector.load %arg4[%c0_136, %c0_137, %c0_138, %c0_139] : memref<2x1x22x22xf32, #tpu.memory_space<vmem>>, vector<1x1x16x22xf32>
    %142 = vector.shape_cast %141 : vector<1x1x16x22xf32> to vector<1x16x22xf32>
    %c0_140 = arith.constant 0 : index
    %143 = memref.load %arg2[%c0_140] : memref<98xf32, #tpu.memory_space<smem>>
    %144 = vector.extract_strided_slice %142 {offsets = [0, 0, 0], sizes = [1, 16, 16], strides = [1, 1, 1]} : vector<1x16x22xf32> to vector<1x16x16xf32>
    %145 = vector.broadcast %143 : f32 to vector<1x16x16xf32>
    %146 = arith.mulf %145, %144 : vector<1x16x16xf32>
    %147 = arith.addf %140, %146 : vector<1x16x16xf32>
    %c1_141 = arith.constant 1 : index
    %148 = memref.load %arg2[%c1_141] : memref<98xf32, #tpu.memory_space<smem>>
    %149 = vector.extract_strided_slice %142 {offsets = [0, 0, 1], sizes = [1, 16, 16], strides = [1, 1, 1]} : vector<1x16x22xf32> to vector<1x16x16xf32>
    %150 = vector.broadcast %148 : f32 to vector<1x16x16xf32>
    %151 = arith.mulf %150, %149 : vector<1x16x16xf32>
    %152 = arith.addf %147, %151 : vector<1x16x16xf32>
    %c2 = arith.constant 2 : index
    %153 = memref.load %arg2[%c2] : memref<98xf32, #tpu.memory_space<smem>>
    %154 = vector.extract_strided_slice %142 {offsets = [0, 0, 2], sizes = [1, 16, 16], strides = [1, 1, 1]} : vector<1x16x22xf32> to vector<1x16x16xf32>
    %155 = vector.broadcast %153 : f32 to vector<1x16x16xf32>
    %156 = arith.mulf %155, %154 : vector<1x16x16xf32>
    %157 = arith.addf %152, %156 : vector<1x16x16xf32>
    %c3_142 = arith.constant 3 : index
    %158 = memref.load %arg2[%c3_142] : memref<98xf32, #tpu.memory_space<smem>>
    %159 = vector.extract_strided_slice %142 {offsets = [0, 0, 3], sizes = [1, 16, 16], strides = [1, 1, 1]} : vector<1x16x22xf32> to vector<1x16x16xf32>
    %160 = vector.broadcast %158 : f32 to vector<1x16x16xf32>
    %161 = arith.mulf %160, %159 : vector<1x16x16xf32>
    %162 = arith.addf %157, %161 : vector<1x16x16xf32>
    %c4_143 = arith.constant 4 : index
    %163 = memref.load %arg2[%c4_143] : memref<98xf32, #tpu.memory_space<smem>>
    %164 = vector.extract_strided_slice %142 {offsets = [0, 0, 4], sizes = [1, 16, 16], strides = [1, 1, 1]} : vector<1x16x22xf32> to vector<1x16x16xf32>
    %165 = vector.broadcast %163 : f32 to vector<1x16x16xf32>
    %166 = arith.mulf %165, %164 : vector<1x16x16xf32>
    %167 = arith.addf %162, %166 : vector<1x16x16xf32>
    %c5_144 = arith.constant 5 : index
    %168 = memref.load %arg2[%c5_144] : memref<98xf32, #tpu.memory_space<smem>>
    %169 = vector.extract_strided_slice %142 {offsets = [0, 0, 5], sizes = [1, 16, 16], strides = [1, 1, 1]} : vector<1x16x22xf32> to vector<1x16x16xf32>
    %170 = vector.broadcast %168 : f32 to vector<1x16x16xf32>
    %171 = arith.mulf %170, %169 : vector<1x16x16xf32>
    %172 = arith.addf %167, %171 : vector<1x16x16xf32>
    %c6_145 = arith.constant 6 : index
    %173 = memref.load %arg2[%c6_145] : memref<98xf32, #tpu.memory_space<smem>>
    %174 = vector.extract_strided_slice %142 {offsets = [0, 0, 6], sizes = [1, 16, 16], strides = [1, 1, 1]} : vector<1x16x22xf32> to vector<1x16x16xf32>
    %175 = vector.broadcast %173 : f32 to vector<1x16x16xf32>
    %176 = arith.mulf %175, %174 : vector<1x16x16xf32>
    %177 = arith.addf %172, %176 : vector<1x16x16xf32>
    %c0_146 = arith.constant 0 : index
    %c0_147 = arith.constant 0 : index
    %c1_148 = arith.constant 1 : index
    %c0_149 = arith.constant 0 : index
    %178 = vector.load %arg4[%c0_146, %c0_147, %c1_148, %c0_149] : memref<2x1x22x22xf32, #tpu.memory_space<vmem>>, vector<1x1x16x22xf32>
    %179 = vector.shape_cast %178 : vector<1x1x16x22xf32> to vector<1x16x22xf32>
    %c7_150 = arith.constant 7 : index
    %180 = memref.load %arg2[%c7_150] : memref<98xf32, #tpu.memory_space<smem>>
    %181 = vector.extract_strided_slice %179 {offsets = [0, 0, 0], sizes = [1, 16, 16], strides = [1, 1, 1]} : vector<1x16x22xf32> to vector<1x16x16xf32>
    %182 = vector.broadcast %180 : f32 to vector<1x16x16xf32>
    %183 = arith.mulf %182, %181 : vector<1x16x16xf32>
    %184 = arith.addf %177, %183 : vector<1x16x16xf32>
    %c8_151 = arith.constant 8 : index
    %185 = memref.load %arg2[%c8_151] : memref<98xf32, #tpu.memory_space<smem>>
    %186 = vector.extract_strided_slice %179 {offsets = [0, 0, 1], sizes = [1, 16, 16], strides = [1, 1, 1]} : vector<1x16x22xf32> to vector<1x16x16xf32>
    %187 = vector.broadcast %185 : f32 to vector<1x16x16xf32>
    %188 = arith.mulf %187, %186 : vector<1x16x16xf32>
    %189 = arith.addf %184, %188 : vector<1x16x16xf32>
    %c9_152 = arith.constant 9 : index
    %190 = memref.load %arg2[%c9_152] : memref<98xf32, #tpu.memory_space<smem>>
    %191 = vector.extract_strided_slice %179 {offsets = [0, 0, 2], sizes = [1, 16, 16], strides = [1, 1, 1]} : vector<1x16x22xf32> to vector<1x16x16xf32>
    %192 = vector.broadcast %190 : f32 to vector<1x16x16xf32>
    %193 = arith.mulf %192, %191 : vector<1x16x16xf32>
    %194 = arith.addf %189, %193 : vector<1x16x16xf32>
    %c10_153 = arith.constant 10 : index
    %195 = memref.load %arg2[%c10_153] : memref<98xf32, #tpu.memory_space<smem>>
    %196 = vector.extract_strided_slice %179 {offsets = [0, 0, 3], sizes = [1, 16, 16], strides = [1, 1, 1]} : vector<1x16x22xf32> to vector<1x16x16xf32>
    %197 = vector.broadcast %195 : f32 to vector<1x16x16xf32>
    %198 = arith.mulf %197, %196 : vector<1x16x16xf32>
    %199 = arith.addf %194, %198 : vector<1x16x16xf32>
    %c11_154 = arith.constant 11 : index
    %200 = memref.load %arg2[%c11_154] : memref<98xf32, #tpu.memory_space<smem>>
    %201 = vector.extract_strided_slice %179 {offsets = [0, 0, 4], sizes = [1, 16, 16], strides = [1, 1, 1]} : vector<1x16x22xf32> to vector<1x16x16xf32>
    %202 = vector.broadcast %200 : f32 to vector<1x16x16xf32>
    %203 = arith.mulf %202, %201 : vector<1x16x16xf32>
    %204 = arith.addf %199, %203 : vector<1x16x16xf32>
    %c12_155 = arith.constant 12 : index
    %205 = memref.load %arg2[%c12_155] : memref<98xf32, #tpu.memory_space<smem>>
    %206 = vector.extract_strided_slice %179 {offsets = [0, 0, 5], sizes = [1, 16, 16], strides = [1, 1, 1]} : vector<1x16x22xf32> to vector<1x16x16xf32>
    %207 = vector.broadcast %205 : f32 to vector<1x16x16xf32>
    %208 = arith.mulf %207, %206 : vector<1x16x16xf32>
    %209 = arith.addf %204, %208 : vector<1x16x16xf32>
    %c13_156 = arith.constant 13 : index
    %210 = memref.load %arg2[%c13_156] : memref<98xf32, #tpu.memory_space<smem>>
    %211 = vector.extract_strided_slice %179 {offsets = [0, 0, 6], sizes = [1, 16, 16], strides = [1, 1, 1]} : vector<1x16x22xf32> to vector<1x16x16xf32>
    %212 = vector.broadcast %210 : f32 to vector<1x16x16xf32>
    %213 = arith.mulf %212, %211 : vector<1x16x16xf32>
    %214 = arith.addf %209, %213 : vector<1x16x16xf32>
    %c0_157 = arith.constant 0 : index
    %c0_158 = arith.constant 0 : index
    %c2_159 = arith.constant 2 : index
    %c0_160 = arith.constant 0 : index
    %215 = vector.load %arg4[%c0_157, %c0_158, %c2_159, %c0_160] : memref<2x1x22x22xf32, #tpu.memory_space<vmem>>, vector<1x1x16x22xf32>
    %216 = vector.shape_cast %215 : vector<1x1x16x22xf32> to vector<1x16x22xf32>
    %c14_161 = arith.constant 14 : index
    %217 = memref.load %arg2[%c14_161] : memref<98xf32, #tpu.memory_space<smem>>
    %218 = vector.extract_strided_slice %216 {offsets = [0, 0, 0], sizes = [1, 16, 16], strides = [1, 1, 1]} : vector<1x16x22xf32> to vector<1x16x16xf32>
    %219 = vector.broadcast %217 : f32 to vector<1x16x16xf32>
    %220 = arith.mulf %219, %218 : vector<1x16x16xf32>
    %221 = arith.addf %214, %220 : vector<1x16x16xf32>
    %c15_162 = arith.constant 15 : index
    %222 = memref.load %arg2[%c15_162] : memref<98xf32, #tpu.memory_space<smem>>
    %223 = vector.extract_strided_slice %216 {offsets = [0, 0, 1], sizes = [1, 16, 16], strides = [1, 1, 1]} : vector<1x16x22xf32> to vector<1x16x16xf32>
    %224 = vector.broadcast %222 : f32 to vector<1x16x16xf32>
    %225 = arith.mulf %224, %223 : vector<1x16x16xf32>
    %226 = arith.addf %221, %225 : vector<1x16x16xf32>
    %c16_163 = arith.constant 16 : index
    %227 = memref.load %arg2[%c16_163] : memref<98xf32, #tpu.memory_space<smem>>
    %228 = vector.extract_strided_slice %216 {offsets = [0, 0, 2], sizes = [1, 16, 16], strides = [1, 1, 1]} : vector<1x16x22xf32> to vector<1x16x16xf32>
    %229 = vector.broadcast %227 : f32 to vector<1x16x16xf32>
    %230 = arith.mulf %229, %228 : vector<1x16x16xf32>
    %231 = arith.addf %226, %230 : vector<1x16x16xf32>
    %c17_164 = arith.constant 17 : index
    %232 = memref.load %arg2[%c17_164] : memref<98xf32, #tpu.memory_space<smem>>
    %233 = vector.extract_strided_slice %216 {offsets = [0, 0, 3], sizes = [1, 16, 16], strides = [1, 1, 1]} : vector<1x16x22xf32> to vector<1x16x16xf32>
    %234 = vector.broadcast %232 : f32 to vector<1x16x16xf32>
    %235 = arith.mulf %234, %233 : vector<1x16x16xf32>
    %236 = arith.addf %231, %235 : vector<1x16x16xf32>
    %c18_165 = arith.constant 18 : index
    %237 = memref.load %arg2[%c18_165] : memref<98xf32, #tpu.memory_space<smem>>
    %238 = vector.extract_strided_slice %216 {offsets = [0, 0, 4], sizes = [1, 16, 16], strides = [1, 1, 1]} : vector<1x16x22xf32> to vector<1x16x16xf32>
    %239 = vector.broadcast %237 : f32 to vector<1x16x16xf32>
    %240 = arith.mulf %239, %238 : vector<1x16x16xf32>
    %241 = arith.addf %236, %240 : vector<1x16x16xf32>
    %c19_166 = arith.constant 19 : index
    %242 = memref.load %arg2[%c19_166] : memref<98xf32, #tpu.memory_space<smem>>
    %243 = vector.extract_strided_slice %216 {offsets = [0, 0, 5], sizes = [1, 16, 16], strides = [1, 1, 1]} : vector<1x16x22xf32> to vector<1x16x16xf32>
    %244 = vector.broadcast %242 : f32 to vector<1x16x16xf32>
    %245 = arith.mulf %244, %243 : vector<1x16x16xf32>
    %246 = arith.addf %241, %245 : vector<1x16x16xf32>
    %c20 = arith.constant 20 : index
    %247 = memref.load %arg2[%c20] : memref<98xf32, #tpu.memory_space<smem>>
    %248 = vector.extract_strided_slice %216 {offsets = [0, 0, 6], sizes = [1, 16, 16], strides = [1, 1, 1]} : vector<1x16x22xf32> to vector<1x16x16xf32>
    %249 = vector.broadcast %247 : f32 to vector<1x16x16xf32>
    %250 = arith.mulf %249, %248 : vector<1x16x16xf32>
    %251 = arith.addf %246, %250 : vector<1x16x16xf32>
    %c0_167 = arith.constant 0 : index
    %c0_168 = arith.constant 0 : index
    %c3_169 = arith.constant 3 : index
    %c0_170 = arith.constant 0 : index
    %252 = vector.load %arg4[%c0_167, %c0_168, %c3_169, %c0_170] : memref<2x1x22x22xf32, #tpu.memory_space<vmem>>, vector<1x1x16x22xf32>
    %253 = vector.shape_cast %252 : vector<1x1x16x22xf32> to vector<1x16x22xf32>
    %c21 = arith.constant 21 : index
    %254 = memref.load %arg2[%c21] : memref<98xf32, #tpu.memory_space<smem>>
    %255 = vector.extract_strided_slice %253 {offsets = [0, 0, 0], sizes = [1, 16, 16], strides = [1, 1, 1]} : vector<1x16x22xf32> to vector<1x16x16xf32>
    %256 = vector.broadcast %254 : f32 to vector<1x16x16xf32>
    %257 = arith.mulf %256, %255 : vector<1x16x16xf32>
    %258 = arith.addf %251, %257 : vector<1x16x16xf32>
    %c22 = arith.constant 22 : index
    %259 = memref.load %arg2[%c22] : memref<98xf32, #tpu.memory_space<smem>>
    %260 = vector.extract_strided_slice %253 {offsets = [0, 0, 1], sizes = [1, 16, 16], strides = [1, 1, 1]} : vector<1x16x22xf32> to vector<1x16x16xf32>
    %261 = vector.broadcast %259 : f32 to vector<1x16x16xf32>
    %262 = arith.mulf %261, %260 : vector<1x16x16xf32>
    %263 = arith.addf %258, %262 : vector<1x16x16xf32>
    %c23 = arith.constant 23 : index
    %264 = memref.load %arg2[%c23] : memref<98xf32, #tpu.memory_space<smem>>
    %265 = vector.extract_strided_slice %253 {offsets = [0, 0, 2], sizes = [1, 16, 16], strides = [1, 1, 1]} : vector<1x16x22xf32> to vector<1x16x16xf32>
    %266 = vector.broadcast %264 : f32 to vector<1x16x16xf32>
    %267 = arith.mulf %266, %265 : vector<1x16x16xf32>
    %268 = arith.addf %263, %267 : vector<1x16x16xf32>
    %c24 = arith.constant 24 : index
    %269 = memref.load %arg2[%c24] : memref<98xf32, #tpu.memory_space<smem>>
    %270 = vector.extract_strided_slice %253 {offsets = [0, 0, 3], sizes = [1, 16, 16], strides = [1, 1, 1]} : vector<1x16x22xf32> to vector<1x16x16xf32>
    %271 = vector.broadcast %269 : f32 to vector<1x16x16xf32>
    %272 = arith.mulf %271, %270 : vector<1x16x16xf32>
    %273 = arith.addf %268, %272 : vector<1x16x16xf32>
    %c25 = arith.constant 25 : index
    %274 = memref.load %arg2[%c25] : memref<98xf32, #tpu.memory_space<smem>>
    %275 = vector.extract_strided_slice %253 {offsets = [0, 0, 4], sizes = [1, 16, 16], strides = [1, 1, 1]} : vector<1x16x22xf32> to vector<1x16x16xf32>
    %276 = vector.broadcast %274 : f32 to vector<1x16x16xf32>
    %277 = arith.mulf %276, %275 : vector<1x16x16xf32>
    %278 = arith.addf %273, %277 : vector<1x16x16xf32>
    %c26 = arith.constant 26 : index
    %279 = memref.load %arg2[%c26] : memref<98xf32, #tpu.memory_space<smem>>
    %280 = vector.extract_strided_slice %253 {offsets = [0, 0, 5], sizes = [1, 16, 16], strides = [1, 1, 1]} : vector<1x16x22xf32> to vector<1x16x16xf32>
    %281 = vector.broadcast %279 : f32 to vector<1x16x16xf32>
    %282 = arith.mulf %281, %280 : vector<1x16x16xf32>
    %283 = arith.addf %278, %282 : vector<1x16x16xf32>
    %c27 = arith.constant 27 : index
    %284 = memref.load %arg2[%c27] : memref<98xf32, #tpu.memory_space<smem>>
    %285 = vector.extract_strided_slice %253 {offsets = [0, 0, 6], sizes = [1, 16, 16], strides = [1, 1, 1]} : vector<1x16x22xf32> to vector<1x16x16xf32>
    %286 = vector.broadcast %284 : f32 to vector<1x16x16xf32>
    %287 = arith.mulf %286, %285 : vector<1x16x16xf32>
    %288 = arith.addf %283, %287 : vector<1x16x16xf32>
    %c0_171 = arith.constant 0 : index
    %c0_172 = arith.constant 0 : index
    %c4_173 = arith.constant 4 : index
    %c0_174 = arith.constant 0 : index
    %289 = vector.load %arg4[%c0_171, %c0_172, %c4_173, %c0_174] : memref<2x1x22x22xf32, #tpu.memory_space<vmem>>, vector<1x1x16x22xf32>
    %290 = vector.shape_cast %289 : vector<1x1x16x22xf32> to vector<1x16x22xf32>
    %c28 = arith.constant 28 : index
    %291 = memref.load %arg2[%c28] : memref<98xf32, #tpu.memory_space<smem>>
    %292 = vector.extract_strided_slice %290 {offsets = [0, 0, 0], sizes = [1, 16, 16], strides = [1, 1, 1]} : vector<1x16x22xf32> to vector<1x16x16xf32>
    %293 = vector.broadcast %291 : f32 to vector<1x16x16xf32>
    %294 = arith.mulf %293, %292 : vector<1x16x16xf32>
    %295 = arith.addf %288, %294 : vector<1x16x16xf32>
    %c29 = arith.constant 29 : index
    %296 = memref.load %arg2[%c29] : memref<98xf32, #tpu.memory_space<smem>>
    %297 = vector.extract_strided_slice %290 {offsets = [0, 0, 1], sizes = [1, 16, 16], strides = [1, 1, 1]} : vector<1x16x22xf32> to vector<1x16x16xf32>
    %298 = vector.broadcast %296 : f32 to vector<1x16x16xf32>
    %299 = arith.mulf %298, %297 : vector<1x16x16xf32>
    %300 = arith.addf %295, %299 : vector<1x16x16xf32>
    %c30 = arith.constant 30 : index
    %301 = memref.load %arg2[%c30] : memref<98xf32, #tpu.memory_space<smem>>
    %302 = vector.extract_strided_slice %290 {offsets = [0, 0, 2], sizes = [1, 16, 16], strides = [1, 1, 1]} : vector<1x16x22xf32> to vector<1x16x16xf32>
    %303 = vector.broadcast %301 : f32 to vector<1x16x16xf32>
    %304 = arith.mulf %303, %302 : vector<1x16x16xf32>
    %305 = arith.addf %300, %304 : vector<1x16x16xf32>
    %c31 = arith.constant 31 : index
    %306 = memref.load %arg2[%c31] : memref<98xf32, #tpu.memory_space<smem>>
    %307 = vector.extract_strided_slice %290 {offsets = [0, 0, 3], sizes = [1, 16, 16], strides = [1, 1, 1]} : vector<1x16x22xf32> to vector<1x16x16xf32>
    %308 = vector.broadcast %306 : f32 to vector<1x16x16xf32>
    %309 = arith.mulf %308, %307 : vector<1x16x16xf32>
    %310 = arith.addf %305, %309 : vector<1x16x16xf32>
    %c32 = arith.constant 32 : index
    %311 = memref.load %arg2[%c32] : memref<98xf32, #tpu.memory_space<smem>>
    %312 = vector.extract_strided_slice %290 {offsets = [0, 0, 4], sizes = [1, 16, 16], strides = [1, 1, 1]} : vector<1x16x22xf32> to vector<1x16x16xf32>
    %313 = vector.broadcast %311 : f32 to vector<1x16x16xf32>
    %314 = arith.mulf %313, %312 : vector<1x16x16xf32>
    %315 = arith.addf %310, %314 : vector<1x16x16xf32>
    %c33 = arith.constant 33 : index
    %316 = memref.load %arg2[%c33] : memref<98xf32, #tpu.memory_space<smem>>
    %317 = vector.extract_strided_slice %290 {offsets = [0, 0, 5], sizes = [1, 16, 16], strides = [1, 1, 1]} : vector<1x16x22xf32> to vector<1x16x16xf32>
    %318 = vector.broadcast %316 : f32 to vector<1x16x16xf32>
    %319 = arith.mulf %318, %317 : vector<1x16x16xf32>
    %320 = arith.addf %315, %319 : vector<1x16x16xf32>
    %c34 = arith.constant 34 : index
    %321 = memref.load %arg2[%c34] : memref<98xf32, #tpu.memory_space<smem>>
    %322 = vector.extract_strided_slice %290 {offsets = [0, 0, 6], sizes = [1, 16, 16], strides = [1, 1, 1]} : vector<1x16x22xf32> to vector<1x16x16xf32>
    %323 = vector.broadcast %321 : f32 to vector<1x16x16xf32>
    %324 = arith.mulf %323, %322 : vector<1x16x16xf32>
    %325 = arith.addf %320, %324 : vector<1x16x16xf32>
    %c0_175 = arith.constant 0 : index
    %c0_176 = arith.constant 0 : index
    %c5_177 = arith.constant 5 : index
    %c0_178 = arith.constant 0 : index
    %326 = vector.load %arg4[%c0_175, %c0_176, %c5_177, %c0_178] : memref<2x1x22x22xf32, #tpu.memory_space<vmem>>, vector<1x1x16x22xf32>
    %327 = vector.shape_cast %326 : vector<1x1x16x22xf32> to vector<1x16x22xf32>
    %c35 = arith.constant 35 : index
    %328 = memref.load %arg2[%c35] : memref<98xf32, #tpu.memory_space<smem>>
    %329 = vector.extract_strided_slice %327 {offsets = [0, 0, 0], sizes = [1, 16, 16], strides = [1, 1, 1]} : vector<1x16x22xf32> to vector<1x16x16xf32>
    %330 = vector.broadcast %328 : f32 to vector<1x16x16xf32>
    %331 = arith.mulf %330, %329 : vector<1x16x16xf32>
    %332 = arith.addf %325, %331 : vector<1x16x16xf32>
    %c36 = arith.constant 36 : index
    %333 = memref.load %arg2[%c36] : memref<98xf32, #tpu.memory_space<smem>>
    %334 = vector.extract_strided_slice %327 {offsets = [0, 0, 1], sizes = [1, 16, 16], strides = [1, 1, 1]} : vector<1x16x22xf32> to vector<1x16x16xf32>
    %335 = vector.broadcast %333 : f32 to vector<1x16x16xf32>
    %336 = arith.mulf %335, %334 : vector<1x16x16xf32>
    %337 = arith.addf %332, %336 : vector<1x16x16xf32>
    %c37 = arith.constant 37 : index
    %338 = memref.load %arg2[%c37] : memref<98xf32, #tpu.memory_space<smem>>
    %339 = vector.extract_strided_slice %327 {offsets = [0, 0, 2], sizes = [1, 16, 16], strides = [1, 1, 1]} : vector<1x16x22xf32> to vector<1x16x16xf32>
    %340 = vector.broadcast %338 : f32 to vector<1x16x16xf32>
    %341 = arith.mulf %340, %339 : vector<1x16x16xf32>
    %342 = arith.addf %337, %341 : vector<1x16x16xf32>
    %c38 = arith.constant 38 : index
    %343 = memref.load %arg2[%c38] : memref<98xf32, #tpu.memory_space<smem>>
    %344 = vector.extract_strided_slice %327 {offsets = [0, 0, 3], sizes = [1, 16, 16], strides = [1, 1, 1]} : vector<1x16x22xf32> to vector<1x16x16xf32>
    %345 = vector.broadcast %343 : f32 to vector<1x16x16xf32>
    %346 = arith.mulf %345, %344 : vector<1x16x16xf32>
    %347 = arith.addf %342, %346 : vector<1x16x16xf32>
    %c39 = arith.constant 39 : index
    %348 = memref.load %arg2[%c39] : memref<98xf32, #tpu.memory_space<smem>>
    %349 = vector.extract_strided_slice %327 {offsets = [0, 0, 4], sizes = [1, 16, 16], strides = [1, 1, 1]} : vector<1x16x22xf32> to vector<1x16x16xf32>
    %350 = vector.broadcast %348 : f32 to vector<1x16x16xf32>
    %351 = arith.mulf %350, %349 : vector<1x16x16xf32>
    %352 = arith.addf %347, %351 : vector<1x16x16xf32>
    %c40 = arith.constant 40 : index
    %353 = memref.load %arg2[%c40] : memref<98xf32, #tpu.memory_space<smem>>
    %354 = vector.extract_strided_slice %327 {offsets = [0, 0, 5], sizes = [1, 16, 16], strides = [1, 1, 1]} : vector<1x16x22xf32> to vector<1x16x16xf32>
    %355 = vector.broadcast %353 : f32 to vector<1x16x16xf32>
    %356 = arith.mulf %355, %354 : vector<1x16x16xf32>
    %357 = arith.addf %352, %356 : vector<1x16x16xf32>
    %c41 = arith.constant 41 : index
    %358 = memref.load %arg2[%c41] : memref<98xf32, #tpu.memory_space<smem>>
    %359 = vector.extract_strided_slice %327 {offsets = [0, 0, 6], sizes = [1, 16, 16], strides = [1, 1, 1]} : vector<1x16x22xf32> to vector<1x16x16xf32>
    %360 = vector.broadcast %358 : f32 to vector<1x16x16xf32>
    %361 = arith.mulf %360, %359 : vector<1x16x16xf32>
    %362 = arith.addf %357, %361 : vector<1x16x16xf32>
    %c0_179 = arith.constant 0 : index
    %c0_180 = arith.constant 0 : index
    %c6_181 = arith.constant 6 : index
    %c0_182 = arith.constant 0 : index
    %363 = vector.load %arg4[%c0_179, %c0_180, %c6_181, %c0_182] : memref<2x1x22x22xf32, #tpu.memory_space<vmem>>, vector<1x1x16x22xf32>
    %364 = vector.shape_cast %363 : vector<1x1x16x22xf32> to vector<1x16x22xf32>
    %c42 = arith.constant 42 : index
    %365 = memref.load %arg2[%c42] : memref<98xf32, #tpu.memory_space<smem>>
    %366 = vector.extract_strided_slice %364 {offsets = [0, 0, 0], sizes = [1, 16, 16], strides = [1, 1, 1]} : vector<1x16x22xf32> to vector<1x16x16xf32>
    %367 = vector.broadcast %365 : f32 to vector<1x16x16xf32>
    %368 = arith.mulf %367, %366 : vector<1x16x16xf32>
    %369 = arith.addf %362, %368 : vector<1x16x16xf32>
    %c43 = arith.constant 43 : index
    %370 = memref.load %arg2[%c43] : memref<98xf32, #tpu.memory_space<smem>>
    %371 = vector.extract_strided_slice %364 {offsets = [0, 0, 1], sizes = [1, 16, 16], strides = [1, 1, 1]} : vector<1x16x22xf32> to vector<1x16x16xf32>
    %372 = vector.broadcast %370 : f32 to vector<1x16x16xf32>
    %373 = arith.mulf %372, %371 : vector<1x16x16xf32>
    %374 = arith.addf %369, %373 : vector<1x16x16xf32>
    %c44 = arith.constant 44 : index
    %375 = memref.load %arg2[%c44] : memref<98xf32, #tpu.memory_space<smem>>
    %376 = vector.extract_strided_slice %364 {offsets = [0, 0, 2], sizes = [1, 16, 16], strides = [1, 1, 1]} : vector<1x16x22xf32> to vector<1x16x16xf32>
    %377 = vector.broadcast %375 : f32 to vector<1x16x16xf32>
    %378 = arith.mulf %377, %376 : vector<1x16x16xf32>
    %379 = arith.addf %374, %378 : vector<1x16x16xf32>
    %c45 = arith.constant 45 : index
    %380 = memref.load %arg2[%c45] : memref<98xf32, #tpu.memory_space<smem>>
    %381 = vector.extract_strided_slice %364 {offsets = [0, 0, 3], sizes = [1, 16, 16], strides = [1, 1, 1]} : vector<1x16x22xf32> to vector<1x16x16xf32>
    %382 = vector.broadcast %380 : f32 to vector<1x16x16xf32>
    %383 = arith.mulf %382, %381 : vector<1x16x16xf32>
    %384 = arith.addf %379, %383 : vector<1x16x16xf32>
    %c46 = arith.constant 46 : index
    %385 = memref.load %arg2[%c46] : memref<98xf32, #tpu.memory_space<smem>>
    %386 = vector.extract_strided_slice %364 {offsets = [0, 0, 4], sizes = [1, 16, 16], strides = [1, 1, 1]} : vector<1x16x22xf32> to vector<1x16x16xf32>
    %387 = vector.broadcast %385 : f32 to vector<1x16x16xf32>
    %388 = arith.mulf %387, %386 : vector<1x16x16xf32>
    %389 = arith.addf %384, %388 : vector<1x16x16xf32>
    %c47 = arith.constant 47 : index
    %390 = memref.load %arg2[%c47] : memref<98xf32, #tpu.memory_space<smem>>
    %391 = vector.extract_strided_slice %364 {offsets = [0, 0, 5], sizes = [1, 16, 16], strides = [1, 1, 1]} : vector<1x16x22xf32> to vector<1x16x16xf32>
    %392 = vector.broadcast %390 : f32 to vector<1x16x16xf32>
    %393 = arith.mulf %392, %391 : vector<1x16x16xf32>
    %394 = arith.addf %389, %393 : vector<1x16x16xf32>
    %c48 = arith.constant 48 : index
    %395 = memref.load %arg2[%c48] : memref<98xf32, #tpu.memory_space<smem>>
    %396 = vector.extract_strided_slice %364 {offsets = [0, 0, 6], sizes = [1, 16, 16], strides = [1, 1, 1]} : vector<1x16x22xf32> to vector<1x16x16xf32>
    %397 = vector.broadcast %395 : f32 to vector<1x16x16xf32>
    %398 = arith.mulf %397, %396 : vector<1x16x16xf32>
    %399 = arith.addf %394, %398 : vector<1x16x16xf32>
    %c1_183 = arith.constant 1 : index
    %c0_184 = arith.constant 0 : index
    %c0_185 = arith.constant 0 : index
    %c0_186 = arith.constant 0 : index
    %400 = vector.load %arg4[%c1_183, %c0_184, %c0_185, %c0_186] : memref<2x1x22x22xf32, #tpu.memory_space<vmem>>, vector<1x1x16x22xf32>
    %401 = vector.shape_cast %400 : vector<1x1x16x22xf32> to vector<1x16x22xf32>
    %c49 = arith.constant 49 : index
    %402 = memref.load %arg2[%c49] : memref<98xf32, #tpu.memory_space<smem>>
    %403 = vector.extract_strided_slice %401 {offsets = [0, 0, 0], sizes = [1, 16, 16], strides = [1, 1, 1]} : vector<1x16x22xf32> to vector<1x16x16xf32>
    %404 = vector.broadcast %402 : f32 to vector<1x16x16xf32>
    %405 = arith.mulf %404, %403 : vector<1x16x16xf32>
    %406 = arith.addf %399, %405 : vector<1x16x16xf32>
    %c50 = arith.constant 50 : index
    %407 = memref.load %arg2[%c50] : memref<98xf32, #tpu.memory_space<smem>>
    %408 = vector.extract_strided_slice %401 {offsets = [0, 0, 1], sizes = [1, 16, 16], strides = [1, 1, 1]} : vector<1x16x22xf32> to vector<1x16x16xf32>
    %409 = vector.broadcast %407 : f32 to vector<1x16x16xf32>
    %410 = arith.mulf %409, %408 : vector<1x16x16xf32>
    %411 = arith.addf %406, %410 : vector<1x16x16xf32>
    %c51 = arith.constant 51 : index
    %412 = memref.load %arg2[%c51] : memref<98xf32, #tpu.memory_space<smem>>
    %413 = vector.extract_strided_slice %401 {offsets = [0, 0, 2], sizes = [1, 16, 16], strides = [1, 1, 1]} : vector<1x16x22xf32> to vector<1x16x16xf32>
    %414 = vector.broadcast %412 : f32 to vector<1x16x16xf32>
    %415 = arith.mulf %414, %413 : vector<1x16x16xf32>
    %416 = arith.addf %411, %415 : vector<1x16x16xf32>
    %c52 = arith.constant 52 : index
    %417 = memref.load %arg2[%c52] : memref<98xf32, #tpu.memory_space<smem>>
    %418 = vector.extract_strided_slice %401 {offsets = [0, 0, 3], sizes = [1, 16, 16], strides = [1, 1, 1]} : vector<1x16x22xf32> to vector<1x16x16xf32>
    %419 = vector.broadcast %417 : f32 to vector<1x16x16xf32>
    %420 = arith.mulf %419, %418 : vector<1x16x16xf32>
    %421 = arith.addf %416, %420 : vector<1x16x16xf32>
    %c53 = arith.constant 53 : index
    %422 = memref.load %arg2[%c53] : memref<98xf32, #tpu.memory_space<smem>>
    %423 = vector.extract_strided_slice %401 {offsets = [0, 0, 4], sizes = [1, 16, 16], strides = [1, 1, 1]} : vector<1x16x22xf32> to vector<1x16x16xf32>
    %424 = vector.broadcast %422 : f32 to vector<1x16x16xf32>
    %425 = arith.mulf %424, %423 : vector<1x16x16xf32>
    %426 = arith.addf %421, %425 : vector<1x16x16xf32>
    %c54 = arith.constant 54 : index
    %427 = memref.load %arg2[%c54] : memref<98xf32, #tpu.memory_space<smem>>
    %428 = vector.extract_strided_slice %401 {offsets = [0, 0, 5], sizes = [1, 16, 16], strides = [1, 1, 1]} : vector<1x16x22xf32> to vector<1x16x16xf32>
    %429 = vector.broadcast %427 : f32 to vector<1x16x16xf32>
    %430 = arith.mulf %429, %428 : vector<1x16x16xf32>
    %431 = arith.addf %426, %430 : vector<1x16x16xf32>
    %c55 = arith.constant 55 : index
    %432 = memref.load %arg2[%c55] : memref<98xf32, #tpu.memory_space<smem>>
    %433 = vector.extract_strided_slice %401 {offsets = [0, 0, 6], sizes = [1, 16, 16], strides = [1, 1, 1]} : vector<1x16x22xf32> to vector<1x16x16xf32>
    %434 = vector.broadcast %432 : f32 to vector<1x16x16xf32>
    %435 = arith.mulf %434, %433 : vector<1x16x16xf32>
    %436 = arith.addf %431, %435 : vector<1x16x16xf32>
    %c1_187 = arith.constant 1 : index
    %c0_188 = arith.constant 0 : index
    %c1_189 = arith.constant 1 : index
    %c0_190 = arith.constant 0 : index
    %437 = vector.load %arg4[%c1_187, %c0_188, %c1_189, %c0_190] : memref<2x1x22x22xf32, #tpu.memory_space<vmem>>, vector<1x1x16x22xf32>
    %438 = vector.shape_cast %437 : vector<1x1x16x22xf32> to vector<1x16x22xf32>
    %c56 = arith.constant 56 : index
    %439 = memref.load %arg2[%c56] : memref<98xf32, #tpu.memory_space<smem>>
    %440 = vector.extract_strided_slice %438 {offsets = [0, 0, 0], sizes = [1, 16, 16], strides = [1, 1, 1]} : vector<1x16x22xf32> to vector<1x16x16xf32>
    %441 = vector.broadcast %439 : f32 to vector<1x16x16xf32>
    %442 = arith.mulf %441, %440 : vector<1x16x16xf32>
    %443 = arith.addf %436, %442 : vector<1x16x16xf32>
    %c57 = arith.constant 57 : index
    %444 = memref.load %arg2[%c57] : memref<98xf32, #tpu.memory_space<smem>>
    %445 = vector.extract_strided_slice %438 {offsets = [0, 0, 1], sizes = [1, 16, 16], strides = [1, 1, 1]} : vector<1x16x22xf32> to vector<1x16x16xf32>
    %446 = vector.broadcast %444 : f32 to vector<1x16x16xf32>
    %447 = arith.mulf %446, %445 : vector<1x16x16xf32>
    %448 = arith.addf %443, %447 : vector<1x16x16xf32>
    %c58 = arith.constant 58 : index
    %449 = memref.load %arg2[%c58] : memref<98xf32, #tpu.memory_space<smem>>
    %450 = vector.extract_strided_slice %438 {offsets = [0, 0, 2], sizes = [1, 16, 16], strides = [1, 1, 1]} : vector<1x16x22xf32> to vector<1x16x16xf32>
    %451 = vector.broadcast %449 : f32 to vector<1x16x16xf32>
    %452 = arith.mulf %451, %450 : vector<1x16x16xf32>
    %453 = arith.addf %448, %452 : vector<1x16x16xf32>
    %c59 = arith.constant 59 : index
    %454 = memref.load %arg2[%c59] : memref<98xf32, #tpu.memory_space<smem>>
    %455 = vector.extract_strided_slice %438 {offsets = [0, 0, 3], sizes = [1, 16, 16], strides = [1, 1, 1]} : vector<1x16x22xf32> to vector<1x16x16xf32>
    %456 = vector.broadcast %454 : f32 to vector<1x16x16xf32>
    %457 = arith.mulf %456, %455 : vector<1x16x16xf32>
    %458 = arith.addf %453, %457 : vector<1x16x16xf32>
    %c60 = arith.constant 60 : index
    %459 = memref.load %arg2[%c60] : memref<98xf32, #tpu.memory_space<smem>>
    %460 = vector.extract_strided_slice %438 {offsets = [0, 0, 4], sizes = [1, 16, 16], strides = [1, 1, 1]} : vector<1x16x22xf32> to vector<1x16x16xf32>
    %461 = vector.broadcast %459 : f32 to vector<1x16x16xf32>
    %462 = arith.mulf %461, %460 : vector<1x16x16xf32>
    %463 = arith.addf %458, %462 : vector<1x16x16xf32>
    %c61 = arith.constant 61 : index
    %464 = memref.load %arg2[%c61] : memref<98xf32, #tpu.memory_space<smem>>
    %465 = vector.extract_strided_slice %438 {offsets = [0, 0, 5], sizes = [1, 16, 16], strides = [1, 1, 1]} : vector<1x16x22xf32> to vector<1x16x16xf32>
    %466 = vector.broadcast %464 : f32 to vector<1x16x16xf32>
    %467 = arith.mulf %466, %465 : vector<1x16x16xf32>
    %468 = arith.addf %463, %467 : vector<1x16x16xf32>
    %c62 = arith.constant 62 : index
    %469 = memref.load %arg2[%c62] : memref<98xf32, #tpu.memory_space<smem>>
    %470 = vector.extract_strided_slice %438 {offsets = [0, 0, 6], sizes = [1, 16, 16], strides = [1, 1, 1]} : vector<1x16x22xf32> to vector<1x16x16xf32>
    %471 = vector.broadcast %469 : f32 to vector<1x16x16xf32>
    %472 = arith.mulf %471, %470 : vector<1x16x16xf32>
    %473 = arith.addf %468, %472 : vector<1x16x16xf32>
    %c1_191 = arith.constant 1 : index
    %c0_192 = arith.constant 0 : index
    %c2_193 = arith.constant 2 : index
    %c0_194 = arith.constant 0 : index
    %474 = vector.load %arg4[%c1_191, %c0_192, %c2_193, %c0_194] : memref<2x1x22x22xf32, #tpu.memory_space<vmem>>, vector<1x1x16x22xf32>
    %475 = vector.shape_cast %474 : vector<1x1x16x22xf32> to vector<1x16x22xf32>
    %c63 = arith.constant 63 : index
    %476 = memref.load %arg2[%c63] : memref<98xf32, #tpu.memory_space<smem>>
    %477 = vector.extract_strided_slice %475 {offsets = [0, 0, 0], sizes = [1, 16, 16], strides = [1, 1, 1]} : vector<1x16x22xf32> to vector<1x16x16xf32>
    %478 = vector.broadcast %476 : f32 to vector<1x16x16xf32>
    %479 = arith.mulf %478, %477 : vector<1x16x16xf32>
    %480 = arith.addf %473, %479 : vector<1x16x16xf32>
    %c64 = arith.constant 64 : index
    %481 = memref.load %arg2[%c64] : memref<98xf32, #tpu.memory_space<smem>>
    %482 = vector.extract_strided_slice %475 {offsets = [0, 0, 1], sizes = [1, 16, 16], strides = [1, 1, 1]} : vector<1x16x22xf32> to vector<1x16x16xf32>
    %483 = vector.broadcast %481 : f32 to vector<1x16x16xf32>
    %484 = arith.mulf %483, %482 : vector<1x16x16xf32>
    %485 = arith.addf %480, %484 : vector<1x16x16xf32>
    %c65 = arith.constant 65 : index
    %486 = memref.load %arg2[%c65] : memref<98xf32, #tpu.memory_space<smem>>
    %487 = vector.extract_strided_slice %475 {offsets = [0, 0, 2], sizes = [1, 16, 16], strides = [1, 1, 1]} : vector<1x16x22xf32> to vector<1x16x16xf32>
    %488 = vector.broadcast %486 : f32 to vector<1x16x16xf32>
    %489 = arith.mulf %488, %487 : vector<1x16x16xf32>
    %490 = arith.addf %485, %489 : vector<1x16x16xf32>
    %c66 = arith.constant 66 : index
    %491 = memref.load %arg2[%c66] : memref<98xf32, #tpu.memory_space<smem>>
    %492 = vector.extract_strided_slice %475 {offsets = [0, 0, 3], sizes = [1, 16, 16], strides = [1, 1, 1]} : vector<1x16x22xf32> to vector<1x16x16xf32>
    %493 = vector.broadcast %491 : f32 to vector<1x16x16xf32>
    %494 = arith.mulf %493, %492 : vector<1x16x16xf32>
    %495 = arith.addf %490, %494 : vector<1x16x16xf32>
    %c67 = arith.constant 67 : index
    %496 = memref.load %arg2[%c67] : memref<98xf32, #tpu.memory_space<smem>>
    %497 = vector.extract_strided_slice %475 {offsets = [0, 0, 4], sizes = [1, 16, 16], strides = [1, 1, 1]} : vector<1x16x22xf32> to vector<1x16x16xf32>
    %498 = vector.broadcast %496 : f32 to vector<1x16x16xf32>
    %499 = arith.mulf %498, %497 : vector<1x16x16xf32>
    %500 = arith.addf %495, %499 : vector<1x16x16xf32>
    %c68 = arith.constant 68 : index
    %501 = memref.load %arg2[%c68] : memref<98xf32, #tpu.memory_space<smem>>
    %502 = vector.extract_strided_slice %475 {offsets = [0, 0, 5], sizes = [1, 16, 16], strides = [1, 1, 1]} : vector<1x16x22xf32> to vector<1x16x16xf32>
    %503 = vector.broadcast %501 : f32 to vector<1x16x16xf32>
    %504 = arith.mulf %503, %502 : vector<1x16x16xf32>
    %505 = arith.addf %500, %504 : vector<1x16x16xf32>
    %c69 = arith.constant 69 : index
    %506 = memref.load %arg2[%c69] : memref<98xf32, #tpu.memory_space<smem>>
    %507 = vector.extract_strided_slice %475 {offsets = [0, 0, 6], sizes = [1, 16, 16], strides = [1, 1, 1]} : vector<1x16x22xf32> to vector<1x16x16xf32>
    %508 = vector.broadcast %506 : f32 to vector<1x16x16xf32>
    %509 = arith.mulf %508, %507 : vector<1x16x16xf32>
    %510 = arith.addf %505, %509 : vector<1x16x16xf32>
    %c1_195 = arith.constant 1 : index
    %c0_196 = arith.constant 0 : index
    %c3_197 = arith.constant 3 : index
    %c0_198 = arith.constant 0 : index
    %511 = vector.load %arg4[%c1_195, %c0_196, %c3_197, %c0_198] : memref<2x1x22x22xf32, #tpu.memory_space<vmem>>, vector<1x1x16x22xf32>
    %512 = vector.shape_cast %511 : vector<1x1x16x22xf32> to vector<1x16x22xf32>
    %c70 = arith.constant 70 : index
    %513 = memref.load %arg2[%c70] : memref<98xf32, #tpu.memory_space<smem>>
    %514 = vector.extract_strided_slice %512 {offsets = [0, 0, 0], sizes = [1, 16, 16], strides = [1, 1, 1]} : vector<1x16x22xf32> to vector<1x16x16xf32>
    %515 = vector.broadcast %513 : f32 to vector<1x16x16xf32>
    %516 = arith.mulf %515, %514 : vector<1x16x16xf32>
    %517 = arith.addf %510, %516 : vector<1x16x16xf32>
    %c71 = arith.constant 71 : index
    %518 = memref.load %arg2[%c71] : memref<98xf32, #tpu.memory_space<smem>>
    %519 = vector.extract_strided_slice %512 {offsets = [0, 0, 1], sizes = [1, 16, 16], strides = [1, 1, 1]} : vector<1x16x22xf32> to vector<1x16x16xf32>
    %520 = vector.broadcast %518 : f32 to vector<1x16x16xf32>
    %521 = arith.mulf %520, %519 : vector<1x16x16xf32>
    %522 = arith.addf %517, %521 : vector<1x16x16xf32>
    %c72 = arith.constant 72 : index
    %523 = memref.load %arg2[%c72] : memref<98xf32, #tpu.memory_space<smem>>
    %524 = vector.extract_strided_slice %512 {offsets = [0, 0, 2], sizes = [1, 16, 16], strides = [1, 1, 1]} : vector<1x16x22xf32> to vector<1x16x16xf32>
    %525 = vector.broadcast %523 : f32 to vector<1x16x16xf32>
    %526 = arith.mulf %525, %524 : vector<1x16x16xf32>
    %527 = arith.addf %522, %526 : vector<1x16x16xf32>
    %c73 = arith.constant 73 : index
    %528 = memref.load %arg2[%c73] : memref<98xf32, #tpu.memory_space<smem>>
    %529 = vector.extract_strided_slice %512 {offsets = [0, 0, 3], sizes = [1, 16, 16], strides = [1, 1, 1]} : vector<1x16x22xf32> to vector<1x16x16xf32>
    %530 = vector.broadcast %528 : f32 to vector<1x16x16xf32>
    %531 = arith.mulf %530, %529 : vector<1x16x16xf32>
    %532 = arith.addf %527, %531 : vector<1x16x16xf32>
    %c74 = arith.constant 74 : index
    %533 = memref.load %arg2[%c74] : memref<98xf32, #tpu.memory_space<smem>>
    %534 = vector.extract_strided_slice %512 {offsets = [0, 0, 4], sizes = [1, 16, 16], strides = [1, 1, 1]} : vector<1x16x22xf32> to vector<1x16x16xf32>
    %535 = vector.broadcast %533 : f32 to vector<1x16x16xf32>
    %536 = arith.mulf %535, %534 : vector<1x16x16xf32>
    %537 = arith.addf %532, %536 : vector<1x16x16xf32>
    %c75 = arith.constant 75 : index
    %538 = memref.load %arg2[%c75] : memref<98xf32, #tpu.memory_space<smem>>
    %539 = vector.extract_strided_slice %512 {offsets = [0, 0, 5], sizes = [1, 16, 16], strides = [1, 1, 1]} : vector<1x16x22xf32> to vector<1x16x16xf32>
    %540 = vector.broadcast %538 : f32 to vector<1x16x16xf32>
    %541 = arith.mulf %540, %539 : vector<1x16x16xf32>
    %542 = arith.addf %537, %541 : vector<1x16x16xf32>
    %c76 = arith.constant 76 : index
    %543 = memref.load %arg2[%c76] : memref<98xf32, #tpu.memory_space<smem>>
    %544 = vector.extract_strided_slice %512 {offsets = [0, 0, 6], sizes = [1, 16, 16], strides = [1, 1, 1]} : vector<1x16x22xf32> to vector<1x16x16xf32>
    %545 = vector.broadcast %543 : f32 to vector<1x16x16xf32>
    %546 = arith.mulf %545, %544 : vector<1x16x16xf32>
    %547 = arith.addf %542, %546 : vector<1x16x16xf32>
    %c1_199 = arith.constant 1 : index
    %c0_200 = arith.constant 0 : index
    %c4_201 = arith.constant 4 : index
    %c0_202 = arith.constant 0 : index
    %548 = vector.load %arg4[%c1_199, %c0_200, %c4_201, %c0_202] : memref<2x1x22x22xf32, #tpu.memory_space<vmem>>, vector<1x1x16x22xf32>
    %549 = vector.shape_cast %548 : vector<1x1x16x22xf32> to vector<1x16x22xf32>
    %c77 = arith.constant 77 : index
    %550 = memref.load %arg2[%c77] : memref<98xf32, #tpu.memory_space<smem>>
    %551 = vector.extract_strided_slice %549 {offsets = [0, 0, 0], sizes = [1, 16, 16], strides = [1, 1, 1]} : vector<1x16x22xf32> to vector<1x16x16xf32>
    %552 = vector.broadcast %550 : f32 to vector<1x16x16xf32>
    %553 = arith.mulf %552, %551 : vector<1x16x16xf32>
    %554 = arith.addf %547, %553 : vector<1x16x16xf32>
    %c78 = arith.constant 78 : index
    %555 = memref.load %arg2[%c78] : memref<98xf32, #tpu.memory_space<smem>>
    %556 = vector.extract_strided_slice %549 {offsets = [0, 0, 1], sizes = [1, 16, 16], strides = [1, 1, 1]} : vector<1x16x22xf32> to vector<1x16x16xf32>
    %557 = vector.broadcast %555 : f32 to vector<1x16x16xf32>
    %558 = arith.mulf %557, %556 : vector<1x16x16xf32>
    %559 = arith.addf %554, %558 : vector<1x16x16xf32>
    %c79 = arith.constant 79 : index
    %560 = memref.load %arg2[%c79] : memref<98xf32, #tpu.memory_space<smem>>
    %561 = vector.extract_strided_slice %549 {offsets = [0, 0, 2], sizes = [1, 16, 16], strides = [1, 1, 1]} : vector<1x16x22xf32> to vector<1x16x16xf32>
    %562 = vector.broadcast %560 : f32 to vector<1x16x16xf32>
    %563 = arith.mulf %562, %561 : vector<1x16x16xf32>
    %564 = arith.addf %559, %563 : vector<1x16x16xf32>
    %c80 = arith.constant 80 : index
    %565 = memref.load %arg2[%c80] : memref<98xf32, #tpu.memory_space<smem>>
    %566 = vector.extract_strided_slice %549 {offsets = [0, 0, 3], sizes = [1, 16, 16], strides = [1, 1, 1]} : vector<1x16x22xf32> to vector<1x16x16xf32>
    %567 = vector.broadcast %565 : f32 to vector<1x16x16xf32>
    %568 = arith.mulf %567, %566 : vector<1x16x16xf32>
    %569 = arith.addf %564, %568 : vector<1x16x16xf32>
    %c81 = arith.constant 81 : index
    %570 = memref.load %arg2[%c81] : memref<98xf32, #tpu.memory_space<smem>>
    %571 = vector.extract_strided_slice %549 {offsets = [0, 0, 4], sizes = [1, 16, 16], strides = [1, 1, 1]} : vector<1x16x22xf32> to vector<1x16x16xf32>
    %572 = vector.broadcast %570 : f32 to vector<1x16x16xf32>
    %573 = arith.mulf %572, %571 : vector<1x16x16xf32>
    %574 = arith.addf %569, %573 : vector<1x16x16xf32>
    %c82 = arith.constant 82 : index
    %575 = memref.load %arg2[%c82] : memref<98xf32, #tpu.memory_space<smem>>
    %576 = vector.extract_strided_slice %549 {offsets = [0, 0, 5], sizes = [1, 16, 16], strides = [1, 1, 1]} : vector<1x16x22xf32> to vector<1x16x16xf32>
    %577 = vector.broadcast %575 : f32 to vector<1x16x16xf32>
    %578 = arith.mulf %577, %576 : vector<1x16x16xf32>
    %579 = arith.addf %574, %578 : vector<1x16x16xf32>
    %c83 = arith.constant 83 : index
    %580 = memref.load %arg2[%c83] : memref<98xf32, #tpu.memory_space<smem>>
    %581 = vector.extract_strided_slice %549 {offsets = [0, 0, 6], sizes = [1, 16, 16], strides = [1, 1, 1]} : vector<1x16x22xf32> to vector<1x16x16xf32>
    %582 = vector.broadcast %580 : f32 to vector<1x16x16xf32>
    %583 = arith.mulf %582, %581 : vector<1x16x16xf32>
    %584 = arith.addf %579, %583 : vector<1x16x16xf32>
    %c1_203 = arith.constant 1 : index
    %c0_204 = arith.constant 0 : index
    %c5_205 = arith.constant 5 : index
    %c0_206 = arith.constant 0 : index
    %585 = vector.load %arg4[%c1_203, %c0_204, %c5_205, %c0_206] : memref<2x1x22x22xf32, #tpu.memory_space<vmem>>, vector<1x1x16x22xf32>
    %586 = vector.shape_cast %585 : vector<1x1x16x22xf32> to vector<1x16x22xf32>
    %c84 = arith.constant 84 : index
    %587 = memref.load %arg2[%c84] : memref<98xf32, #tpu.memory_space<smem>>
    %588 = vector.extract_strided_slice %586 {offsets = [0, 0, 0], sizes = [1, 16, 16], strides = [1, 1, 1]} : vector<1x16x22xf32> to vector<1x16x16xf32>
    %589 = vector.broadcast %587 : f32 to vector<1x16x16xf32>
    %590 = arith.mulf %589, %588 : vector<1x16x16xf32>
    %591 = arith.addf %584, %590 : vector<1x16x16xf32>
    %c85 = arith.constant 85 : index
    %592 = memref.load %arg2[%c85] : memref<98xf32, #tpu.memory_space<smem>>
    %593 = vector.extract_strided_slice %586 {offsets = [0, 0, 1], sizes = [1, 16, 16], strides = [1, 1, 1]} : vector<1x16x22xf32> to vector<1x16x16xf32>
    %594 = vector.broadcast %592 : f32 to vector<1x16x16xf32>
    %595 = arith.mulf %594, %593 : vector<1x16x16xf32>
    %596 = arith.addf %591, %595 : vector<1x16x16xf32>
    %c86 = arith.constant 86 : index
    %597 = memref.load %arg2[%c86] : memref<98xf32, #tpu.memory_space<smem>>
    %598 = vector.extract_strided_slice %586 {offsets = [0, 0, 2], sizes = [1, 16, 16], strides = [1, 1, 1]} : vector<1x16x22xf32> to vector<1x16x16xf32>
    %599 = vector.broadcast %597 : f32 to vector<1x16x16xf32>
    %600 = arith.mulf %599, %598 : vector<1x16x16xf32>
    %601 = arith.addf %596, %600 : vector<1x16x16xf32>
    %c87 = arith.constant 87 : index
    %602 = memref.load %arg2[%c87] : memref<98xf32, #tpu.memory_space<smem>>
    %603 = vector.extract_strided_slice %586 {offsets = [0, 0, 3], sizes = [1, 16, 16], strides = [1, 1, 1]} : vector<1x16x22xf32> to vector<1x16x16xf32>
    %604 = vector.broadcast %602 : f32 to vector<1x16x16xf32>
    %605 = arith.mulf %604, %603 : vector<1x16x16xf32>
    %606 = arith.addf %601, %605 : vector<1x16x16xf32>
    %c88 = arith.constant 88 : index
    %607 = memref.load %arg2[%c88] : memref<98xf32, #tpu.memory_space<smem>>
    %608 = vector.extract_strided_slice %586 {offsets = [0, 0, 4], sizes = [1, 16, 16], strides = [1, 1, 1]} : vector<1x16x22xf32> to vector<1x16x16xf32>
    %609 = vector.broadcast %607 : f32 to vector<1x16x16xf32>
    %610 = arith.mulf %609, %608 : vector<1x16x16xf32>
    %611 = arith.addf %606, %610 : vector<1x16x16xf32>
    %c89 = arith.constant 89 : index
    %612 = memref.load %arg2[%c89] : memref<98xf32, #tpu.memory_space<smem>>
    %613 = vector.extract_strided_slice %586 {offsets = [0, 0, 5], sizes = [1, 16, 16], strides = [1, 1, 1]} : vector<1x16x22xf32> to vector<1x16x16xf32>
    %614 = vector.broadcast %612 : f32 to vector<1x16x16xf32>
    %615 = arith.mulf %614, %613 : vector<1x16x16xf32>
    %616 = arith.addf %611, %615 : vector<1x16x16xf32>
    %c90 = arith.constant 90 : index
    %617 = memref.load %arg2[%c90] : memref<98xf32, #tpu.memory_space<smem>>
    %618 = vector.extract_strided_slice %586 {offsets = [0, 0, 6], sizes = [1, 16, 16], strides = [1, 1, 1]} : vector<1x16x22xf32> to vector<1x16x16xf32>
    %619 = vector.broadcast %617 : f32 to vector<1x16x16xf32>
    %620 = arith.mulf %619, %618 : vector<1x16x16xf32>
    %621 = arith.addf %616, %620 : vector<1x16x16xf32>
    %c1_207 = arith.constant 1 : index
    %c0_208 = arith.constant 0 : index
    %c6_209 = arith.constant 6 : index
    %c0_210 = arith.constant 0 : index
    %622 = vector.load %arg4[%c1_207, %c0_208, %c6_209, %c0_210] : memref<2x1x22x22xf32, #tpu.memory_space<vmem>>, vector<1x1x16x22xf32>
    %623 = vector.shape_cast %622 : vector<1x1x16x22xf32> to vector<1x16x22xf32>
    %c91 = arith.constant 91 : index
    %624 = memref.load %arg2[%c91] : memref<98xf32, #tpu.memory_space<smem>>
    %625 = vector.extract_strided_slice %623 {offsets = [0, 0, 0], sizes = [1, 16, 16], strides = [1, 1, 1]} : vector<1x16x22xf32> to vector<1x16x16xf32>
    %626 = vector.broadcast %624 : f32 to vector<1x16x16xf32>
    %627 = arith.mulf %626, %625 : vector<1x16x16xf32>
    %628 = arith.addf %621, %627 : vector<1x16x16xf32>
    %c92 = arith.constant 92 : index
    %629 = memref.load %arg2[%c92] : memref<98xf32, #tpu.memory_space<smem>>
    %630 = vector.extract_strided_slice %623 {offsets = [0, 0, 1], sizes = [1, 16, 16], strides = [1, 1, 1]} : vector<1x16x22xf32> to vector<1x16x16xf32>
    %631 = vector.broadcast %629 : f32 to vector<1x16x16xf32>
    %632 = arith.mulf %631, %630 : vector<1x16x16xf32>
    %633 = arith.addf %628, %632 : vector<1x16x16xf32>
    %c93 = arith.constant 93 : index
    %634 = memref.load %arg2[%c93] : memref<98xf32, #tpu.memory_space<smem>>
    %635 = vector.extract_strided_slice %623 {offsets = [0, 0, 2], sizes = [1, 16, 16], strides = [1, 1, 1]} : vector<1x16x22xf32> to vector<1x16x16xf32>
    %636 = vector.broadcast %634 : f32 to vector<1x16x16xf32>
    %637 = arith.mulf %636, %635 : vector<1x16x16xf32>
    %638 = arith.addf %633, %637 : vector<1x16x16xf32>
    %c94 = arith.constant 94 : index
    %639 = memref.load %arg2[%c94] : memref<98xf32, #tpu.memory_space<smem>>
    %640 = vector.extract_strided_slice %623 {offsets = [0, 0, 3], sizes = [1, 16, 16], strides = [1, 1, 1]} : vector<1x16x22xf32> to vector<1x16x16xf32>
    %641 = vector.broadcast %639 : f32 to vector<1x16x16xf32>
    %642 = arith.mulf %641, %640 : vector<1x16x16xf32>
    %643 = arith.addf %638, %642 : vector<1x16x16xf32>
    %c95 = arith.constant 95 : index
    %644 = memref.load %arg2[%c95] : memref<98xf32, #tpu.memory_space<smem>>
    %645 = vector.extract_strided_slice %623 {offsets = [0, 0, 4], sizes = [1, 16, 16], strides = [1, 1, 1]} : vector<1x16x22xf32> to vector<1x16x16xf32>
    %646 = vector.broadcast %644 : f32 to vector<1x16x16xf32>
    %647 = arith.mulf %646, %645 : vector<1x16x16xf32>
    %648 = arith.addf %643, %647 : vector<1x16x16xf32>
    %c96 = arith.constant 96 : index
    %649 = memref.load %arg2[%c96] : memref<98xf32, #tpu.memory_space<smem>>
    %650 = vector.extract_strided_slice %623 {offsets = [0, 0, 5], sizes = [1, 16, 16], strides = [1, 1, 1]} : vector<1x16x22xf32> to vector<1x16x16xf32>
    %651 = vector.broadcast %649 : f32 to vector<1x16x16xf32>
    %652 = arith.mulf %651, %650 : vector<1x16x16xf32>
    %653 = arith.addf %648, %652 : vector<1x16x16xf32>
    %c97 = arith.constant 97 : index
    %654 = memref.load %arg2[%c97] : memref<98xf32, #tpu.memory_space<smem>>
    %655 = vector.extract_strided_slice %623 {offsets = [0, 0, 6], sizes = [1, 16, 16], strides = [1, 1, 1]} : vector<1x16x22xf32> to vector<1x16x16xf32>
    %656 = vector.broadcast %654 : f32 to vector<1x16x16xf32>
    %657 = arith.mulf %656, %655 : vector<1x16x16xf32>
    %658 = arith.addf %653, %657 : vector<1x16x16xf32>
    %659 = arith.negf %658 : vector<1x16x16xf32>
    %660 = math.exp %659 : vector<1x16x16xf32>
    %cst_211 = arith.constant 1.000000e+00 : f32
    %661 = vector.broadcast %cst_211 : f32 to vector<1x16x16xf32>
    %662 = arith.addf %661, %660 : vector<1x16x16xf32>
    %663 = arith.divf %661, %662 : vector<1x16x16xf32>
    %664 = vector.extract_strided_slice %663 {offsets = [0, 0, 0], sizes = [1, 1, 16], strides = [1, 1, 1]} : vector<1x16x16xf32> to vector<1x1x16xf32>
    %665 = vector.shape_cast %664 : vector<1x1x16xf32> to vector<1x16xf32>
    %c0_212 = arith.constant 0 : index
    %c0_213 = arith.constant 0 : index
    %666 = vector.load %arg5[%c0_212, %c0_213] : memref<1x256xf32, #tpu.memory_space<vmem>>, vector<1x16xf32>
    tpu.vector_store %arg5[%c0_212, %c0_213], %665 {strides = array<i32>} : memref<1x256xf32, #tpu.memory_space<vmem>>, vector<1x16xf32>,
    %667 = vector.extract_strided_slice %663 {offsets = [0, 1, 0], sizes = [1, 1, 16], strides = [1, 1, 1]} : vector<1x16x16xf32> to vector<1x1x16xf32>
    %668 = vector.shape_cast %667 : vector<1x1x16xf32> to vector<1x16xf32>
    %c0_214 = arith.constant 0 : index
    %c16_215 = arith.constant 16 : index
    %669 = vector.load %arg5[%c0_214, %c16_215] : memref<1x256xf32, #tpu.memory_space<vmem>>, vector<1x16xf32>
    tpu.vector_store %arg5[%c0_214, %c16_215], %668 {strides = array<i32>} : memref<1x256xf32, #tpu.memory_space<vmem>>, vector<1x16xf32>,
    %670 = vector.extract_strided_slice %663 {offsets = [0, 2, 0], sizes = [1, 1, 16], strides = [1, 1, 1]} : vector<1x16x16xf32> to vector<1x1x16xf32>
    %671 = vector.shape_cast %670 : vector<1x1x16xf32> to vector<1x16xf32>
    %c0_216 = arith.constant 0 : index
    %c32_217 = arith.constant 32 : index
    %672 = vector.load %arg5[%c0_216, %c32_217] : memref<1x256xf32, #tpu.memory_space<vmem>>, vector<1x16xf32>
    tpu.vector_store %arg5[%c0_216, %c32_217], %671 {strides = array<i32>} : memref<1x256xf32, #tpu.memory_space<vmem>>, vector<1x16xf32>,
    %673 = vector.extract_strided_slice %663 {offsets = [0, 3, 0], sizes = [1, 1, 16], strides = [1, 1, 1]} : vector<1x16x16xf32> to vector<1x1x16xf32>
    %674 = vector.shape_cast %673 : vector<1x1x16xf32> to vector<1x16xf32>
    %c0_218 = arith.constant 0 : index
    %c48_219 = arith.constant 48 : index
    %675 = vector.load %arg5[%c0_218, %c48_219] : memref<1x256xf32, #tpu.memory_space<vmem>>, vector<1x16xf32>
    tpu.vector_store %arg5[%c0_218, %c48_219], %674 {strides = array<i32>} : memref<1x256xf32, #tpu.memory_space<vmem>>, vector<1x16xf32>,
    %676 = vector.extract_strided_slice %663 {offsets = [0, 4, 0], sizes = [1, 1, 16], strides = [1, 1, 1]} : vector<1x16x16xf32> to vector<1x1x16xf32>
    %677 = vector.shape_cast %676 : vector<1x1x16xf32> to vector<1x16xf32>
    %c0_220 = arith.constant 0 : index
    %c64_221 = arith.constant 64 : index
    %678 = vector.load %arg5[%c0_220, %c64_221] : memref<1x256xf32, #tpu.memory_space<vmem>>, vector<1x16xf32>
    tpu.vector_store %arg5[%c0_220, %c64_221], %677 {strides = array<i32>} : memref<1x256xf32, #tpu.memory_space<vmem>>, vector<1x16xf32>,
    %679 = vector.extract_strided_slice %663 {offsets = [0, 5, 0], sizes = [1, 1, 16], strides = [1, 1, 1]} : vector<1x16x16xf32> to vector<1x1x16xf32>
    %680 = vector.shape_cast %679 : vector<1x1x16xf32> to vector<1x16xf32>
    %c0_222 = arith.constant 0 : index
    %c80_223 = arith.constant 80 : index
    %681 = vector.load %arg5[%c0_222, %c80_223] : memref<1x256xf32, #tpu.memory_space<vmem>>, vector<1x16xf32>
    tpu.vector_store %arg5[%c0_222, %c80_223], %680 {strides = array<i32>} : memref<1x256xf32, #tpu.memory_space<vmem>>, vector<1x16xf32>,
    %682 = vector.extract_strided_slice %663 {offsets = [0, 6, 0], sizes = [1, 1, 16], strides = [1, 1, 1]} : vector<1x16x16xf32> to vector<1x1x16xf32>
    %683 = vector.shape_cast %682 : vector<1x1x16xf32> to vector<1x16xf32>
    %c0_224 = arith.constant 0 : index
    %c96_225 = arith.constant 96 : index
    %684 = vector.load %arg5[%c0_224, %c96_225] : memref<1x256xf32, #tpu.memory_space<vmem>>, vector<1x16xf32>
    tpu.vector_store %arg5[%c0_224, %c96_225], %683 {strides = array<i32>} : memref<1x256xf32, #tpu.memory_space<vmem>>, vector<1x16xf32>,
    %685 = vector.extract_strided_slice %663 {offsets = [0, 7, 0], sizes = [1, 1, 16], strides = [1, 1, 1]} : vector<1x16x16xf32> to vector<1x1x16xf32>
    %686 = vector.shape_cast %685 : vector<1x1x16xf32> to vector<1x16xf32>
    %c0_226 = arith.constant 0 : index
    %c112 = arith.constant 112 : index
    %687 = vector.load %arg5[%c0_226, %c112] : memref<1x256xf32, #tpu.memory_space<vmem>>, vector<1x16xf32>
    tpu.vector_store %arg5[%c0_226, %c112], %686 {strides = array<i32>} : memref<1x256xf32, #tpu.memory_space<vmem>>, vector<1x16xf32>,
    %688 = vector.extract_strided_slice %663 {offsets = [0, 8, 0], sizes = [1, 1, 16], strides = [1, 1, 1]} : vector<1x16x16xf32> to vector<1x1x16xf32>
    %689 = vector.shape_cast %688 : vector<1x1x16xf32> to vector<1x16xf32>
    %c0_227 = arith.constant 0 : index
    %c128 = arith.constant 128 : index
    %690 = vector.load %arg5[%c0_227, %c128] : memref<1x256xf32, #tpu.memory_space<vmem>>, vector<1x16xf32>
    tpu.vector_store %arg5[%c0_227, %c128], %689 {strides = array<i32>} : memref<1x256xf32, #tpu.memory_space<vmem>>, vector<1x16xf32>,
    %691 = vector.extract_strided_slice %663 {offsets = [0, 9, 0], sizes = [1, 1, 16], strides = [1, 1, 1]} : vector<1x16x16xf32> to vector<1x1x16xf32>
    %692 = vector.shape_cast %691 : vector<1x1x16xf32> to vector<1x16xf32>
    %c0_228 = arith.constant 0 : index
    %c144 = arith.constant 144 : index
    %693 = vector.load %arg5[%c0_228, %c144] : memref<1x256xf32, #tpu.memory_space<vmem>>, vector<1x16xf32>
    tpu.vector_store %arg5[%c0_228, %c144], %692 {strides = array<i32>} : memref<1x256xf32, #tpu.memory_space<vmem>>, vector<1x16xf32>,
    %694 = vector.extract_strided_slice %663 {offsets = [0, 10, 0], sizes = [1, 1, 16], strides = [1, 1, 1]} : vector<1x16x16xf32> to vector<1x1x16xf32>
    %695 = vector.shape_cast %694 : vector<1x1x16xf32> to vector<1x16xf32>
    %c0_229 = arith.constant 0 : index
    %c160 = arith.constant 160 : index
    %696 = vector.load %arg5[%c0_229, %c160] : memref<1x256xf32, #tpu.memory_space<vmem>>, vector<1x16xf32>
    tpu.vector_store %arg5[%c0_229, %c160], %695 {strides = array<i32>} : memref<1x256xf32, #tpu.memory_space<vmem>>, vector<1x16xf32>,
    %697 = vector.extract_strided_slice %663 {offsets = [0, 11, 0], sizes = [1, 1, 16], strides = [1, 1, 1]} : vector<1x16x16xf32> to vector<1x1x16xf32>
    %698 = vector.shape_cast %697 : vector<1x1x16xf32> to vector<1x16xf32>
    %c0_230 = arith.constant 0 : index
    %c176 = arith.constant 176 : index
    %699 = vector.load %arg5[%c0_230, %c176] : memref<1x256xf32, #tpu.memory_space<vmem>>, vector<1x16xf32>
    tpu.vector_store %arg5[%c0_230, %c176], %698 {strides = array<i32>} : memref<1x256xf32, #tpu.memory_space<vmem>>, vector<1x16xf32>,
    %700 = vector.extract_strided_slice %663 {offsets = [0, 12, 0], sizes = [1, 1, 16], strides = [1, 1, 1]} : vector<1x16x16xf32> to vector<1x1x16xf32>
    %701 = vector.shape_cast %700 : vector<1x1x16xf32> to vector<1x16xf32>
    %c0_231 = arith.constant 0 : index
    %c192 = arith.constant 192 : index
    %702 = vector.load %arg5[%c0_231, %c192] : memref<1x256xf32, #tpu.memory_space<vmem>>, vector<1x16xf32>
    tpu.vector_store %arg5[%c0_231, %c192], %701 {strides = array<i32>} : memref<1x256xf32, #tpu.memory_space<vmem>>, vector<1x16xf32>,
    %703 = vector.extract_strided_slice %663 {offsets = [0, 13, 0], sizes = [1, 1, 16], strides = [1, 1, 1]} : vector<1x16x16xf32> to vector<1x1x16xf32>
    %704 = vector.shape_cast %703 : vector<1x1x16xf32> to vector<1x16xf32>
    %c0_232 = arith.constant 0 : index
    %c208 = arith.constant 208 : index
    %705 = vector.load %arg5[%c0_232, %c208] : memref<1x256xf32, #tpu.memory_space<vmem>>, vector<1x16xf32>
    tpu.vector_store %arg5[%c0_232, %c208], %704 {strides = array<i32>} : memref<1x256xf32, #tpu.memory_space<vmem>>, vector<1x16xf32>,
    %706 = vector.extract_strided_slice %663 {offsets = [0, 14, 0], sizes = [1, 1, 16], strides = [1, 1, 1]} : vector<1x16x16xf32> to vector<1x1x16xf32>
    %707 = vector.shape_cast %706 : vector<1x1x16xf32> to vector<1x16xf32>
    %c0_233 = arith.constant 0 : index
    %c224 = arith.constant 224 : index
    %708 = vector.load %arg5[%c0_233, %c224] : memref<1x256xf32, #tpu.memory_space<vmem>>, vector<1x16xf32>
    tpu.vector_store %arg5[%c0_233, %c224], %707 {strides = array<i32>} : memref<1x256xf32, #tpu.memory_space<vmem>>, vector<1x16xf32>,
    %709 = vector.extract_strided_slice %663 {offsets = [0, 15, 0], sizes = [1, 1, 16], strides = [1, 1, 1]} : vector<1x16x16xf32> to vector<1x1x16xf32>
    %710 = vector.shape_cast %709 : vector<1x1x16xf32> to vector<1x16xf32>
    %c0_234 = arith.constant 0 : index
    %c240 = arith.constant 240 : index
    %711 = vector.load %arg5[%c0_234, %c240] : memref<1x256xf32, #tpu.memory_space<vmem>>, vector<1x16xf32>
    tpu.vector_store %arg5[%c0_234, %c240], %710 {strides = array<i32>} : memref<1x256xf32, #tpu.memory_space<vmem>>, vector<1x16xf32>,
    %c0_235 = arith.constant 0 : index
    %c0_236 = arith.constant 0 : index
    %712 = vector.load %arg5[%c0_235, %c0_236] : memref<1x256xf32, #tpu.memory_space<vmem>>, vector<1x256xf32>
    %c0_237 = arith.constant 0 : index
    %c0_238 = arith.constant 0 : index
    %c0_239 = arith.constant 0 : index
    %713 = vector.load %arg1[%c0_237, %c0_238, %c0_239] : memref<1x4x256xf32, #tpu.memory_space<vmem>>, vector<1x4x256xf32>
    %714 = vector.shape_cast %712 : vector<1x256xf32> to vector<1x1x256xf32>
    %715 = vector.broadcast %714 : vector<1x1x256xf32> to vector<1x4x256xf32>
    %716 = arith.mulf %713, %715 : vector<1x4x256xf32>
    %c0_240 = arith.constant 0 : index
    %c0_241 = arith.constant 0 : index
    %c0_242 = arith.constant 0 : index
    %717 = vector.load %arg3[%c0_240, %c0_241, %c0_242] : memref<1x4x256xf32, #tpu.memory_space<vmem>>, vector<1x4x256xf32>
    tpu.vector_store %arg3[%c0_240, %c0_241, %c0_242], %716 {strides = array<i32>} : memref<1x4x256xf32, #tpu.memory_space<vmem>>, vector<1x4x256xf32>,
    return
  }
  func.func @transform_0(%arg0: i32) -> (i32, i32, i32) {
    %c0_i32 = arith.constant 0 : i32
    %c0_i32_0 = arith.constant 0 : i32
    %c0_i32_1 = arith.constant 0 : i32
    return %arg0, %c0_i32, %c0_i32_0 : i32, i32, i32
  }
  func.func @transform_1(%arg0: i32) -> i32 {
    %c0_i32 = arith.constant 0 : i32
    %c0_i32_0 = arith.constant 0 : i32
    return %c0_i32 : i32
  }
  func.func @transform_2(%arg0: i32) -> (i32, i32, i32) {
    %c0_i32 = arith.constant 0 : i32
    %c0_i32_0 = arith.constant 0 : i32
    %c0_i32_1 = arith.constant 0 : i32
    return %arg0, %c0_i32, %c0_i32_0 : i32, i32, i32
  }
}

</mosaic_0001>

<bundles_post_ra>
// kernel: tpu_custom_call.1
= control target key start
LH: loop header
LB: loop body
LE: loop exit
PB: predicated region body
PF: predicated region fallthrough
CT: control target
= control target key end

     0   :  { %7 = vsyncpa [#allocation5], 0  ;;  %s3536_s0 = inlined_call_operand.hbm [shape: f32[2,4,256], index: 0, kind: input, shape index: {}]   ;;  %s3537_s1 = inlined_call_operand.vmem [shape: f32[98], index: 1, kind: input, shape index: {}]   ;;  %s3538_s2 = inlined_call_operand.hbm [shape: f32[2,4,256], index: 2, kind: output, shape index: {}]  }
   0x1   :  { %9 = vsyncpa [#allocation5 + $0x1], 0 }
   0x2   :  { %10 = vsyncpa [#allocation7], 0 }
   0x3   :  { %11 = vsyncpa [#allocation6], 0 }
   0x4   :  { %13 = vsyncpa [#allocation6 + $0x1], 0  ;;  %s2313_s9 = smov 0   ;;  %s2315_s10 = smov 0  }
   0x5   :  { %s2317_s11 = smov 0   ;;  %s2319_s12 = smov 0  }
   0x6 LB: > { %s2334_s13 = sadd.s32 4294967295, %s2270_s12   ;;  %s1953_s14 = sadd.s32 4294967294, %s2270_s12   ;;  %s2270_s12 = sphi %s2319_s12, %s3605_s12   ;;  %s2266_s11 = sphi %s2317_s11, %s3604_s11   ;;  %s2262_s10 = sphi %s2315_s10, %s3603_s10   ;;  %s2258_s9 = sphi %s2313_s9, %s3602_s9  }
   0x7   : > { %p39_p0 = scmp.ne.s32.totalorder %s2262_s10, %s2258_s9  ;;  %p3539_p1 = scmp.eq.s32.totalorder %s2334_s13, 0 }
   0x8   : > { %p90_p3 = scmp.eq.s32.totalorder %s1953_s14, 1  ;;  %p1954_p5 = scmp.ge.s32.totalorder %s2270_s12, 1 }
   0x9   : > { %p2343_p4 = por %p3539_p1, %p39_p0  ;;  %p97_p7 = scmp.lt.s32.totalorder %s2270_s12, 3 }
   0xa   : > { %p2348_p6 = por %p90_p3, %p39_p0  ;;  %s110_s19 = sshll.u32 %s3537_s1, 4  ;;  %s111_s19 = int_to_ptr.vmem [resolvable:$true] %s110_s19 }
   0xb   : > { %s3550_s15 = scalar_select %p2343_p4, 1, 0 }
   0xc   : > { %s3551_s16 = scalar_select %p2348_p6, 1, 0 }
   0xd   : > { %p2356_p8 = pnand %p1954_p5, %p97_p7  ;;  %s2364_s21 = sadd.s32 1, %s2270_s12  }
   0xe   : > { %s23_s23 = ssub.s32 %s2270_s12, %s2364_s21  ;;  %s26_s25 = sadd.s32 1, %s2266_s11 }
   0xf   : > { %s3552_s20 = scalar_select %p2356_p8, 1, 0 }
  0x10   : > { %p2078_p10 = pneg %p2356_p8  ;;  %p2374_p12 = scmp.eq.s32.totalorder %s23_s23, 0 }
  0x11   : > { %p33_p13 = scmp.ne.s32.totalorder %s2266_s11, %s2262_s10  ;;  %s2159_s26 = scalar_lea.vmem %s111_s19, 16 }
  0x12   : > { %p2368_p11 = pnand %p2078_p10, %p3539_p1  ;;  %p2160_p0 = scmp.ne.s32.totalorder %s111_s19, %s2159_s26 }
  0x13   : > { %p2167_p9 = scmp.lt.s32.totalorder %s111_s19, %s111_s19  ;;  %p2168_p2 = scmp.lt.s32.totalorder %s2159_s26, %s2159_s26 }
  0x14   : > { %p2161_p3 = pneg %p2368_p11 }
  0x15   : > { %p2169_p10 = por %p2168_p2, %p2167_p9 }
  0x16   : > { %p2162_p5 = pnand %p2161_p3, %p2160_p0 }
  0x18   : > { %p2163_p7 = pneg %p2162_p5 }
  0x1a   : > { %p2170_p1 = pnand %p2169_p10, %p2163_p7 }
  0x1c   : > { %2173 = shalt.err (!%p2170_p1)
}
  0x1d   : > { %s2272_s27 = smov [#allocation8]   ;;  %p34_p2 = scmp.eq.s32.totalorder %s2270_s12, 0 }
  0x1e   : > { %2081 = dma.vmem_to_smem (!%p2368_p11), %s111_s19, 16, %s2272_s27, [#allocation7]  }
  0x1f   : > { %s2388_s28 = scalar_select %p2374_p12, %s2266_s11, %s26_s25  }
  0x20   : > { %p3555_p1 = scmp.eq.s32.totalorder %s2334_s13, 1  ;;  %p2091_p0 = scmp.lt.s32.totalorder %s2270_s12, 2 }
  0x21   : > { %s121_s30 = sand.u32 1, %s2266_s11   ;;  %p35_p3 = por %p34_p2, %p33_p13 }
  0x22   : > { %p2396_p9 = por %p3555_p1, %p33_p13  ;;  %s1957_s3 = sshll.u32 %s121_s30, 3 }
  0x23   : > { %s2068_s4 = sshll.u32 %s2270_s12, 7  ;;  %s125_s8 = scalar_lea.vmem [#allocation4], %s1957_s3 }
  0x24   : > { %s3556_s29 = scalar_select %p2396_p9, 1, 0 }
  0x25   : > { %s2409_s7 = scalar_lea.hbm %s3536_s0, %s2068_s4  ;;  %s133_s14 = sshll.u32 %s125_s8, 4  ;;  %s134_s14 = int_to_ptr.vmem [resolvable:$true] %s133_s14 }
  0x26   : > { %p2411_p11 = pnand %p2091_p0, %p35_p3  ;;  %s122_s18 = scalar_lea.sflag [#allocation5], %s121_s30 }
  0x27   : > { %s2174_s19 = scalar_lea.hbm %s2409_s7, 128  ;;  %s2179_s24 = scalar_lea.hbm %s3536_s0, 256 }
  0x28   : > { %p2175_p12 = scmp.ne.s32.totalorder %s2409_s7, %s2174_s19  ;;  %p2176_p13 = pneg %p2411_p11 }
  0x29   : > { %p2180_p10 = scmp.lt.s32.totalorder %s2409_s7, %s3536_s0  ;;  %p2181_p2 = scmp.lt.s32.totalorder %s2179_s24, %s2174_s19 }
  0x2a   : > { %p2177_p5 = pnand %p2176_p13, %p2175_p12 }
  0x2b   : > { %p2182_p1 = por %p2181_p2, %p2180_p10 }
  0x2c   : > { %p2178_p7 = pneg %p2177_p5 }
  0x2e   : > { %p2183_p0 = pnand %p2182_p1, %p2178_p7 }
  0x30   : > { %2186 = shalt.err (!%p2183_p0)
}
  0x31   : > { %s2187_s27 = scalar_lea.vmem %s134_s14, 128  ;;  %s2273_s30 = smov [#allocation4]  }
  0x32   : > { %p2188_p3 = scmp.ne.s32.totalorder %s134_s14, %s2187_s27  ;;  %s2192_s3 = sshll.u32 %s2273_s30, 4  ;;  %s2193_s3 = int_to_ptr.vmem [resolvable:$false] %s2192_s3 }
  0x33   : > { %s2194_s4 = scalar_lea.vmem %s2193_s3, 256  ;;  %p2195_p12 = scmp.lt.s32.totalorder %s134_s14, %s2193_s3 }
  0x34   : > { %p2190_p6 = pnand %p2188_p3, %p2176_p13  ;;  %p2196_p5 = scmp.lt.s32.totalorder %s2194_s4, %s2187_s27 }
  0x36   : > { %p2191_p9 = pneg %p2190_p6  ;;  %p2197_p4 = por %p2196_p5, %p2195_p12 }
  0x38   : > { %p2198_p8 = pnand %p2197_p4, %p2191_p9 }
  0x3a   : > { %2201 = shalt.err (!%p2198_p8)
}
  0x3b   : > { %2085 = dma.hbm_to_vmem [thread:$0]  (!%p2411_p11), %s2409_s7, 128, %s134_s14, %s122_s18  }
  0x3c   : > { %p3558_p7 = scmp.ne.s32.totalorder %s3552_s20, 0 }
  0x3d   : > { %s2432_s5 = sand.u32 (!%p3558_p7), 1, %s2262_s10   ;;  %p3559_p4 = scmp.ne.s32.totalorder (!%p3558_p7), %s3550_s15, 0 }
  0x3e   : > { %142 = sbr.rel (%p3558_p7) target bundleno = 899 (0x383), region = 28  ;;  %s1961_s6 = sshll.u32 (!%p3558_p7), %s2432_s5, 3 }
  0x3f   : > { %s145_s8 = scalar_lea.sflag (!%p3558_p7), [#allocation5], %s2432_s5  ;;  %s2438_s19 = scalar_lea.vmem (!%p3558_p7), [#allocation4], %s1961_s6 }
  0x43   : > { %2245 = dma.done.wait (%p3559_p4), %s145_s8, 128  }
  0x44   : > { %2247 = vsyncadd (%p3559_p4), %s145_s8, 4294967168  ;;  %p3560_p6 = scmp.eq.s32.totalorder %s2334_s13, 0 }
  0x46   : > { %2249 = dma.done.wait (%p3560_p6), [#allocation7], 16   ;;  %p3561_p8 = pmov %p3560_p6 }
  0x48   : > { %2251 = vsyncadd (%p3561_p8), [#allocation7], 4294967280 }
  0x49   : > { %157 = sfence }
  0x4a   : > { %v174_v0 = vld [vmem:[%s2438_s19] sm:$0xff]  ;;  %vm178_vm0 = vcmask 1043456   ;;  %vm214_vm1 = vcmask 23552   ;;  %v2274_v3 = vmov 0.0   ;;  %vm219_vm2 = vcmask 179352   ;;  %s2275_s15 = smov 99  }
  0x4b   : > { %v179_v1 = vsel %vm178_vm0, %v174_v0, -inf  ;;  %v176_v2 = vcombine.high %v174_v0, %v174_v0  ;;  %215 = vst.msk [vmem:[#allocation2 + $0x3] sm:$0xff] %vm214_vm1, %v2274_v3  ;;  %216 = vst.msk [vmem:[#allocation2 + $0xb] sm:$0xff] %vm214_vm1, %v2274_v3  ;;  %vm209_vm3 = vcmask 174080   ;;  %v193_v12 = vsel %vm178_vm0, %v174_v0, 0.0  ;;  %s2276_s20 = smov 3  }
  0x4c   : > { %217 = vst.msk [vmem:[#allocation2 + $0x1b] sm:$0xff] %vm214_vm1, %v2274_v3  ;;  %218 = vst.msk [vmem:[#allocation2 + $0x23] sm:$0xff] %vm214_vm1, %v2274_v3  ;;  %v180_v4 = vrot.slane %v179_v1, 4  ;;  %v194_v15 = vrot.slane %v193_v12, 4  ;;  %s2277_s7 = smov 83   ;;  %s2278_s14 = smov 115  }
  0x4d   : > { %220 = vst.msk [vmem:[#allocation2 + $0x3] sm:$0xff] %vm219_vm2, %v2274_v3  ;;  %221 = vst.msk [vmem:[#allocation2 + $0xb] sm:$0xff] %vm219_vm2, %v2274_v3  ;;  %v186_v5 = vsel %vm178_vm0, %v176_v2, -inf  ;;  %s2279_s17 = smov 51   ;;  %s2280_s18 = smov 67   ;;  %v200_v23 = vsel %vm178_vm0, %v176_v2, 0.0 }
  0x4e   : > { %222 = vst.msk [vmem:[#allocation2 + $0x1b] sm:$0xff] %vm219_vm2, %v2274_v3  ;;  %223 = vst.msk [vmem:[#allocation2 + $0x23] sm:$0xff] %vm219_vm2, %v2274_v3  ;;  %v181_v6 = vmax.f32 %v179_v1, %v180_v4  ;;  %v187_v8 = vrot.slane %v186_v5, 4  ;;  %v195_v17 = vadd.f32 %v194_v15, %v193_v12  ;;  %s2281_s22 = smov 19   ;;  %s2282_s23 = smov 35   ;;  %v201_v25 = vrot.slane %v200_v23, 4 }
  0x4f   : > { %210 = vst.msk [vmem:[#allocation2] sm:$0x7] %vm209_vm3, %v2274_v3  ;;  %211 = vst.msk [vmem:[#allocation2 + $0x18] sm:$0x7] %vm209_vm3, %v2274_v3  ;;  %vm228_vm4 = vcmask 147480   ;;  %s2495_s24 = sld [smem:[#allocation8 + $0x1]] }
  0x50   : > { %v182_v7 = vrot.slane %v181_v6, 2  ;;  %v188_v11 = vmax.f32 %v186_v5, %v187_v8  ;;  %212 = vst.msk [vmem:[#allocation2 + $0x13] sm:$0x7] %vm209_vm3, %v2274_v3  ;;  %213 = vst.msk [vmem:[#allocation2 + $0x2b] sm:$0x7] %vm209_vm3, %v2274_v3  ;;  %v196_v19 = vrot.slane %v195_v17, 2  ;;  %v202_v27 = vadd.f32 %v201_v25, %v200_v23 }
  0x51   : > { %s2499_s25 = sld [smem:[#allocation8 + $0x2]]  ;;  %s2283_s30 = smov 127  }
  0x52   : > { %v183_v9 = vmax.f32 %v181_v6, %v182_v7  ;;  %v189_v14 = vrot.slane %v188_v11, 2  ;;  %v197_v21 = vadd.f32 %v196_v19, %v195_v17  ;;  %v203_v28 = vrot.slane %v202_v27, 2  ;;  %s2504_s26 = sld [smem:[#allocation8 + $0x3]]  ;;  %s2284_s4 = smov 126  }
  0x53   : > { %s2512_s27 = sld [smem:[#allocation8 + $0x4]]  ;;  %p3599_p11 = scmp.ne.s32.totalorder %s3556_s29, 0 }
  0x54   : > { %v184_v10 = vrot.slane %v183_v9, 1  ;;  %v190_v16 = vmax.f32 %v188_v11, %v189_v14  ;;  %v198_v22 = vrot.slane %v197_v21, 1  ;;  %v204_v29 = vadd.f32 %v203_v28, %v202_v27  ;;  %s2519_s3 = sld [smem:[#allocation8 + $0x5]] }
  0x55   : > { %v367_v41 = vstv %s2495_s24  ;;  %s2526_s8 = sld [smem:[#allocation8 + $0x6]]  ;;  %s2288_s24 = smov 122  }
  0x56   : > { %v185_v13 = vmax.f32 %v183_v9, %v184_v10  ;;  %v191_v18 = vrot.slane %v190_v16, 1  ;;  %v199_v24 = vadd.f32 %v198_v22, %v197_v21  ;;  %v205_v30 = vrot.slane %v204_v29, 1 }
  0x57   : > { %v381_v46 = vstv %s2499_s25  ;;  %s2563_s25 = sld [smem:[#allocation8 + $0xb]] }
  0x58   : > { %244 = vrot.lane.b32.xlu1 %v185_v13, %s2275_s15  ;;  %225 = vrot.lane.b32.xlu0 %v185_v13, %s2276_s20  ;;  %v192_v20 = vmax.f32 %v190_v16, %v191_v18  ;;  %v207_v26 = vmul.f32 0.25, %v199_v24  ;;  %v206_v31 = vadd.f32 %v205_v30, %v204_v29  ;;  %v395_v50 = vstv %s2504_s26  ;;  %s2572_s26 = sld [smem:[#allocation8 + $0xc]] }
  0x59   : > { %v409_v54 = vstv %s2512_s27  ;;  %s2581_s27 = sld [smem:[#allocation8 + $0xd]] }
  0x5a   : > { %v2477_v32 = vmul.f32 0.25, %v206_v31  ;;  %v423_v58 = vstv %s2519_s3  ;;  %s2592_s3 = sld [smem:[#allocation8 + $0xf]] }
  0x5b   : > { %v437_v0 = vstv %s2526_s8  ;;  %s2601_s8 = sld [smem:[#allocation8 + $0x10]] }
  0x5c   : > { %252 = vrot.lane.b32.xlu1 %v185_v13, %s2277_s7  ;;  %236 = vrot.lane.b32.xlu0 %v185_v13, %s2278_s14 }
  0x5d   : > { %v501_v21 = vstv %s2563_s25  ;;  %s2631_s25 = sld [smem:[#allocation8 + $0x14]] }
  0x5e   : > { %v515_v27 = vstv %s2572_s26  ;;  %s2640_s26 = sld [smem:[#allocation8 + $0x16]] }
  0x60   : > { %268 = vrot.lane.b32.xlu1 %v185_v13, %s2279_s17  ;;  %260 = vrot.lane.b32.xlu0 %v185_v13, %s2280_s18 }
  0x64   : > { %284 = vrot.lane.b32.xlu1 %v185_v13, %s2281_s22  ;;  %276 = vrot.lane.b32.xlu0 %v185_v13, %s2282_s23 }
  0x68   : > { %302 = vrot.lane.b32.xlu1 %v192_v20, %s2278_s14  ;;  %293 = vrot.lane.b32.xlu0 %v192_v20, %s2276_s20 }
  0x6c   : > { %318 = vrot.lane.b32.xlu1 %v192_v20, %s2277_s7  ;;  %310 = vrot.lane.b32.xlu0 %v192_v20, %s2275_s15 }
  0x70   : > { %334 = vrot.lane.b32.xlu1 %v192_v20, %s2279_s17  ;;  %326 = vrot.lane.b32.xlu0 %v192_v20, %s2280_s18 }
  0x74   : > { %231 = vrot.lane.b32.xlu1 %v207_v26, %s2276_s20  ;;  %342 = vrot.lane.b32.xlu0 %v192_v20, %s2282_s23 }
  0x78   : > { %350 = vrot.lane.b32.xlu1 %v192_v20, %s2281_s22  ;;  %240 = vrot.lane.b32.xlu0 %v207_v26, %s2278_s14 }
  0x7c   : > { %256 = vrot.lane.b32.xlu1 %v207_v26, %s2277_s7  ;;  %248 = vrot.lane.b32.xlu0 %v207_v26, %s2275_s15 }
  0x80   : > { %272 = vrot.lane.b32.xlu1 %v207_v26, %s2279_s17  ;;  %264 = vrot.lane.b32.xlu0 %v207_v26, %s2280_s18 }
  0x84   : > { %288 = vrot.lane.b32.xlu1 %v207_v26, %s2281_s22  ;;  %280 = vrot.lane.b32.xlu0 %v207_v26, %s2282_s23 }
  0x88   : > { %298 = vrot.lane.b32.xlu0 %v2477_v32, %s2276_s20  ;;  %306 = vrot.lane.b32.xlu1 %v2477_v32, %s2278_s14  ;;  %s2533_s20 = sld [smem:[#allocation8 + $0x8]] }
  0x89   : > { %s2543_s14 = sld [smem:[#allocation8 + $0x9]] }
  0x8c   : > { %314 = vrot.lane.b32.xlu0 %v2477_v32, %s2275_s15  ;;  %322 = vrot.lane.b32.xlu1 %v2477_v32, %s2277_s7  ;;  %s2285_s15 = smov 125   ;;  %s2286_s7 = smov 124  }
  0x8e   : > { %v459_v6 = vstv %s2533_s20  ;;  %s2610_s20 = sld [smem:[#allocation8 + $0x11]] }
  0x8f   : > { %v473_v11 = vstv %s2543_s14  ;;  %s2617_s14 = sld [smem:[#allocation8 + $0x12]] }
  0x90   : > { %330 = vrot.lane.b32.xlu0 %v2477_v32, %s2280_s18  ;;  %338 = vrot.lane.b32.xlu1 %v2477_v32, %s2279_s17  ;;  %s2287_s17 = smov 123   ;;  %s2554_s18 = sld [smem:[#allocation8 + $0xa]] }
  0x96   : > { %v487_v16 = vstv %s2554_s18  ;;  %s2624_s18 = sld [smem:[#allocation8 + $0x13]] }
  0xca   : > { %v245_v33 = vpop.permute.xlu1 %244  ;;  %v226_v34 = vpop.permute.xlu0 %225 }
  0xcb   : > { %247 = vst.msk [vmem:[#allocation2 + $0x5] sm:$0x1] %vm228_vm4, %v245_v33  ;;  %229 = vst.msk [vmem:[#allocation2 + $0x3] sm:$0x1] %vm228_vm4, %v226_v34  ;;  %v529_v33 = vstv %s2581_s27  ;;  %s2647_s27 = sld [smem:[#allocation8 + $0x17]] }
  0xce   : > { %v253_v35 = vpop.permute.xlu1 %252  ;;  %v237_v36 = vpop.permute.xlu0 %236 }
  0xcf   : > { %255 = vst.msk [vmem:[#allocation2 + $0x6] sm:$0x1] %vm228_vm4, %v253_v35  ;;  %239 = vst.msk [vmem:[#allocation2 + $0x4] sm:$0x1] %vm228_vm4, %v237_v36 }
  0xd2   : > { %v269_v37 = vpop.permute.xlu1 %268  ;;  %v261_v38 = vpop.permute.xlu0 %260 }
  0xd3   : > { %271 = vst.msk [vmem:[#allocation2 + $0x8] sm:$0x1] %vm228_vm4, %v269_v37  ;;  %263 = vst.msk [vmem:[#allocation2 + $0x7] sm:$0x1] %vm228_vm4, %v261_v38  ;;  %v551_v37 = vstv %s2592_s3  ;;  %s2656_s3 = sld [smem:[#allocation8 + $0x18]] }
  0xd6   : > { %v285_v39 = vpop.permute.xlu1 %284  ;;  %v277_v40 = vpop.permute.xlu0 %276 }
  0xd7   : > { %287 = vst.msk [vmem:[#allocation2 + $0xa] sm:$0x1] %vm228_vm4, %v285_v39  ;;  %279 = vst.msk [vmem:[#allocation2 + $0x9] sm:$0x1] %vm228_vm4, %v277_v40  ;;  %v565_v40 = vstv %s2601_s8  ;;  %s2663_s8 = sld [smem:[#allocation8 + $0x19]] }
  0xda   : > { %v2506_v42 = vld [vmem:[#allocation2] sm:$0xff]  ;;  %v303_v43 = vpop.permute.xlu1 %302  ;;  %v294_v44 = vpop.permute.xlu0 %293 }
  0xdb   : > { %305 = vst.msk [vmem:[#allocation2 + $0xc] sm:$0x1] %vm228_vm4, %v303_v43  ;;  %296 = vst.msk [vmem:[#allocation2 + $0xb] sm:$0x1] %vm228_vm4, %v294_v44  ;;  %v368_v45 = vmul.f32 %v367_v41, %v2506_v42  ;;  %v382_v49 = vmul.f32 %v381_v46, %v2506_v42  ;;  %v396_v53 = vmul.f32 %v395_v50, %v2506_v42  ;;  %v2551_v5 = vld [vmem:[#allocation2 + $0x1] sm:$0xff]  ;;  %v579_v44 = vstv %s2610_s20  ;;  %s2670_s20 = sld [smem:[#allocation8 + $0x1a]] }
  0xdc   : > { %v410_v57 = vmul.f32 %v409_v54, %v2506_v42  ;;  %v424_v62 = vmul.f32 %v423_v58, %v2506_v42  ;;  %v438_v3 = vmul.f32 %v437_v0, %v2506_v42  ;;  %v460_v9 = vmul.f32 %v459_v6, %v2551_v5 }
  0xdd   : > { %372 = vrot.lane.b32.xlu0 %v368_v45, %s2283_s30  ;;  %v474_v14 = vmul.f32 %v473_v11, %v2551_v5  ;;  %v488_v19 = vmul.f32 %v487_v16, %v2551_v5  ;;  %v502_v24 = vmul.f32 %v501_v21, %v2551_v5  ;;  %v516_v30 = vmul.f32 %v515_v27, %v2551_v5 }
  0xde   : > { %v319_v47 = vpop.permute.xlu1 %318  ;;  %v311_v48 = vpop.permute.xlu0 %310  ;;  %v530_v34 = vmul.f32 %v529_v33, %v2551_v5  ;;  %v2607_v36 = vld [vmem:[#allocation2 + $0x2] sm:$0xff] }
  0xdf   : > { %321 = vst.msk [vmem:[#allocation2 + $0xe] sm:$0x1] %vm228_vm4, %v319_v47  ;;  %313 = vst.msk [vmem:[#allocation2 + $0xd] sm:$0x1] %vm228_vm4, %v311_v48  ;;  %v552_v38 = vmul.f32 %v551_v37, %v2607_v36  ;;  %v580_v45 = vmul.f32 %v579_v44, %v2607_v36  ;;  %v593_v47 = vstv %s2617_s14  ;;  %s2677_s14 = sld [smem:[#allocation8 + $0x1b]] }
  0xe0   : > { %v594_v48 = vmul.f32 %v593_v47, %v2607_v36 }
  0xe1   : > { %386 = vrot.lane.b32.xlu0 %v382_v49, %s2284_s4 }
  0xe2   : > { %v335_v51 = vpop.permute.xlu1 %334  ;;  %v327_v52 = vpop.permute.xlu0 %326 }
  0xe3   : > { %337 = vst.msk [vmem:[#allocation2 + $0x10] sm:$0x1] %vm228_vm4, %v335_v51  ;;  %329 = vst.msk [vmem:[#allocation2 + $0xf] sm:$0x1] %vm228_vm4, %v327_v52  ;;  %v607_v51 = vstv %s2624_s18  ;;  %s2686_s18 = sld [smem:[#allocation8 + $0x1d]] }
  0xe4   : > { %v608_v52 = vmul.f32 %v607_v51, %v2607_v36 }
  0xe5   : > { %400 = vrot.lane.b32.xlu0 %v396_v53, %s2285_s15 }
  0xe6   : > { %v232_v55 = vpop.permute.xlu1 %231  ;;  %v343_v56 = vpop.permute.xlu0 %342 }
  0xe7   : > { %235 = vst.msk [vmem:[#allocation2 + $0x1b] sm:$0x1] %vm228_vm4, %v232_v55  ;;  %345 = vst.msk [vmem:[#allocation2 + $0x11] sm:$0x1] %vm228_vm4, %v343_v56 }
  0xe9   : > { %414 = vrot.lane.b32.xlu0 %v410_v57, %s2286_s7  ;;  %v2653_v57 = vld [vmem:[#allocation2 + $0x3] sm:$0xff] }
  0xea   : > { %v2536_v59 = vld [vmem:[#allocation2 + $0x8] sm:$0xff]  ;;  %v351_v60 = vpop.permute.xlu1 %350  ;;  %v241_v61 = vpop.permute.xlu0 %240 }
  0xeb   : > { %353 = vst.msk [vmem:[#allocation2 + $0x12] sm:$0x1] %vm228_vm4, %v351_v60  ;;  %v369_v63 = vmul.f32 %v367_v41, %v2536_v59  ;;  %243 = vst.msk [vmem:[#allocation2 + $0x1c] sm:$0x1] %vm228_vm4, %v241_v61  ;;  %v383_v4 = vmul.f32 %v381_v46, %v2536_v59  ;;  %v397_v10 = vmul.f32 %v395_v50, %v2536_v59  ;;  %v2589_v26 = vld [vmem:[#allocation2 + $0x9] sm:$0xff] }
  0xec   : > { %v411_v15 = vmul.f32 %v409_v54, %v2536_v59  ;;  %v425_v20 = vmul.f32 %v423_v58, %v2536_v59  ;;  %v439_v25 = vmul.f32 %v437_v0, %v2536_v59  ;;  %v461_v31 = vmul.f32 %v459_v6, %v2589_v26 }
  0xed   : > { %428 = vrot.lane.b32.xlu0 %v424_v62, %s2287_s17  ;;  %374 = vrot.lane.b32.xlu1 %v369_v63, %s2283_s30  ;;  %v475_v35 = vmul.f32 %v473_v11, %v2589_v26  ;;  %v489_v39 = vmul.f32 %v487_v16, %v2589_v26  ;;  %v566_v41 = vmul.f32 %v565_v40, %v2607_v36  ;;  %v621_v54 = vstv %s2631_s25  ;;  %s2702_s25 = sld [smem:[#allocation8 + $0x1e]] }
  0xee   : > { %v257_v1 = vpop.permute.xlu1 %256  ;;  %v249_v2 = vpop.permute.xlu0 %248  ;;  %v503_v43 = vmul.f32 %v501_v21, %v2589_v26  ;;  %v517_v46 = vmul.f32 %v515_v27, %v2589_v26  ;;  %v531_v49 = vmul.f32 %v529_v33, %v2589_v26  ;;  %v2637_v50 = vld [vmem:[#allocation2 + $0xa] sm:$0xff]  ;;  %v622_v55 = vmul.f32 %v621_v54, %v2607_v36 }
  0xef   : > { %259 = vst.msk [vmem:[#allocation2 + $0x1e] sm:$0x1] %vm228_vm4, %v257_v1  ;;  %251 = vst.msk [vmem:[#allocation2 + $0x1d] sm:$0x1] %vm228_vm4, %v249_v2  ;;  %v553_v53 = vmul.f32 %v551_v37, %v2637_v50  ;;  %v567_v56 = vmul.f32 %v565_v40, %v2637_v50  ;;  %v643_v58 = vstv %s2640_s26  ;;  %v581_v61 = vmul.f32 %v579_v44, %v2637_v50  ;;  %s2708_s26 = sld [smem:[#allocation8 + $0x1f]] }
  0xf0   : > { %v644_v60 = vmul.f32 %v643_v58, %v2653_v57  ;;  %v657_v62 = vstv %s2647_s27  ;;  %v595_v0 = vmul.f32 %v593_v47, %v2637_v50  ;;  %v671_v1 = vstv %s2656_s3  ;;  %s2717_s27 = sld [smem:[#allocation8 + $0x20]] }
  0xf1   : > { %442 = vrot.lane.b32.xlu0 %v438_v3, %s2288_s24  ;;  %388 = vrot.lane.b32.xlu1 %v383_v4, %s2284_s4  ;;  %v658_v63 = vmul.f32 %v657_v62, %v2653_v57  ;;  %v672_v2 = vmul.f32 %v671_v1, %v2653_v57  ;;  %v609_v3 = vmul.f32 %v607_v51, %v2637_v50  ;;  %v685_v4 = vstv %s2663_s8  ;;  %s2724_s3 = sld [smem:[#allocation8 + $0x21]] }
  0xf2   : > { %v273_v7 = vpop.permute.xlu1 %272  ;;  %v265_v8 = vpop.permute.xlu0 %264  ;;  %v686_v6 = vmul.f32 %v685_v4, %v2653_v57  ;;  %v735_v16 = vstv %s2686_s18  ;;  %s2735_s8 = sld [smem:[#allocation8]] }
  0xf3   : > { %275 = vst.msk [vmem:[#allocation2 + $0x20] sm:$0x1] %vm228_vm4, %v273_v7  ;;  %267 = vst.msk [vmem:[#allocation2 + $0x1f] sm:$0x1] %vm228_vm4, %v265_v8  ;;  %v623_v7 = vmul.f32 %v621_v54, %v2637_v50  ;;  %v2683_v8 = vld [vmem:[#allocation2 + $0xb] sm:$0xff]  ;;  %v749_v21 = vstv %s2702_s25  ;;  %s2753_s18 = sld [smem:[#allocation8 + $0x26]] }
  0xf4   : > { %v645_v11 = vmul.f32 %v643_v58, %v2683_v8  ;;  %s2765_s25 = sld [smem:[#allocation8 + $0x27]] }
  0xf5   : > { %464 = vrot.lane.b32.xlu0 %v460_v9, %s2283_s30  ;;  %402 = vrot.lane.b32.xlu1 %v397_v10, %s2285_s15  ;;  %v699_v9 = vstv %s2670_s20  ;;  %s2740_s20 = sld [smem:[#allocation8 + $0x24]] }
  0xf6   : > { %v289_v12 = vpop.permute.xlu1 %288  ;;  %v281_v13 = vpop.permute.xlu0 %280  ;;  %v700_v10 = vmul.f32 %v699_v9, %v2653_v57 }
  0xf7   : > { %291 = vst.msk [vmem:[#allocation2 + $0x22] sm:$0x1] %vm228_vm4, %v289_v12  ;;  %283 = vst.msk [vmem:[#allocation2 + $0x21] sm:$0x1] %vm228_vm4, %v281_v13  ;;  %v713_v12 = vstv %s2677_s14  ;;  %s2744_s14 = sld [smem:[#allocation8 + $0x25]] }
  0xf8   : > { %v714_v13 = vmul.f32 %v713_v12, %v2653_v57  ;;  %v715_v27 = vmul.f32 %v713_v12, %v2683_v8 }
  0xf9   : > { %478 = vrot.lane.b32.xlu0 %v474_v14, %s2284_s4  ;;  %416 = vrot.lane.b32.xlu1 %v411_v15, %s2286_s7  ;;  %v659_v14 = vmul.f32 %v657_v62, %v2683_v8  ;;  %v2697_v15 = vld [vmem:[#allocation2 + $0x4] sm:$0xff] }
  0xfa   : > { %v299_v17 = vpop.permute.xlu0 %298  ;;  %v307_v18 = vpop.permute.xlu1 %306 }
  0xfb   : > { %301 = vst.msk [vmem:[#allocation2 + $0x23] sm:$0x1] %vm228_vm4, %v299_v17  ;;  %309 = vst.msk [vmem:[#allocation2 + $0x24] sm:$0x1] %vm228_vm4, %v307_v18  ;;  %v736_v17 = vmul.f32 %v735_v16, %v2697_v15  ;;  %v673_v18 = vmul.f32 %v671_v1, %v2683_v8  ;;  %v827_v44 = vstv %s2740_s20  ;;  %v869_v1 = vstv %s2765_s25  ;;  %s2807_s20 = sld [smem:[#allocation8 + $0x2d]] }
  0xfc   : > { %s2831_s25 = sld [smem:[#allocation8 + $0x30]] }
  0xfd   : > { %492 = vrot.lane.b32.xlu0 %v488_v19, %s2285_s15  ;;  %430 = vrot.lane.b32.xlu1 %v425_v20, %s2287_s17  ;;  %v687_v19 = vmul.f32 %v685_v4, %v2683_v8  ;;  %v2711_v20 = vld [vmem:[#allocation2 + $0xc] sm:$0xff]  ;;  %v841_v51 = vstv %s2744_s14  ;;  %s2816_s14 = sld [smem:[#allocation8 + $0xe]] }
  0xfe   : > { %v315_v22 = vpop.permute.xlu0 %314  ;;  %v323_v23 = vpop.permute.xlu1 %322 }
  0xff   : > { %317 = vst.msk [vmem:[#allocation2 + $0x25] sm:$0x1] %vm228_vm4, %v315_v22  ;;  %325 = vst.msk [vmem:[#allocation2 + $0x26] sm:$0x1] %vm228_vm4, %v323_v23  ;;  %v751_v22 = vmul.f32 %v749_v21, %v2711_v20  ;;  %v701_v23 = vmul.f32 %v699_v9, %v2683_v8 }
 0x101   : > { %506 = vrot.lane.b32.xlu0 %v502_v24, %s2286_s7  ;;  %444 = vrot.lane.b32.xlu1 %v439_v25, %s2288_s24  ;;  %v763_v24 = vstv %s2708_s26  ;;  %s2767_s26 = sld [smem:[#allocation8 + $0x7]] }
 0x102   : > { %v331_v28 = vpop.permute.xlu0 %330  ;;  %v339_v29 = vpop.permute.xlu1 %338  ;;  %v765_v25 = vmul.f32 %v763_v24, %v2711_v20  ;;  %v764_v40 = vmul.f32 %v763_v24, %v2697_v15 }
 0x103   : > { %333 = vst.msk [vmem:[#allocation2 + $0x27] sm:$0x1] %vm228_vm4, %v331_v28  ;;  %341 = vst.msk [vmem:[#allocation2 + $0x28] sm:$0x1] %vm228_vm4, %v339_v29  ;;  %v777_v28 = vstv %s2717_s27  ;;  %s2774_s27 = sld [smem:[#allocation8 + $0x28]] }
 0x104   : > { %v779_v29 = vmul.f32 %v777_v28, %v2711_v20  ;;  %v778_v47 = vmul.f32 %v777_v28, %v2697_v15 }
 0x105   : > { %520 = vrot.lane.b32.xlu0 %v516_v30, %s2287_s17  ;;  %466 = vrot.lane.b32.xlu1 %v461_v31, %s2283_s30  ;;  %v737_v30 = vmul.f32 %v735_v16, %v2711_v20  ;;  %v791_v31 = vstv %s2724_s3  ;;  %s2781_s3 = sld [smem:[#allocation8 + $0x29]] }
 0x109   : > { %534 = vrot.lane.b32.xlu0 %v530_v34, %s2288_s24  ;;  %480 = vrot.lane.b32.xlu1 %v475_v35, %s2284_s4  ;;  %v793_v34 = vmul.f32 %v791_v31, %v2711_v20  ;;  %v750_v35 = vmul.f32 %v749_v21, %v2697_v15  ;;  %v883_v12 = vstv %s2774_s27  ;;  %s2849_s27 = sld [smem:[#allocation8 + $0x33]] }
 0x10d   : > { %556 = vrot.lane.b32.xlu0 %v552_v38, %s2283_s30  ;;  %494 = vrot.lane.b32.xlu1 %v489_v39, %s2285_s15 }
 0x111   : > { %570 = vrot.lane.b32.xlu0 %v566_v41, %s2284_s4  ;;  %508 = vrot.lane.b32.xlu1 %v503_v43, %s2286_s7  ;;  %v2751_v41 = vld [vmem:[#allocation2 + $0xd] sm:$0xff]  ;;  %v361_v43 = vstv %s2735_s8  ;;  %s2797_s8 = sld [smem:[#allocation8 + $0x2c]] }
 0x112   : > { %v843_v24 = vmul.f32 %v841_v51, %v2751_v41 }
 0x115   : > { %584 = vrot.lane.b32.xlu0 %v580_v45, %s2285_s15  ;;  %522 = vrot.lane.b32.xlu1 %v517_v46, %s2287_s17  ;;  %v829_v46 = vmul.f32 %v827_v44, %v2751_v41 }
 0x119   : > { %598 = vrot.lane.b32.xlu0 %v594_v48, %s2286_s7  ;;  %536 = vrot.lane.b32.xlu1 %v531_v49, %s2288_s24  ;;  %v362_v48 = vmul.f32 %v361_v43, %v2506_v42  ;;  %v2762_v49 = vld [vmem:[#allocation2 + $0x5] sm:$0xff] }
 0x11a   : > { %v842_v54 = vmul.f32 %v841_v51, %v2762_v49  ;;  %v828_v9 = vmul.f32 %v827_v44, %v2762_v49 }
 0x11d   : > { %612 = vrot.lane.b32.xlu0 %v608_v52, %s2287_s17  ;;  %558 = vrot.lane.b32.xlu1 %v553_v53, %s2283_s30 }
 0x121   : > { %626 = vrot.lane.b32.xlu0 %v622_v55, %s2288_s24  ;;  %572 = vrot.lane.b32.xlu1 %v567_v56, %s2284_s4  ;;  %v792_v55 = vmul.f32 %v791_v31, %v2697_v15  ;;  %v855_v56 = vstv %s2753_s18  ;;  %s2824_s18 = sld [smem:[#allocation8 + $0x2f]] }
 0x122   : > { %v856_v62 = vmul.f32 %v855_v56, %v2762_v49  ;;  %v857_v31 = vmul.f32 %v855_v56, %v2751_v41  ;;  %v545_v56 = vstv %s2816_s14  ;;  %s2893_s14 = sld [smem:[#allocation8 + $0x39]] }
 0x125   : > { %648 = vrot.lane.b32.xlu0 %v644_v60, %s2283_s30  ;;  %586 = vrot.lane.b32.xlu1 %v581_v61, %s2285_s15 }
 0x129   : > { %662 = vrot.lane.b32.xlu0 %v658_v63, %s2284_s4  ;;  %600 = vrot.lane.b32.xlu1 %v595_v0, %s2286_s7 }
 0x12d   : > { %676 = vrot.lane.b32.xlu0 %v672_v2, %s2285_s15  ;;  %614 = vrot.lane.b32.xlu1 %v609_v3, %s2287_s17  ;;  %v453_v2 = vstv %s2767_s26  ;;  %s2842_s26 = sld [smem:[#allocation8 + $0x32]] }
 0x12e   : > { %v455_v44 = vmul.f32 %v453_v2, %v2589_v26 }
 0x131   : > { %690 = vrot.lane.b32.xlu0 %v686_v6, %s2286_s7  ;;  %628 = vrot.lane.b32.xlu1 %v623_v7, %s2288_s24  ;;  %v870_v7 = vmul.f32 %v869_v1, %v2762_v49 }
 0x135   : > { %704 = vrot.lane.b32.xlu0 %v700_v10, %s2287_s17  ;;  %650 = vrot.lane.b32.xlu1 %v645_v11, %s2283_s30  ;;  %v454_v10 = vmul.f32 %v453_v2, %v2551_v5 }
 0x139   : > { %718 = vrot.lane.b32.xlu0 %v714_v13, %s2288_s24  ;;  %664 = vrot.lane.b32.xlu1 %v659_v14, %s2284_s4 }
 0x13d   : > { %740 = vrot.lane.b32.xlu0 %v736_v17, %s2283_s30  ;;  %678 = vrot.lane.b32.xlu1 %v673_v18, %s2285_s15  ;;  %v884_v17 = vmul.f32 %v883_v12, %v2762_v49  ;;  %v363_v18 = vmul.f32 %v361_v43, %v2536_v59  ;;  %v871_v43 = vmul.f32 %v869_v1, %v2751_v41  ;;  %v2839_v1 = vld [vmem:[#allocation2 + $0xe] sm:$0xff] }
 0x141   : > { %346 = vrot.lane.b32.xlu0 %v2477_v32, %s2282_s23  ;;  %692 = vrot.lane.b32.xlu1 %v687_v19, %s2286_s7  ;;  %s2731_s23 = sld [smem:[#allocation8 + $0x22]]  ;;  %v897_v19 = vstv %s2781_s3 }
 0x142   : > { %s2858_s3 = sld [smem:[#allocation8 + $0x34]] }
 0x145   : > { %756 = vrot.lane.b32.xlu0 %v751_v22, %s2284_s4  ;;  %706 = vrot.lane.b32.xlu1 %v701_v23, %s2287_s17  ;;  %v898_v23 = vmul.f32 %v897_v19, %v2762_v49 }
 0x147   : > { %v805_v37 = vstv %s2731_s23  ;;  %s2790_s23 = sld [smem:[#allocation8 + $0x2b]] }
 0x148   : > { %v807_v39 = vmul.f32 %v805_v37, %v2711_v20  ;;  %v806_v63 = vmul.f32 %v805_v37, %v2697_v15 }
 0x149   : > { %770 = vrot.lane.b32.xlu0 %v765_v25, %s2285_s15  ;;  %720 = vrot.lane.b32.xlu1 %v715_v27, %s2288_s24  ;;  %v2804_v25 = vld [vmem:[#allocation2 + $0x6] sm:$0xff] }
 0x14d   : > { %784 = vrot.lane.b32.xlu0 %v779_v29, %s2286_s7  ;;  %742 = vrot.lane.b32.xlu1 %v737_v30, %s2283_s30  ;;  %v919_v59 = vstv %s2790_s23  ;;  %s2865_s23 = sld [smem:[#allocation8 + $0x35]] }
 0x14e   : > { %v920_v30 = vmul.f32 %v919_v59, %v2804_v25 }
 0x14f   : > { %v373_v33 = vpop.permute.xlu0 %372 }
 0x150   : > { %v378_v52 = vadd.f32 %v373_v33, %v362_v48 }
 0x151   : > { %798 = vrot.lane.b32.xlu0 %v793_v34, %s2287_s17  ;;  %754 = vrot.lane.b32.xlu1 %v750_v35, %s2284_s4  ;;  %v933_v34 = vstv %s2797_s8  ;;  %s2867_s8 = sld [smem:[#allocation8 + $0x15]] }
 0x153   : > { %v387_v38 = vpop.permute.xlu0 %386 }
 0x154   : > { %v392_v42 = vadd.f32 %v387_v38, %v378_v52 }
 0x155   : > { %812 = vrot.lane.b32.xlu0 %v807_v39, %s2288_s24  ;;  %768 = vrot.lane.b32.xlu1 %v764_v40, %s2285_s15  ;;  %v934_v40 = vmul.f32 %v933_v34, %v2804_v25 }
 0x157   : > { %v401_v45 = vpop.permute.xlu0 %400 }
 0x158   : > { %v406_v58 = vadd.f32 %v401_v45, %v392_v42 }
 0x159   : > { %834 = vrot.lane.b32.xlu0 %v829_v46, %s2283_s30  ;;  %782 = vrot.lane.b32.xlu1 %v778_v47, %s2286_s7  ;;  %v947_v47 = vstv %s2807_s20  ;;  %s2875_s20 = sld [smem:[#allocation8 + $0x36]] }
 0x15b   : > { %v415_v53 = vpop.permute.xlu0 %414 }
 0x15c   : > { %v420_v0 = vadd.f32 %v415_v53, %v406_v58 }
 0x15d   : > { %846 = vrot.lane.b32.xlu0 %v842_v54, %s2284_s4  ;;  %796 = vrot.lane.b32.xlu1 %v792_v55, %s2287_s17  ;;  %v948_v54 = vmul.f32 %v947_v47, %v2804_v25  ;;  %v885_v55 = vmul.f32 %v883_v12, %v2751_v41 }
 0x15f   : > { %v375_v60 = vpop.permute.xlu1 %374  ;;  %v429_v61 = vpop.permute.xlu0 %428 }
 0x160   : > { %v434_v3 = vadd.f32 %v429_v61, %v420_v0  ;;  %v379_v5 = vadd.f32 %v375_v60, %v363_v18  ;;  %v546_v0 = vmul.f32 %v545_v56, %v2607_v36  ;;  %v2855_v18 = vld [vmem:[#allocation2 + $0x18] sm:$0xff] }
 0x161   : > { %860 = vrot.lane.b32.xlu0 %v856_v62, %s2285_s15  ;;  %810 = vrot.lane.b32.xlu1 %v806_v63, %s2288_s24  ;;  %v899_v63 = vmul.f32 %v897_v19, %v2751_v41  ;;  %v1011_v19 = vstv %s2842_s26  ;;  %s2916_s26 = sld [smem:[#allocation8 + $0x3c]] }
 0x163   : > { %v389_v4 = vpop.permute.xlu1 %388  ;;  %v443_v6 = vpop.permute.xlu0 %442 }
 0x164   : > { %v448_v11 = vadd.f32 %v443_v6, %v434_v3  ;;  %v393_v27 = vadd.f32 %v389_v4, %v379_v5  ;;  %v975_v3 = vstv %s2824_s18  ;;  %s2900_s18 = sld [smem:[#allocation8 + $0x3a]] }
 0x165   : > { %874 = vrot.lane.b32.xlu0 %v870_v7, %s2286_s7  ;;  %832 = vrot.lane.b32.xlu1 %v828_v9, %s2283_s30  ;;  %v976_v9 = vmul.f32 %v975_v3, %v2804_v25 }
 0x166   : > { %v456_v13 = vadd.f32 %v454_v10, %v448_v11  ;;  %v921_v10 = vmul.f32 %v919_v59, %v2839_v1  ;;  %v989_v11 = vstv %s2831_s25  ;;  %v1025_v59 = vstv %s2849_s27  ;;  %s2909_s25 = sld [smem:[#allocation8 + $0x3b]] }
 0x167   : > { %v403_v14 = vpop.permute.xlu1 %402  ;;  %v465_v16 = vpop.permute.xlu0 %464  ;;  %s2918_s27 = sld [smem:[#allocation8 + $0x1c]] }
 0x168   : > { %v407_v28 = vadd.f32 %v403_v14, %v393_v27  ;;  %v470_v35 = vadd.f32 %v465_v16, %v456_v13  ;;  %v935_v14 = vmul.f32 %v933_v34, %v2839_v1  ;;  %v990_v16 = vmul.f32 %v989_v11, %v2804_v25 }
 0x169   : > { %888 = vrot.lane.b32.xlu0 %v884_v17, %s2287_s17  ;;  %354 = vrot.lane.b32.xlu1 %v2477_v32, %s2281_s22  ;;  %s2814_s22 = sld [smem:[#allocation8 + $0x2e]]  ;;  %v547_v34 = vmul.f32 %v545_v56, %v2637_v50  ;;  %v1067_v56 = vstv %s2875_s20 }
 0x16a   : > { %s2955_s20 = sld [smem:[#allocation8 + $0x41]] }
 0x16b   : > { %v417_v21 = vpop.permute.xlu1 %416  ;;  %v479_v22 = vpop.permute.xlu0 %478 }
 0x16c   : > { %v421_v33 = vadd.f32 %v417_v21, %v407_v28  ;;  %v484_v45 = vadd.f32 %v479_v22, %v470_v35 }
 0x16d   : > { %902 = vrot.lane.b32.xlu0 %v898_v23, %s2288_s24  ;;  %848 = vrot.lane.b32.xlu1 %v843_v24, %s2284_s4  ;;  %v949_v23 = vmul.f32 %v947_v47, %v2839_v1  ;;  %v1012_v24 = vmul.f32 %v1011_v19, %v2855_v18  ;;  %v1053_v47 = vstv %s2865_s23  ;;  %s2933_s23 = sld [smem:[#allocation8 + $0x3e]] }
 0x16f   : > { %v431_v32 = vpop.permute.xlu1 %430  ;;  %v493_v29 = vpop.permute.xlu0 %492  ;;  %v961_v42 = vstv %s2814_s22  ;;  %s2882_s22 = sld [smem:[#allocation8 + $0x37]] }
 0x170   : > { %v435_v37 = vadd.f32 %v431_v32, %v421_v33  ;;  %v498_v48 = vadd.f32 %v493_v29, %v484_v45  ;;  %v962_v62 = vmul.f32 %v961_v42, %v2804_v25  ;;  %v1026_v33 = vmul.f32 %v1025_v59, %v2855_v18 }
 0x171   : > { %924 = vrot.lane.b32.xlu0 %v920_v30, %s2283_s30  ;;  %862 = vrot.lane.b32.xlu1 %v857_v31, %s2285_s15  ;;  %v963_v31 = vmul.f32 %v961_v42, %v2839_v1  ;;  %v977_v45 = vmul.f32 %v975_v3, %v2839_v1 }
 0x173   : > { %v445_v38 = vpop.permute.xlu1 %444  ;;  %v507_v39 = vpop.permute.xlu0 %506 }
 0x174   : > { %v449_v46 = vadd.f32 %v445_v38, %v435_v37  ;;  %v512_v26 = vadd.f32 %v507_v39, %v498_v48  ;;  %v1039_v38 = vstv %s2858_s3  ;;  %v637_v48 = vstv %s2867_s8  ;;  %s2926_s3 = sld [smem:[#allocation8 + $0x3d]] }
 0x175   : > { %938 = vrot.lane.b32.xlu0 %v934_v40, %s2284_s4  ;;  %876 = vrot.lane.b32.xlu1 %v871_v43, %s2286_s7  ;;  %s2944_s8 = sld [smem:[#allocation8 + $0x40]] }
 0x176   : > { %v457_v51 = vadd.f32 %v455_v44, %v449_v46  ;;  %v1040_v46 = vmul.f32 %v1039_v38, %v2855_v18 }
 0x177   : > { %v467_v52 = vpop.permute.xlu1 %466  ;;  %v521_v53 = vpop.permute.xlu0 %520 }
 0x178   : > { %v526_v58 = vadd.f32 %v521_v53, %v512_v26  ;;  %v471_v36 = vadd.f32 %v467_v52, %v457_v51  ;;  %v638_v26 = vmul.f32 %v637_v48, %v2653_v57 }
 0x179   : > { %952 = vrot.lane.b32.xlu0 %v948_v54, %s2285_s15  ;;  %890 = vrot.lane.b32.xlu1 %v885_v55, %s2287_s17  ;;  %v991_v54 = vmul.f32 %v989_v11, %v2839_v1  ;;  %v1054_v55 = vmul.f32 %v1053_v47, %v2855_v18  ;;  %v1103_v11 = vstv %s2893_s14  ;;  %s2972_s14 = sld [smem:[#allocation8 + $0x43]] }
 0x17b   : > { %v481_v60 = vpop.permute.xlu1 %480  ;;  %v535_v61 = vpop.permute.xlu0 %534 }
 0x17c   : > { %v540_v2 = vadd.f32 %v535_v61, %v526_v58  ;;  %v485_v17 = vadd.f32 %v481_v60, %v471_v36  ;;  %v2891_v58 = vld [vmem:[#allocation2 + $0x20] sm:$0xff] }
 0x17d   : > { %966 = vrot.lane.b32.xlu0 %v962_v62, %s2286_s7  ;;  %904 = vrot.lane.b32.xlu1 %v899_v63, %s2288_s24  ;;  %v1068_v63 = vmul.f32 %v1067_v56, %v2855_v18 }
 0x17e   : > { %v548_v4 = vadd.f32 %v546_v0, %v540_v2  ;;  %v1013_v0 = vmul.f32 %v1011_v19, %v2891_v58  ;;  %v1081_v2 = vstv %s2882_s22  ;;  %v1117_v19 = vstv %s2900_s18  ;;  %s2965_s22 = sld [smem:[#allocation8 + $0x42]] }
 0x17f   : > { %v495_v6 = vpop.permute.xlu1 %494  ;;  %v557_v7 = vpop.permute.xlu0 %556  ;;  %s2980_s18 = sld [smem:[#allocation8 + $0x44]] }
 0x180   : > { %v499_v5 = vadd.f32 %v495_v6, %v485_v17  ;;  %v562_v28 = vadd.f32 %v557_v7, %v548_v4  ;;  %v1027_v6 = vmul.f32 %v1025_v59, %v2891_v58  ;;  %v1082_v7 = vmul.f32 %v1081_v2, %v2855_v18 }
 0x181   : > { %980 = vrot.lane.b32.xlu0 %v976_v9, %s2287_s17  ;;  %926 = vrot.lane.b32.xlu1 %v921_v10, %s2283_s30  ;;  %v2906_v10 = vld [vmem:[#allocation2 + $0x19] sm:$0xff]  ;;  %v639_v59 = vmul.f32 %v637_v48, %v2683_v8  ;;  %v2941_v48 = vld [vmem:[#allocation2 + $0x21] sm:$0xff] }
 0x183   : > { %v509_v12 = vpop.permute.xlu1 %508  ;;  %v571_v13 = vpop.permute.xlu0 %570 }
 0x184   : > { %v513_v27 = vadd.f32 %v509_v12, %v499_v5  ;;  %v576_v35 = vadd.f32 %v571_v13, %v562_v28 }
 0x185   : > { %940 = vrot.lane.b32.xlu1 %v935_v14, %s2284_s4  ;;  %994 = vrot.lane.b32.xlu0 %v990_v16, %s2288_s24  ;;  %v1041_v14 = vmul.f32 %v1039_v38, %v2891_v58  ;;  %v1104_v16 = vmul.f32 %v1103_v11, %v2906_v10  ;;  %v1145_v38 = vstv %s2916_s26  ;;  %s2989_s26 = sld [smem:[#allocation8 + $0x23]] }
 0x187   : > { %v523_v21 = vpop.permute.xlu1 %522  ;;  %v585_v22 = vpop.permute.xlu0 %584 }
 0x188   : > { %v527_v32 = vadd.f32 %v523_v21, %v513_v27  ;;  %v590_v39 = vadd.f32 %v585_v22, %v576_v35  ;;  %v1118_v27 = vmul.f32 %v1117_v19, %v2906_v10  ;;  %v1069_v35 = vmul.f32 %v1067_v56, %v2891_v58 }
 0x189   : > { %954 = vrot.lane.b32.xlu1 %v949_v23, %s2285_s15  ;;  %1016 = vrot.lane.b32.xlu0 %v1012_v24, %s2283_s30  ;;  %v1055_v24 = vmul.f32 %v1053_v47, %v2891_v58 }
 0x18b   : > { %v537_v29 = vpop.permute.xlu1 %536  ;;  %v599_v30 = vpop.permute.xlu0 %598 }
 0x18c   : > { %v541_v37 = vadd.f32 %v537_v29, %v527_v32  ;;  %v604_v50 = vadd.f32 %v599_v30, %v590_v39  ;;  %v1131_v29 = vstv %s2909_s25  ;;  %v729_v39 = vstv %s2918_s27  ;;  %s2987_s25 = sld [smem:[#allocation8 + $0x45]] }
 0x18d   : > { %968 = vrot.lane.b32.xlu1 %v963_v31, %s2286_s7  ;;  %1030 = vrot.lane.b32.xlu0 %v1026_v33, %s2284_s4  ;;  %s2998_s27 = sld [smem:[#allocation8 + $0x47]] }
 0x18e   : > { %v549_v40 = vadd.f32 %v547_v34, %v541_v37  ;;  %v1132_v37 = vmul.f32 %v1131_v29, %v2906_v10 }
 0x18f   : > { %v559_v43 = vpop.permute.xlu1 %558  ;;  %v613_v44 = vpop.permute.xlu0 %612 }
 0x190   : > { %v618_v51 = vadd.f32 %v613_v44, %v604_v50  ;;  %v563_v57 = vadd.f32 %v559_v43, %v549_v40  ;;  %v730_v50 = vmul.f32 %v729_v39, %v2697_v15 }
 0x191   : > { %982 = vrot.lane.b32.xlu1 %v977_v45, %s2287_s17  ;;  %1044 = vrot.lane.b32.xlu0 %v1040_v46, %s2285_s15  ;;  %v1083_v45 = vmul.f32 %v1081_v2, %v2891_v58  ;;  %v1146_v46 = vmul.f32 %v1145_v38, %v2906_v10  ;;  %v1195_v2 = vstv %s2944_s8  ;;  %s3031_s8 = sld [smem:[#allocation8 + $0x4a]] }
 0x193   : > { %v573_v52 = vpop.permute.xlu1 %572  ;;  %v627_v53 = vpop.permute.xlu0 %626 }
 0x194   : > { %v632_v42 = vadd.f32 %v627_v53, %v618_v51  ;;  %v577_v9 = vadd.f32 %v573_v52, %v563_v57  ;;  %v1159_v51 = vstv %s2926_s3  ;;  %s3005_s3 = sld [smem:[#allocation8 + $0x48]] }
 0x195   : > { %996 = vrot.lane.b32.xlu1 %v991_v54, %s2288_s24  ;;  %1058 = vrot.lane.b32.xlu0 %v1054_v55, %s2286_s7  ;;  %v1105_v55 = vmul.f32 %v1103_v11, %v2941_v48  ;;  %v1160_v15 = vmul.f32 %v1159_v51, %v2906_v10  ;;  %v1209_v11 = vstv %s2955_s20  ;;  %s3041_s20 = sld [smem:[#allocation8 + $0x4b]] }
 0x196   : > { %v640_v60 = vadd.f32 %v638_v26, %v632_v42  ;;  %v1173_v26 = vstv %s2933_s23  ;;  %s3022_s23 = sld [smem:[#allocation8 + $0x49]] }
 0x197   : > { %v587_v61 = vpop.permute.xlu1 %586  ;;  %v649_v62 = vpop.permute.xlu0 %648 }
 0x198   : > { %v591_v36 = vadd.f32 %v587_v61, %v577_v9  ;;  %v654_v5 = vadd.f32 %v649_v62, %v640_v60  ;;  %v1119_v61 = vmul.f32 %v1117_v19, %v2941_v48  ;;  %v1174_v62 = vmul.f32 %v1173_v26, %v2906_v10 }
 0x199   : > { %1072 = vrot.lane.b32.xlu0 %v1068_v63, %s2287_s17  ;;  %1018 = vrot.lane.b32.xlu1 %v1013_v0, %s2283_s30  ;;  %v2962_v0 = vld [vmem:[#allocation2 + $0x1a] sm:$0xff] }
 0x19b   : > { %v601_v3 = vpop.permute.xlu1 %600  ;;  %v663_v4 = vpop.permute.xlu0 %662 }
 0x19c   : > { %v605_v17 = vadd.f32 %v601_v3, %v591_v36  ;;  %v668_v28 = vadd.f32 %v663_v4, %v654_v5  ;;  %v1223_v5 = vstv %s2965_s22  ;;  %s3045_s22 = sld [smem:[#allocation8 + $0x2a]] }
 0x19d   : > { %1032 = vrot.lane.b32.xlu1 %v1027_v6, %s2284_s4  ;;  %1086 = vrot.lane.b32.xlu0 %v1082_v7, %s2288_s24  ;;  %v1133_v6 = vmul.f32 %v1131_v29, %v2941_v48  ;;  %v1196_v7 = vmul.f32 %v1195_v2, %v2962_v0 }
 0x19f   : > { %v615_v12 = vpop.permute.xlu1 %614  ;;  %v677_v13 = vpop.permute.xlu0 %676 }
 0x1a0   : > { %v619_v21 = vadd.f32 %v615_v12, %v605_v17  ;;  %v682_v30 = vadd.f32 %v677_v13, %v668_v28  ;;  %v731_v17 = vmul.f32 %v729_v39, %v2711_v20  ;;  %v1237_v28 = vstv %s2972_s14  ;;  %s3052_s14 = sld [smem:[#allocation8 + $0x4c]] }
 0x1a1   : > { %1046 = vrot.lane.b32.xlu1 %v1041_v14, %s2285_s15  ;;  %1108 = vrot.lane.b32.xlu0 %v1104_v16, %s2283_s30  ;;  %v1147_v14 = vmul.f32 %v1145_v38, %v2941_v48  ;;  %v1210_v16 = vmul.f32 %v1209_v11, %v2962_v0 }
 0x1a3   : > { %v629_v22 = vpop.permute.xlu1 %628  ;;  %v691_v23 = vpop.permute.xlu0 %690 }
 0x1a4   : > { %v633_v32 = vadd.f32 %v629_v22, %v619_v21  ;;  %v696_v8 = vadd.f32 %v691_v23, %v682_v30  ;;  %v1175_v30 = vmul.f32 %v1173_v26, %v2941_v48 }
 0x1a5   : > { %1060 = vrot.lane.b32.xlu1 %v1055_v24, %s2286_s7  ;;  %1122 = vrot.lane.b32.xlu0 %v1118_v27, %s2284_s4  ;;  %v1161_v24 = vmul.f32 %v1159_v51, %v2941_v48  ;;  %v1224_v27 = vmul.f32 %v1223_v5, %v2962_v0 }
 0x1a6   : > { %v641_v31 = vadd.f32 %v639_v59, %v633_v32 }
 0x1a7   : > { %v651_v33 = vpop.permute.xlu1 %650  ;;  %v705_v34 = vpop.permute.xlu0 %704 }
 0x1a8   : > { %v710_v40 = vadd.f32 %v705_v34, %v696_v8  ;;  %v655_v42 = vadd.f32 %v651_v33, %v641_v31  ;;  %v1238_v31 = vmul.f32 %v1237_v28, %v2962_v0  ;;  %v1251_v34 = vstv %s2980_s18  ;;  %s3062_s18 = sld [smem:[#allocation8 + $0x4e]] }
 0x1a9   : > { %1074 = vrot.lane.b32.xlu1 %v1069_v35, %s2287_s17  ;;  %1136 = vrot.lane.b32.xlu0 %v1132_v37, %s2285_s15  ;;  %v1252_v39 = vmul.f32 %v1251_v34, %v2962_v0 }
 0x1ab   : > { %v665_v43 = vpop.permute.xlu1 %664  ;;  %v719_v44 = vpop.permute.xlu0 %718 }
 0x1ac   : > { %v724_v47 = vadd.f32 %v719_v44, %v710_v40  ;;  %v669_v63 = vadd.f32 %v665_v43, %v655_v42  ;;  %v1265_v44 = vstv %s2987_s25  ;;  %s3071_s25 = sld [smem:[#allocation8 + $0x4f]] }
 0x1ad   : > { %1088 = vrot.lane.b32.xlu1 %v1083_v45, %s2288_s24  ;;  %1150 = vrot.lane.b32.xlu0 %v1146_v46, %s2286_s7  ;;  %v821_v45 = vstv %s2989_s26  ;;  %s3086_s26 = sld [smem:[#allocation8 + $0x50]] }
 0x1ae   : > { %v2948_v52 = vadd.f32 %v730_v50, %v724_v47  ;;  %v823_v46 = vmul.f32 %v821_v45, %v2751_v41 }
 0x1af   : > { %v679_v53 = vpop.permute.xlu1 %678  ;;  %v2950_v54 = vpop.permute.xlu0 %740 }
 0x1b0   : > { %v683_v57 = vadd.f32 %v679_v53, %v669_v63  ;;  %v746_v50 = vadd.f32 %v2950_v54, %v2948_v52 }
 0x1b1   : > { %1110 = vrot.lane.b32.xlu1 %v1105_v55, %s2283_s30  ;;  %1164 = vrot.lane.b32.xlu0 %v1160_v15, %s2287_s17  ;;  %v1266_v55 = vmul.f32 %v1265_v44, %v2962_v0 }
 0x1b3   : > { %v693_v56 = vpop.permute.xlu1 %692  ;;  %v347_v60 = vpop.permute.xlu0 %346 }
 0x1b4   : > { %349 = vst.msk [vmem:[#allocation2 + $0x29] sm:$0x1] %vm228_vm4, %v347_v60  ;;  %v697_v9 = vadd.f32 %v693_v56, %v683_v57  ;;  %v3019_v56 = vld [vmem:[#allocation2 + $0x1b] sm:$0xff]  ;;  %v1287_v60 = vstv %s2998_s27  ;;  %s3095_s27 = sld [smem:[#allocation8 + $0x51]] }
 0x1b5   : > { %1124 = vrot.lane.b32.xlu1 %v1119_v61, %s2284_s4  ;;  %1178 = vrot.lane.b32.xlu0 %v1174_v62, %s2288_s24  ;;  %v1288_v61 = vmul.f32 %v1287_v60, %v3019_v56 }
 0x1b7   : > { %v707_v3 = vpop.permute.xlu1 %706  ;;  %v757_v4 = vpop.permute.xlu0 %756 }
 0x1b8   : > { %v711_v36 = vadd.f32 %v707_v3, %v697_v9  ;;  %v822_v9 = vmul.f32 %v821_v45, %v2762_v49  ;;  %v3083_v45 = vld [vmem:[#allocation2 + $0x1c] sm:$0xff] }
 0x1b9   : > { %1138 = vrot.lane.b32.xlu1 %v1133_v6, %s2285_s15  ;;  %1200 = vrot.lane.b32.xlu0 %v1196_v7, %s2283_s30 }
 0x1bb   : > { %v721_v12 = vpop.permute.xlu1 %720  ;;  %v771_v13 = vpop.permute.xlu0 %770  ;;  %v2996_v35 = vld [vmem:[#allocation2 + $0x22] sm:$0xff] }
 0x1bc   : > { %v725_v19 = vadd.f32 %v721_v12, %v711_v36  ;;  %v1197_v40 = vmul.f32 %v1195_v2, %v2996_v35  ;;  %v1211_v15 = vmul.f32 %v1209_v11, %v2996_v35  ;;  %v1225_v62 = vmul.f32 %v1223_v5, %v2996_v35 }
 0x1bd   : > { %1152 = vrot.lane.b32.xlu1 %v1147_v14, %s2286_s7  ;;  %1214 = vrot.lane.b32.xlu0 %v1210_v16, %s2284_s4  ;;  %v1301_v2 = vstv %s3005_s3  ;;  %v1239_v7 = vmul.f32 %v1237_v28, %v2996_v35  ;;  %v1315_v36 = vstv %s3022_s23  ;;  %v1253_v49 = vmul.f32 %v1251_v34, %v2996_v35  ;;  %s3110_s3 = sld [smem:[#allocation8 + $0x52]] }
 0x1be   : > { %v733_v21 = vadd.f32 %v731_v17, %v725_v19  ;;  %v1302_v6 = vmul.f32 %v1301_v2, %v3019_v56  ;;  %v1316_v16 = vmul.f32 %v1315_v36, %v3019_v56  ;;  %v1329_v19 = vstv %s3031_s8  ;;  %s3124_s23 = sld [smem:[#allocation8 + $0x53]] }
 0x1bf   : > { %v743_v22 = vpop.permute.xlu1 %742  ;;  %v785_v23 = vpop.permute.xlu0 %784  ;;  %s3135_s8 = sld [smem:[#allocation8 + $0x55]] }
 0x1c0   : > { %v747_v59 = vadd.f32 %v743_v22, %v733_v21 }
 0x1c1   : > { %1166 = vrot.lane.b32.xlu1 %v1161_v24, %s2287_s17  ;;  %1228 = vrot.lane.b32.xlu0 %v1224_v27, %s2285_s15  ;;  %v1267_v24 = vmul.f32 %v1265_v44, %v2996_v35 }
 0x1c2   : > { %v761_v20 = vadd.f32 %v757_v4, %v747_v59  ;;  %v1343_v59 = vstv %s3041_s20  ;;  %s3148_s20 = sld [smem:[#allocation8 + $0x56]] }
 0x1c3   : > { %v755_v32 = vpop.permute.xlu1 %754  ;;  %v799_v29 = vpop.permute.xlu0 %798 }
 0x1c4   : > { %v775_v33 = vadd.f32 %v771_v13, %v761_v20  ;;  %v760_v26 = vadd.f32 %v755_v32, %v746_v50  ;;  %v913_v20 = vstv %s3045_s22  ;;  %s3113_s22 = sld [smem:[#allocation8 + $0x31]] }
 0x1c5   : > { %1180 = vrot.lane.b32.xlu1 %v1175_v30, %s2288_s24  ;;  %1242 = vrot.lane.b32.xlu0 %v1238_v31, %s2286_s7  ;;  %v1344_v30 = vmul.f32 %v1343_v59, %v3019_v56  ;;  %v914_v34 = vmul.f32 %v913_v20, %v2804_v25 }
 0x1c6   : > { %v789_v37 = vadd.f32 %v785_v23, %v775_v33  ;;  %v1330_v23 = vmul.f32 %v1329_v19, %v3019_v56  ;;  %v1357_v33 = vstv %s3052_s14  ;;  %s3163_s14 = sld [smem:[#allocation8 + $0x57]] }
 0x1c7   : > { %v769_v8 = vpop.permute.xlu1 %768  ;;  %v813_v38 = vpop.permute.xlu0 %812 }
 0x1c8   : > { %v803_v43 = vadd.f32 %v799_v29, %v789_v37  ;;  %v774_v41 = vadd.f32 %v769_v8, %v760_v26  ;;  %v1393_v26 = vstv %s3071_s25  ;;  %s3185_s25 = sld [smem:[#allocation8 + $0x59]] }
 0x1c9   : > { %1256 = vrot.lane.b32.xlu0 %v1252_v39, %s2287_s17  ;;  %1202 = vrot.lane.b32.xlu1 %v1197_v40, %s2283_s30  ;;  %v1358_v39 = vmul.f32 %v1357_v33, %v3019_v56 }
 0x1ca   : > { %v817_v47 = vadd.f32 %v813_v38, %v803_v43 }
 0x1cb   : > { %v783_v51 = vpop.permute.xlu1 %782  ;;  %v3013_v53 = vpop.permute.xlu0 %834 }
 0x1cc   : > { %v3017_v42 = vadd.f32 %v823_v46, %v817_v47  ;;  %v788_v63 = vadd.f32 %v783_v51, %v774_v41  ;;  %v1379_v46 = vstv %s3062_s18  ;;  %v1394_v41 = vmul.f32 %v1393_v26, %v3083_v45  ;;  %s3170_s18 = sld [smem:[#allocation8 + $0x58]] }
 0x1cd   : > { %1270 = vrot.lane.b32.xlu0 %v1266_v55, %s2288_s24  ;;  %1216 = vrot.lane.b32.xlu1 %v1211_v15, %s2284_s4  ;;  %v1380_v51 = vmul.f32 %v1379_v46, %v3083_v45 }
 0x1ce   : > { %v839_v25 = vadd.f32 %v3013_v53, %v3017_v42 }
 0x1cf   : > { %v797_v52 = vpop.permute.xlu1 %796  ;;  %v847_v54 = vpop.permute.xlu0 %846 }
 0x1d0   : > { %v802_v57 = vadd.f32 %v797_v52, %v788_v63 }
 0x1d1   : > { %1292 = vrot.lane.b32.xlu0 %v1288_v61, %s2283_s30  ;;  %1230 = vrot.lane.b32.xlu1 %v1225_v62, %s2285_s15  ;;  %v1407_v62 = vstv %s3086_s26  ;;  %s3195_s26 = sld [smem:[#allocation8 + $0x5a]] }
 0x1d3   : > { %v811_v3 = vpop.permute.xlu1 %810  ;;  %v861_v4 = vpop.permute.xlu0 %860 }
 0x1d4   : > { %v816_v11 = vadd.f32 %v811_v3, %v802_v57  ;;  %v1408_v3 = vmul.f32 %v1407_v62, %v3083_v45 }
 0x1d5   : > { %1306 = vrot.lane.b32.xlu0 %v1302_v6, %s2284_s4  ;;  %1244 = vrot.lane.b32.xlu1 %v1239_v7, %s2286_s7  ;;  %v915_v6 = vmul.f32 %v913_v20, %v2839_v1 }
 0x1d6   : > { %v824_v12 = vadd.f32 %v822_v9, %v816_v11 }
 0x1d7   : > { %v833_v13 = vpop.permute.xlu1 %832  ;;  %v875_v14 = vpop.permute.xlu0 %874 }
 0x1d8   : > { %v838_v17 = vadd.f32 %v833_v13, %v824_v12 }
 0x1d9   : > { %1320 = vrot.lane.b32.xlu0 %v1316_v16, %s2285_s15  ;;  %1258 = vrot.lane.b32.xlu1 %v1253_v49, %s2287_s17 }
 0x1da   : > { %v852_v5 = vadd.f32 %v847_v54, %v838_v17  ;;  %v1435_v17 = vstv %s3110_s3  ;;  %s3223_s3 = sld [smem:[#allocation8 + $0x5d]] }
 0x1db   : > { %v355_v21 = vpop.permute.xlu1 %354  ;;  %v889_v22 = vpop.permute.xlu0 %888 }
 0x1dc   : > { %v866_v27 = vadd.f32 %v861_v4, %v852_v5  ;;  %357 = vst.msk [vmem:[#allocation2 + $0x2a] sm:$0x1] %vm228_vm4, %v355_v21  ;;  %v1421_v4 = vstv %s3095_s27  ;;  %s3210_s27 = sld [smem:[#allocation8 + $0x5c]] }
 0x1dd   : > { %1334 = vrot.lane.b32.xlu0 %v1330_v23, %s2286_s7  ;;  %1272 = vrot.lane.b32.xlu1 %v1267_v24, %s2288_s24  ;;  %v1422_v1 = vmul.f32 %v1421_v4, %v3083_v45  ;;  %v1436_v23 = vmul.f32 %v1435_v17, %v3083_v45 }
 0x1de   : > { %v880_v28 = vadd.f32 %v875_v14, %v866_v27 }
 0x1df   : > { %v849_v32 = vpop.permute.xlu1 %848  ;;  %v903_v29 = vpop.permute.xlu0 %902 }
 0x1e0   : > { %v894_v31 = vadd.f32 %v889_v22, %v880_v28  ;;  %v853_v55 = vadd.f32 %v849_v32, %v839_v25  ;;  %v1449_v28 = vstv %s3124_s23  ;;  %s3238_s23 = sld [smem:[#allocation8 + $0x5e]] }
 0x1e1   : > { %1348 = vrot.lane.b32.xlu0 %v1344_v30, %s2287_s17 }
 0x1e2   : > { %v908_v37 = vadd.f32 %v903_v29, %v894_v31 }
 0x1e3   : > { %v863_v8 = vpop.permute.xlu1 %862  ;;  %v925_v38 = vpop.permute.xlu0 %924  ;;  %v3078_v40 = vld [vmem:[#allocation2 + $0x23] sm:$0xff] }
 0x1e4   : > { %v916_v43 = vadd.f32 %v914_v34, %v908_v37  ;;  %v1289_v44 = vmul.f32 %v1287_v60, %v3078_v40  ;;  %v1303_v15 = vmul.f32 %v1301_v2, %v3078_v40  ;;  %v867_v60 = vadd.f32 %v863_v8, %v853_v55  ;;  %v3151_v20 = vld [vmem:[#allocation2 + $0x24] sm:$0xff] }
 0x1e5   : > { %1362 = vrot.lane.b32.xlu0 %v1358_v39, %s2288_s24  ;;  %v1317_v61 = vmul.f32 %v1315_v36, %v3078_v40  ;;  %v1331_v11 = vmul.f32 %v1329_v19, %v3078_v40  ;;  %v1345_v49 = vmul.f32 %v1343_v59, %v3078_v40  ;;  %v1005_v19 = vstv %s3113_s22  ;;  %v3160_v34 = vld [vmem:[#allocation2 + $0x1d] sm:$0xff]  ;;  %s3188_s22 = sld [smem:[#allocation8 + $0x38]] }
 0x1e6   : > { %1294 = vrot.lane.b32.xlu1 %v1289_v44, %s2283_s30  ;;  %v930_v52 = vadd.f32 %v925_v38, %v916_v43  ;;  %v1006_v24 = vmul.f32 %v1005_v19, %v2855_v18  ;;  %v1359_v59 = vmul.f32 %v1357_v33, %v3078_v40  ;;  %v1450_v18 = vmul.f32 %v1449_v28, %v3083_v45 }
 0x1e7   : > { %v877_v50 = vpop.permute.xlu1 %876  ;;  %v939_v47 = vpop.permute.xlu0 %938  ;;  %v1381_v33 = vmul.f32 %v1379_v46, %v3151_v20  ;;  %v1471_v37 = vstv %s3135_s8  ;;  %v1395_v25 = vmul.f32 %v1393_v26, %v3151_v20  ;;  %v1499_v26 = vstv %s3163_s14  ;;  %s3256_s8 = sld [smem:[#allocation8 + $0x60]] }
 0x1e8   : > { %v881_v54 = vadd.f32 %v877_v50, %v867_v60  ;;  %v944_v7 = vadd.f32 %v939_v47, %v930_v52  ;;  %v1472_v43 = vmul.f32 %v1471_v37, %v3160_v34  ;;  %v1485_v50 = vstv %s3148_s20  ;;  %s3259_s20 = sld [smem:[#allocation8 + $0x3f]] }
 0x1e9   : > { %1384 = vrot.lane.b32.xlu0 %v1380_v51, %s2283_s30  ;;  %s3268_s14 = sld [smem:[#allocation8 + $0x61]] }
 0x1ea   : > { %1308 = vrot.lane.b32.xlu1 %v1303_v15, %s2284_s4  ;;  %v1486_v15 = vmul.f32 %v1485_v50, %v3160_v34 }
 0x1eb   : > { %v891_v53 = vpop.permute.xlu1 %890  ;;  %v953_v42 = vpop.permute.xlu0 %952 }
 0x1ec   : > { %v895_v63 = vadd.f32 %v891_v53, %v881_v54  ;;  %v958_v36 = vadd.f32 %v953_v42, %v944_v7  ;;  %v1409_v42 = vmul.f32 %v1407_v62, %v3151_v20 }
 0x1ed   : > { %1398 = vrot.lane.b32.xlu0 %v1394_v41, %s2284_s4 }
 0x1ee   : > { %1322 = vrot.lane.b32.xlu1 %v1317_v61, %s2285_s15  ;;  %v1500_v61 = vmul.f32 %v1499_v26, %v3160_v34 }
 0x1ef   : > { %v905_v2 = vpop.permute.xlu1 %904  ;;  %v967_v57 = vpop.permute.xlu0 %966 }
 0x1f0   : > { %v909_v9 = vadd.f32 %v905_v2, %v895_v63  ;;  %v972_v16 = vadd.f32 %v967_v57, %v958_v36  ;;  %v1513_v63 = vstv %s3170_s18  ;;  %v1007_v2 = vmul.f32 %v1005_v19, %v2891_v58  ;;  %s3297_s18 = sld [smem:[#allocation8 + $0x46]] }
 0x1f1   : > { %1412 = vrot.lane.b32.xlu0 %v1408_v3, %s2285_s15  ;;  %v1423_v3 = vmul.f32 %v1421_v4, %v3151_v20  ;;  %v1437_v58 = vmul.f32 %v1435_v17, %v3151_v20  ;;  %v1097_v4 = vstv %s3188_s22  ;;  %s3243_s22 = sld [smem:[#allocation8 + $0x5f]] }
 0x1f2   : > { %v917_v12 = vadd.f32 %v915_v6, %v909_v9  ;;  %1336 = vrot.lane.b32.xlu1 %v1331_v11, %s2286_s7  ;;  %v1514_v11 = vmul.f32 %v1513_v63, %v3160_v34  ;;  %v1098_v17 = vmul.f32 %v1097_v4, %v2906_v10 }
 0x1f3   : > { %v927_v13 = vpop.permute.xlu1 %926  ;;  %v981_v14 = vpop.permute.xlu0 %980 }
 0x1f4   : > { %v986_v5 = vadd.f32 %v981_v14, %v972_v16  ;;  %v931_v8 = vadd.f32 %v927_v13, %v917_v12  ;;  %v1527_v12 = vstv %s3185_s25  ;;  %s2293_s25 = smov 48  }
 0x1f5   : > { %1426 = vrot.lane.b32.xlu0 %v1422_v1, %s2286_s7  ;;  %v1528_v16 = vmul.f32 %v1527_v12, %v3160_v34 }
 0x1f6   : > { %1350 = vrot.lane.b32.xlu1 %v1345_v49, %s2287_s17  ;;  %v1541_v49 = vstv %s3195_s26  ;;  %s2294_s26 = smov 80  }
 0x1f7   : > { %v941_v21 = vpop.permute.xlu1 %940  ;;  %v995_v22 = vpop.permute.xlu0 %994  ;;  %v1542_v10 = vmul.f32 %v1541_v49, %v3160_v34 }
 0x1f8   : > { %v1000_v27 = vadd.f32 %v995_v22, %v986_v5  ;;  %v945_v44 = vadd.f32 %v941_v21, %v931_v8  ;;  %v1451_v21 = vmul.f32 %v1449_v28, %v3151_v20  ;;  %v3226_v22 = vld [vmem:[#allocation2 + $0x25] sm:$0xff]  ;;  %v1577_v8 = vstv %s3223_s3  ;;  %s2296_s3 = smov 112  }
 0x1f9   : > { %1440 = vrot.lane.b32.xlu0 %v1436_v23, %s2287_s17  ;;  %v1473_v28 = vmul.f32 %v1471_v37, %v3226_v22  ;;  %v1487_v37 = vmul.f32 %v1485_v50, %v3226_v22 }
 0x1fa   : > { %v1008_v32 = vadd.f32 %v1006_v24, %v1000_v27  ;;  %1364 = vrot.lane.b32.xlu1 %v1359_v59, %s2288_s24 }
 0x1fb   : > { %v955_v29 = vpop.permute.xlu1 %954  ;;  %v1017_v30 = vpop.permute.xlu0 %1016 }
 0x1fc   : > { %v1022_v31 = vadd.f32 %v1017_v30, %v1008_v32  ;;  %v959_v47 = vadd.f32 %v955_v29, %v945_v44  ;;  %v3235_v32 = vld [vmem:[#allocation2 + $0x1e] sm:$0xff]  ;;  %v1563_v29 = vstv %s3210_s27  ;;  %v1501_v44 = vmul.f32 %v1499_v26, %v3226_v22  ;;  %s2295_s27 = smov 96  }
 0x1fd   : > { %1454 = vrot.lane.b32.xlu0 %v1450_v18, %s2288_s24  ;;  %v1515_v26 = vmul.f32 %v1513_v63, %v3226_v22  ;;  %v1189_v63 = vstv %s3259_s20 }
 0x1fe   : > { %1386 = vrot.lane.b32.xlu1 %v1381_v33, %s2283_s30 }
 0x1ff   : > { %v969_v38 = vpop.permute.xlu1 %968  ;;  %v1031_v39 = vpop.permute.xlu0 %1030 }
 0x200   : > { %v1036_v46 = vadd.f32 %v1031_v39, %v1022_v31  ;;  %v973_v60 = vadd.f32 %v969_v38, %v959_v47  ;;  %v1564_v31 = vmul.f32 %v1563_v29, %v3235_v32 }
 0x201   : > { %1476 = vrot.lane.b32.xlu0 %v1472_v43, %s2283_s30  ;;  %v1578_v43 = vmul.f32 %v1577_v8, %v3235_v32 }
 0x202   : > { %1400 = vrot.lane.b32.xlu1 %v1395_v25, %s2284_s4 }
 0x203   : > { %v983_v51 = vpop.permute.xlu1 %982  ;;  %v1045_v55 = vpop.permute.xlu0 %1044 }
 0x204   : > { %v1050_v53 = vadd.f32 %v1045_v55, %v1036_v46  ;;  %v987_v41 = vadd.f32 %v983_v51, %v973_v60  ;;  %v1591_v46 = vstv %s3238_s23  ;;  %s2069_s23 = sshll.u32 %s2334_s13, 7 }
 0x205   : > { %1490 = vrot.lane.b32.xlu0 %v1486_v15, %s2284_s4  ;;  %v1592_v55 = vmul.f32 %v1591_v46, %v3235_v32  ;;  %v1605_v15 = vstv %s3243_s22  ;;  %s173_s22 = scalar_lea.vmem [#allocation9], %s1961_s6 }
 0x206   : > { %1414 = vrot.lane.b32.xlu1 %v1409_v42, %s2285_s15 }
 0x207   : > { %v997_v52 = vpop.permute.xlu1 %996  ;;  %v1059_v54 = vpop.permute.xlu0 %1058 }
 0x208   : > { %v1001_v62 = vadd.f32 %v997_v52, %v987_v41  ;;  %v1064_v57 = vadd.f32 %v1059_v54, %v1050_v53  ;;  %v1099_v53 = vmul.f32 %v1097_v4, %v2941_v48  ;;  %v1529_v48 = vmul.f32 %v1527_v12, %v3226_v22  ;;  %v3287_v12 = vld [vmem:[#allocation2 + $0x26] sm:$0xff] }
 0x209   : > { %1504 = vrot.lane.b32.xlu0 %v1500_v61, %s2285_s15  ;;  %v1633_v4 = vstv %s3268_s14 }
 0x20a   : > { %v1009_v6 = vadd.f32 %v1007_v2, %v1001_v62  ;;  %1428 = vrot.lane.b32.xlu1 %v1423_v3, %s2286_s7  ;;  %v1606_v62 = vmul.f32 %v1605_v15, %v3235_v32 }
 0x20b   : > { %v1019_v7 = vpop.permute.xlu1 %1018  ;;  %v1073_v9 = vpop.permute.xlu0 %1072 }
 0x20c   : > { %v1023_v36 = vadd.f32 %v1019_v7, %v1009_v6  ;;  %v1078_v13 = vadd.f32 %v1073_v9, %v1064_v57  ;;  %v1619_v57 = vstv %s3256_s8  ;;  %s1871_s8 = sshll.u32 %s173_s22, 4  ;;  %s1872_s8 = int_to_ptr.vmem [resolvable:$true] %s1871_s8 }
 0x20d   : > { %1518 = vrot.lane.b32.xlu0 %v1514_v11, %s2286_s7  ;;  %v1620_v9 = vmul.f32 %v1619_v57, %v3235_v32  ;;  %v1190_v11 = vmul.f32 %v1189_v63, %v2962_v0 }
 0x20e   : > { %1442 = vrot.lane.b32.xlu1 %v1437_v58, %s2287_s17  ;;  %v1543_v58 = vmul.f32 %v1541_v49, %v3226_v22 }
 0x20f   : > { %v1033_v14 = vpop.permute.xlu1 %1032  ;;  %v1087_v1 = vpop.permute.xlu0 %1086 }
 0x210   : > { %v1037_v19 = vadd.f32 %v1033_v14, %v1023_v36  ;;  %v1092_v5 = vadd.f32 %v1087_v1, %v1078_v13 }
 0x211   : > { %1532 = vrot.lane.b32.xlu0 %v1528_v16, %s2287_s17  ;;  %v1634_v16 = vmul.f32 %v1633_v4, %v3235_v32 }
 0x212   : > { %v1100_v23 = vadd.f32 %v1098_v17, %v1092_v5  ;;  %1456 = vrot.lane.b32.xlu1 %v1451_v21, %s2288_s24  ;;  %v1579_v21 = vmul.f32 %v1577_v8, %v3287_v12  ;;  %v1607_v8 = vmul.f32 %v1605_v15, %v3287_v12 }
 0x213   : > { %v1047_v24 = vpop.permute.xlu1 %1046  ;;  %v1109_v27 = vpop.permute.xlu0 %1108 }
 0x214   : > { %v1051_v59 = vadd.f32 %v1047_v24, %v1037_v19  ;;  %v1114_v25 = vadd.f32 %v1109_v27, %v1100_v23  ;;  %v1565_v19 = vmul.f32 %v1563_v29, %v3287_v12 }
 0x215   : > { %1546 = vrot.lane.b32.xlu0 %v1542_v10, %s2288_s24 }
 0x216   : > { %1478 = vrot.lane.b32.xlu1 %v1473_v28, %s2283_s30 }
 0x217   : > { %v1061_v30 = vpop.permute.xlu1 %1060  ;;  %v1123_v18 = vpop.permute.xlu0 %1122 }
 0x218   : > { %v1065_v33 = vadd.f32 %v1061_v30, %v1051_v59  ;;  %v1128_v60 = vadd.f32 %v1123_v18, %v1114_v25  ;;  %v1593_v59 = vmul.f32 %v1591_v46, %v3287_v12  ;;  %v1621_v25 = vmul.f32 %v1619_v57, %v3287_v12 }
 0x219   : > { %1568 = vrot.lane.b32.xlu0 %v1564_v31, %s2283_s30 }
 0x21a   : > { %1492 = vrot.lane.b32.xlu1 %v1487_v37, %s2284_s4  ;;  %v1191_v37 = vmul.f32 %v1189_v63, %v2996_v35  ;;  %v1635_v35 = vmul.f32 %v1633_v4, %v3287_v12 }
 0x21b   : > { %v1075_v38 = vpop.permute.xlu1 %1074  ;;  %v1137_v39 = vpop.permute.xlu0 %1136 }
 0x21c   : > { %v1079_v50 = vadd.f32 %v1075_v38, %v1065_v33  ;;  %v1142_v41 = vadd.f32 %v1137_v39, %v1128_v60 }
 0x21d   : > { %1582 = vrot.lane.b32.xlu0 %v1578_v43, %s2284_s4 }
 0x21e   : > { %1506 = vrot.lane.b32.xlu1 %v1501_v44, %s2285_s15 }
 0x21f   : > { %v1089_v47 = vpop.permute.xlu1 %1088  ;;  %v1151_v51 = vpop.permute.xlu0 %1150 }
 0x220   : > { %v1093_v42 = vadd.f32 %v1089_v47, %v1079_v50  ;;  %v1156_v2 = vadd.f32 %v1151_v51, %v1142_v41  ;;  %v1281_v50 = vstv %s3297_s18  ;;  %s1869_s18 = scalar_lea.hbm %s3538_s2, %s2069_s23 }
 0x221   : > { %1596 = vrot.lane.b32.xlu0 %v1592_v55, %s2285_s15  ;;  %v1282_v15 = vmul.f32 %v1281_v50, %v3019_v56 }
 0x222   : > { %v1101_v52 = vadd.f32 %v1099_v53, %v1093_v42  ;;  %1520 = vrot.lane.b32.xlu1 %v1515_v26, %s2286_s7 }
 0x223   : > { %v1111_v54 = vpop.permute.xlu1 %1110  ;;  %v1165_v61 = vpop.permute.xlu0 %1164 }
 0x224   : > { %v1170_v3 = vadd.f32 %v1165_v61, %v1156_v2  ;;  %v1115_v0 = vadd.f32 %v1111_v54, %v1101_v52 }
 0x225   : > { %1610 = vrot.lane.b32.xlu0 %v1606_v62, %s2286_s7 }
 0x226   : > { %1534 = vrot.lane.b32.xlu1 %v1529_v48, %s2287_s17 }
 0x227   : > { %v1125_v6 = vpop.permute.xlu1 %1124  ;;  %v1179_v7 = vpop.permute.xlu0 %1178 }
 0x228   : > { %v1184_v36 = vadd.f32 %v1179_v7, %v1170_v3  ;;  %v1129_v5 = vadd.f32 %v1125_v6, %v1115_v0 }
 0x229   : > { %1624 = vrot.lane.b32.xlu0 %v1620_v9, %s2287_s17 }
 0x22a   : > { %v1192_v13 = vadd.f32 %v1190_v11, %v1184_v36  ;;  %1548 = vrot.lane.b32.xlu1 %v1543_v58, %s2288_s24  ;;  %v1283_v11 = vmul.f32 %v1281_v50, %v3078_v40 }
 0x22b   : > { %v1139_v14 = vpop.permute.xlu1 %1138  ;;  %v1201_v1 = vpop.permute.xlu0 %1200 }
 0x22c   : > { %v1143_v23 = vadd.f32 %v1139_v14, %v1129_v5  ;;  %v1206_v28 = vadd.f32 %v1201_v1, %v1192_v13 }
 0x22d   : > { %1638 = vrot.lane.b32.xlu0 %v1634_v16, %s2288_s24 }
 0x22e   : > { %1570 = vrot.lane.b32.xlu1 %v1565_v19, %s2283_s30  ;;  %s3309_s30 = sld [smem:[#allocation8 + $0x4d]] }
 0x22f   : > { %v1153_v49 = vpop.permute.xlu1 %1152  ;;  %v1215_v17 = vpop.permute.xlu0 %1214 }
 0x230   : > { %v1157_v10 = vadd.f32 %v1153_v49, %v1143_v23  ;;  %v1220_v31 = vadd.f32 %v1215_v17, %v1206_v28 }
 0x232   : > { %1584 = vrot.lane.b32.xlu1 %v1579_v21, %s2284_s4  ;;  %s3314_s4 = sld [smem:[#allocation8 + $0x54]] }
 0x233   : > { %v1167_v24 = vpop.permute.xlu1 %1166  ;;  %v1229_v27 = vpop.permute.xlu0 %1228 }
 0x234   : > { %v1171_v29 = vadd.f32 %v1167_v24, %v1157_v10  ;;  %v1234_v38 = vadd.f32 %v1229_v27, %v1220_v31  ;;  %v1373_v14 = vstv %s3309_s30  ;;  %s1857_s30 = scalar_lea.sflag [#allocation6], %s2432_s5 }
 0x235   : > { %v1374_v49 = vmul.f32 %v1373_v14, %v3083_v45 }
 0x236   : > { %1598 = vrot.lane.b32.xlu1 %v1593_v59, %s2285_s15  ;;  %s3319_s15 = sld [smem:[#allocation8 + $0x5b]] }
 0x237   : > { %v1181_v30 = vpop.permute.xlu1 %1180  ;;  %v1243_v18 = vpop.permute.xlu0 %1242 }
 0x238   : > { %v1185_v33 = vadd.f32 %v1181_v30, %v1171_v29  ;;  %v1248_v46 = vadd.f32 %v1243_v18, %v1234_v38 }
 0x23a   : > { %v1193_v39 = vadd.f32 %v1191_v37, %v1185_v33  ;;  %1612 = vrot.lane.b32.xlu1 %v1607_v8, %s2286_s7  ;;  %s2290_s7 = smov 16  }
 0x23b   : > { %v1203_v43 = vpop.permute.xlu1 %1202  ;;  %v1257_v44 = vpop.permute.xlu0 %1256 }
 0x23c   : > { %v1262_v47 = vadd.f32 %v1257_v44, %v1248_v46  ;;  %v1207_v41 = vadd.f32 %v1203_v43, %v1193_v39  ;;  %v1375_v44 = vmul.f32 %v1373_v14, %v3151_v20  ;;  %v1465_v46 = vstv %s3314_s4  ;;  %s2202_s4 = scalar_lea.vmem %s1872_s8, 128 }
 0x23d   : > { %p2203_p9 = scmp.ne.s32.totalorder %s1872_s8, %s2202_s4 }
 0x23e   : > { %1626 = vrot.lane.b32.xlu1 %v1621_v25, %s2287_s17  ;;  %s2291_s17 = smov 32  }
 0x23f   : > { %v1217_v51 = vpop.permute.xlu1 %1216  ;;  %v1271_v55 = vpop.permute.xlu0 %1270  ;;  %p2204_p13 = pnand %p2203_p9, %p3599_p11 }
 0x240   : > { %v1276_v60 = vadd.f32 %v1271_v55, %v1262_v47  ;;  %v1221_v61 = vadd.f32 %v1217_v51, %v1207_v41 }
 0x241   : > { %p2205_p10 = pneg %p2204_p13 }
 0x242   : > { %1640 = vrot.lane.b32.xlu1 %v1635_v35, %s2288_s24  ;;  %v1284_v53 = vadd.f32 %v1282_v15, %v1276_v60  ;;  %v1466_v60 = vmul.f32 %v1465_v46, %v3160_v34  ;;  %s2292_s24 = smov 64  }
 0x243   : > { %v1231_v42 = vpop.permute.xlu1 %1230  ;;  %v1293_v26 = vpop.permute.xlu0 %1292 }
 0x244   : > { %v1235_v62 = vadd.f32 %v1231_v42, %v1221_v61  ;;  %v1298_v63 = vadd.f32 %v1293_v26, %v1284_v53 }
 0x247   : > { %v1245_v52 = vpop.permute.xlu1 %1244  ;;  %v1307_v54 = vpop.permute.xlu0 %1306 }
 0x248   : > { %v1249_v57 = vadd.f32 %v1245_v52, %v1235_v62  ;;  %v1312_v7 = vadd.f32 %v1307_v54, %v1298_v63 }
 0x24b   : > { %v1259_v2 = vpop.permute.xlu1 %1258  ;;  %v1321_v48 = vpop.permute.xlu0 %1320 }
 0x24c   : > { %v1263_v3 = vadd.f32 %v1259_v2, %v1249_v57  ;;  %v1326_v36 = vadd.f32 %v1321_v48, %v1312_v7 }
 0x24f   : > { %v1273_v6 = vpop.permute.xlu1 %1272  ;;  %v1335_v56 = vpop.permute.xlu0 %1334 }
 0x250   : > { %v1277_v9 = vadd.f32 %v1273_v6, %v1263_v3  ;;  %v1340_v13 = vadd.f32 %v1335_v56, %v1326_v36  ;;  %v1557_v36 = vstv %s3319_s15  ;;  %s2297_s15 = smov [#allocation9]  }
 0x252   : > { %v1285_v58 = vadd.f32 %v1283_v11, %v1277_v9  ;;  %v1467_v11 = vmul.f32 %v1465_v46, %v3226_v22 }
 0x253   : > { %v1349_v4 = vpop.permute.xlu0 %1348 }
 0x254   : > { %v1354_v1 = vadd.f32 %v1349_v4, %v1340_v13 }
 0x257   : > { %v1363_v16 = vpop.permute.xlu0 %1362 }
 0x258   : > { %v1368_v19 = vadd.f32 %v1363_v16, %v1354_v1  ;;  %v1295_v0 = vpop.permute.xlu1 %1294  ;;  %v1558_v16 = vmul.f32 %v1557_v36, %v3235_v32 }
 0x259   : > { %v1299_v27 = vadd.f32 %v1295_v0, %v1285_v58 }
 0x25a   : > { %v1376_v17 = vadd.f32 %v1374_v49, %v1368_v19 }
 0x25b   : > { %v1385_v5 = vpop.permute.xlu0 %1384 }
 0x25c   : > { %v1309_v21 = vpop.permute.xlu1 %1308  ;;  %v1390_v28 = vadd.f32 %v1385_v5, %v1376_v17 }
 0x25d   : > { %v1313_v40 = vadd.f32 %v1309_v21, %v1299_v27 }
 0x25f   : > { %v1399_v23 = vpop.permute.xlu0 %1398 }
 0x260   : > { %v1323_v24 = vpop.permute.xlu1 %1322  ;;  %v1404_v18 = vadd.f32 %v1399_v23, %v1390_v28 }
 0x261   : > { %v1327_v29 = vadd.f32 %v1323_v24, %v1313_v40 }
 0x263   : > { %v1413_v10 = vpop.permute.xlu0 %1412 }
 0x264   : > { %v1337_v59 = vpop.permute.xlu1 %1336  ;;  %v1418_v37 = vadd.f32 %v1413_v10, %v1404_v18 }
 0x265   : > { %v1341_v33 = vadd.f32 %v1337_v59, %v1327_v29 }
 0x267   : > { %v1427_v30 = vpop.permute.xlu0 %1426 }
 0x268   : > { %v1351_v31 = vpop.permute.xlu1 %1350  ;;  %v1432_v38 = vadd.f32 %v1427_v30, %v1418_v37 }
 0x269   : > { %v1355_v45 = vadd.f32 %v1351_v31, %v1341_v33 }
 0x26b   : > { %v1441_v8 = vpop.permute.xlu0 %1440 }
 0x26c   : > { %v1365_v39 = vpop.permute.xlu1 %1364  ;;  %v1446_v25 = vadd.f32 %v1441_v8, %v1432_v38 }
 0x26d   : > { %v1369_v43 = vadd.f32 %v1365_v39, %v1355_v45  ;;  %v1559_v45 = vmul.f32 %v1557_v36, %v3287_v12 }
 0x26f   : > { %v1455_v50 = vpop.permute.xlu0 %1454  ;;  %v1377_v47 = vadd.f32 %v1375_v44, %v1369_v43 }
 0x270   : > { %v1460_v51 = vadd.f32 %v1455_v50, %v1446_v25  ;;  %v1387_v55 = vpop.permute.xlu1 %1386 }
 0x271   : > { %v1391_v41 = vadd.f32 %v1387_v55, %v1377_v47 }
 0x272   : > { %v1468_v35 = vadd.f32 %v1466_v60, %v1460_v51 }
 0x273   : > { %v1477_v15 = vpop.permute.xlu0 %1476 }
 0x274   : > { %v1401_v53 = vpop.permute.xlu1 %1400  ;;  %v1482_v20 = vadd.f32 %v1477_v15, %v1468_v35 }
 0x275   : > { %v1405_v61 = vadd.f32 %v1401_v53, %v1391_v41 }
 0x277   : > { %v1491_v42 = vpop.permute.xlu0 %1490 }
 0x278   : > { %v1415_v26 = vpop.permute.xlu1 %1414  ;;  %v1496_v48 = vadd.f32 %v1491_v42, %v1482_v20 }
 0x279   : > { %v1419_v62 = vadd.f32 %v1415_v26, %v1405_v61 }
 0x27b   : > { %v1505_v52 = vpop.permute.xlu0 %1504 }
 0x27c   : > { %v1429_v54 = vpop.permute.xlu1 %1428  ;;  %v1510_v3 = vadd.f32 %v1505_v52, %v1496_v48  ;;  %v1658_v52 = vlaneseq }
 0x27d   : > { %v1433_v63 = vadd.f32 %v1429_v54, %v1419_v62  ;;  %v2289_v54 = vmov 1966171168  }
 0x27e   : > { %v1665_v61 = vunpack.c.l.s4 %v2289_v54  ;;  %vm3330_vm5 = vcmp.lt.s32.totalorder %v1658_v52, 16  ;;  %vm3339_vm6 = vcmp.ge.s32.totalorder %v1658_v52, 16  ;;  %vm3344_vm7 = vcmp.lt.s32.totalorder %v1658_v52, 32 }
 0x27f   : > { %v1519_v2 = vpop.permute.xlu0 %1518  ;;  %vm3546_vm8 = vmand %vm3339_vm6, %vm3344_vm7  ;;  %vm3353_vm9 = vcmp.ge.s32.totalorder %v1658_v52, 32  ;;  %vm3358_vm10 = vcmp.lt.s32.totalorder %v1658_v52, 48  ;;  %vm3377_vm12 = vcmp.ge.s32.totalorder %v1658_v52, 48  ;;  %vm3382_vm13 = vcmp.lt.s32.totalorder %v1658_v52, 64 }
 0x280   : > { %v1443_v57 = vpop.permute.xlu1 %1442  ;;  %v1524_v56 = vadd.f32 %v1519_v2, %v1510_v3  ;;  %v1666_v62 = vunpack.c.0.s8 %v1665_v61  ;;  %v3326_v2 = vshrl.u32 %v1658_v52, 7  ;;  %vm3543_vm11 = vmand %vm3353_vm9, %vm3358_vm10  ;;  %vm3387_vm14 = vcmp.ge.s32.totalorder %v1658_v52, 64 }
 0x281   : > { %v1447_v34 = vadd.f32 %v1443_v57, %v1433_v63  ;;  %vm3392_vm15 = vcmp.lt.s32.totalorder %v1658_v52, 80  ;;  %vm3545_vm0 = vmand %vm3377_vm12, %vm3382_vm13  ;;  %vm3405_vm2 = vcmp.ge.s32.totalorder %v1658_v52, 80  ;;  %vm3410_vm3 = vcmp.lt.s32.totalorder %v1658_v52, 96 }
 0x282   : > { %v1669_v48 = vsub.s32 %v1666_v62, %v3326_v2  ;;  %vm3544_vm1 = vmand %vm3387_vm14, %vm3392_vm15  ;;  %v1846_v61 = vsub.s32 0, %v3326_v2 }
 0x283   : > { %v1533_v6 = vpop.permute.xlu0 %1532  ;;  %vm3547_vm4 = vmand %vm3405_vm2, %vm3410_vm3 }
 0x284   : > { %v1457_v7 = vpop.permute.xlu1 %1456  ;;  %v1538_v58 = vadd.f32 %v1533_v6, %v1524_v56 }
 0x285   : > { %v1461_v9 = vadd.f32 %v1457_v7, %v1447_v34 }
 0x287   : > { %v1547_v4 = vpop.permute.xlu0 %1546  ;;  %v1469_v13 = vadd.f32 %v1467_v11, %v1461_v9 }
 0x288   : > { %v1552_v14 = vadd.f32 %v1547_v4, %v1538_v58  ;;  %v1479_v1 = vpop.permute.xlu1 %1478 }
 0x289   : > { %v1483_v21 = vadd.f32 %v1479_v1, %v1469_v13 }
 0x28a   : > { %v1560_v19 = vadd.f32 %v1558_v16, %v1552_v14 }
 0x28b   : > { %v1569_v0 = vpop.permute.xlu0 %1568 }
 0x28c   : > { %v1493_v49 = vpop.permute.xlu1 %1492  ;;  %v1574_v10 = vadd.f32 %v1569_v0, %v1560_v19 }
 0x28d   : > { %v1497_v27 = vadd.f32 %v1493_v49, %v1483_v21 }
 0x28f   : > { %v1583_v17 = vpop.permute.xlu0 %1582 }
 0x290   : > { %v1507_v5 = vpop.permute.xlu1 %1506  ;;  %v1588_v40 = vadd.f32 %v1583_v17, %v1574_v10 }
 0x291   : > { %v1511_v59 = vadd.f32 %v1507_v5, %v1497_v27 }
 0x293   : > { %v1597_v23 = vpop.permute.xlu0 %1596 }
 0x294   : > { %v1521_v24 = vpop.permute.xlu1 %1520  ;;  %v1602_v30 = vadd.f32 %v1597_v23, %v1588_v40 }
 0x295   : > { %v1525_v29 = vadd.f32 %v1521_v24, %v1511_v59 }
 0x297   : > { %v1611_v22 = vpop.permute.xlu0 %1610 }
 0x298   : > { %v1535_v28 = vpop.permute.xlu1 %1534  ;;  %v1616_v33 = vadd.f32 %v1611_v22, %v1602_v30 }
 0x299   : > { %v1539_v18 = vadd.f32 %v1535_v28, %v1525_v29 }
 0x29b   : > { %v1625_v31 = vpop.permute.xlu0 %1624 }
 0x29c   : > { %v1549_v32 = vpop.permute.xlu1 %1548  ;;  %v1630_v8 = vadd.f32 %v1625_v31, %v1616_v33 }
 0x29d   : > { %v1553_v37 = vadd.f32 %v1549_v32, %v1539_v18 }
 0x29f   : > { %v1639_v38 = vpop.permute.xlu0 %1638  ;;  %v1561_v39 = vadd.f32 %v1559_v45, %v1553_v37 }
 0x2a0   : > { %v1644_v43 = vadd.f32 %v1639_v38, %v1630_v8  ;;  %v1571_v44 = vpop.permute.xlu1 %1570 }
 0x2a1   : > { %v1575_v47 = vadd.f32 %v1571_v44, %v1561_v39 }
 0x2a2   : > { %v2061_v46 = vmul.f32 -1.442695, %v1644_v43 }
 0x2a4   : > { %2151 = vpow2.f32 %v2061_v46  ;;  %v1585_v25 = vpop.permute.xlu1 %1584  ;;  %v3582_v46 = vmov 0 }
 0x2a5   : > { %v1589_v55 = vadd.f32 %v1585_v25, %v1575_v47  ;;  %v3583_v46 = vsel %vm3410_vm3, 4294967295, %v3582_v46 }
 0x2a8   : > { %v1599_v50 = vpop.permute.xlu1 %1598 }
 0x2a9   : > { %v1603_v60 = vadd.f32 %v1599_v50, %v1589_v55 }
 0x2ac   : > { %v1613_v51 = vpop.permute.xlu1 %1612 }
 0x2ad   : > { %v1617_v53 = vadd.f32 %v1613_v51, %v1603_v60 }
 0x2b0   : > { %v1627_v35 = vpop.permute.xlu1 %1626 }
 0x2b1   : > { %v2152_v15 = vpop.eup %2151  ;;  %v1631_v26 = vadd.f32 %v1627_v35, %v1617_v53 }
 0x2b2   : > { %v1652_v42 = vadd.f32 1.0, %v2152_v15 }
 0x2b4   : > { %2153 = vrcp.f32 %v1652_v42  ;;  %v1641_v12 = vpop.permute.xlu1 %1640 }
 0x2b5   : > { %v1645_v41 = vadd.f32 %v1641_v12, %v1631_v26 }
 0x2b7   : > { %v2062_v20 = vmul.f32 -1.442695, %v1645_v41 }
 0x2b9   : > { %2155 = vpow2.f32 %v2062_v20  ;;  %v1850_v20 = vsub.s32 1, %v3326_v2 }
 0x2c1   : > { %v2154_v63 = vpop.eup %2153 }
 0x2c2   : > { %v1670_v3 = vrot.slane %v2154_v63, %v1669_v48  ;;  %1662 = vst.msk [vmem:[#allocation3] sm:$0x1] %vm3330_vm5, %v2154_v63  ;;  %v1709_v9 = vcombine.high %v2154_v63, %v2154_v63  ;;  %v1842_v63 = vld [vmem:[%s2438_s19] sm:$0xff]  ;;  %s2206_s19 = sshll.u32 %s2297_s15, 4  ;;  %s2207_s19 = int_to_ptr.vmem [resolvable:$false] %s2206_s19 }
 0x2c3   : > { %s2208_s13 = scalar_lea.vmem %s2207_s19, 256  ;;  %p2209_p2 = scmp.lt.s32.totalorder %s1872_s8, %s2207_s19 }
 0x2c4   : > { %v1671_v34 = vcombine.high %v1670_v3, %v1670_v3  ;;  %v1678_v7 = vrot.slane %v1670_v3, %v1669_v48  ;;  %v1716_v58 = vrot.slane %v1709_v9, %v1669_v48  ;;  %p2210_p1 = scmp.lt.s32.totalorder %s2208_s13, %s2202_s4 }
 0x2c6   : > { %v2156_v6 = vpop.eup %2155  ;;  %v1685_v56 = vrot.slane %v1671_v34, %v1669_v48  ;;  %v1693_v36 = vcombine.high %v1678_v7, %v1678_v7  ;;  %v1723_v4 = vrot.slane %v1716_v58, %v1669_v48  ;;  %v1731_v14 = vcombine.high %v1716_v58, %v1716_v58  ;;  %p2211_p0 = por %p2210_p1, %p2209_p2 }
 0x2c7   : > { %v1653_v11 = vadd.f32 1.0, %v2156_v6 }
 0x2c8   : > { %1686 = vrot.lane.b32.xlu0 %v1685_v56, %s2290_s7  ;;  %v1701_v13 = vcombine.high %v1685_v56, %v1685_v56  ;;  %v1738_v16 = vrot.slane %v1731_v14, %v1669_v48  ;;  %v1746_v49 = vcombine.high %v1723_v4, %v1723_v4  ;;  %p2212_p3 = pnand %p2211_p0, %p2205_p10 }
 0x2c9   : > { %2157 = vrcp.f32 %v1653_v11 }
 0x2ca   : > { %v1754_v23 = vcombine.high %v1738_v16, %v1738_v16 }
 0x2cc   : > { %1694 = vrot.lane.b32.xlu0 %v1693_v36, %s2291_s17 }
 0x2d0   : > { %1724 = vrot.lane.b32.xlu0 %v1723_v4, %s2292_s24 }
 0x2d4   : > { %1702 = vrot.lane.b32.xlu0 %v1701_v13, %s2293_s25 }
 0x2d6   : > { %v2158_v1 = vpop.eup %2157 }
 0x2d7   : > { %v1770_v19 = vrot.slane %v2158_v1, %v1669_v48  ;;  %1762 = vst.msk [vmem:[#allocation3 + $0x1] sm:$0x1] %vm3330_vm5, %v2158_v1  ;;  %v1800_v21 = vcombine.high %v2158_v1, %v2158_v1  ;;  %vm3429_vm5 = vcmp.ge.s32.totalorder %v1658_v52, 96 }
 0x2d8   : > { %1739 = vrot.lane.b32.xlu0 %v1738_v16, %s2294_s26 }
 0x2d9   : > { %v1771_v0 = vcombine.high %v1770_v19, %v1770_v19  ;;  %v1778_v5 = vrot.slane %v1770_v19, %v1669_v48  ;;  %v1807_v27 = vrot.slane %v1800_v21, %v1669_v48 }
 0x2db   : > { %v1785_v17 = vrot.slane %v1771_v0, %v1669_v48  ;;  %v1790_v24 = vcombine.high %v1778_v5, %v1778_v5  ;;  %v1814_v10 = vrot.slane %v1807_v27, %v1669_v48  ;;  %v1819_v22 = vcombine.high %v1807_v27, %v1807_v27 }
 0x2dc   : > { %1747 = vrot.lane.b32.xlu0 %v1746_v49, %s2295_s27 }
 0x2dd   : > { %1786 = vrot.lane.b32.xlu1 %v1785_v17, %s2290_s7  ;;  %v1795_v59 = vcombine.high %v1785_v17, %v1785_v17  ;;  %v1826_v40 = vrot.slane %v1819_v22, %v1669_v48  ;;  %v1831_v28 = vcombine.high %v1814_v10, %v1814_v10 }
 0x2df   : > { %v1836_v29 = vcombine.high %v1826_v40, %v1826_v40 }
 0x2e0   : > { %1755 = vrot.lane.b32.xlu0 %v1754_v23, %s2296_s3 }
 0x2e1   : > { %1791 = vrot.lane.b32.xlu1 %v1790_v24, %s2291_s17 }
 0x2e5   : > { %1815 = vrot.lane.b32.xlu1 %v1814_v10, %s2292_s24 }
 0x2e9   : > { %1796 = vrot.lane.b32.xlu1 %v1795_v59, %s2293_s25 }
 0x2ed   : > { %1827 = vrot.lane.b32.xlu1 %v1826_v40, %s2294_s26 }
 0x2f1   : > { %1832 = vrot.lane.b32.xlu1 %v1831_v28, %s2295_s27 }
 0x2f5   : > { %1837 = vrot.lane.b32.xlu1 %v1836_v29, %s2296_s3 }
 0x33a   : > { %v1687_v32 = vpop.permute.xlu0 %1686 }
 0x33b   : > { %1692 = vst.msk [vmem:[#allocation3] sm:$0x1] %vm3546_vm8, %v1687_v32  ;;  %vm3453_vm8 = vcmp.lt.s32.totalorder %v1658_v52, 128 }
 0x33e   : > { %v1695_v37 = vpop.permute.xlu0 %1694 }
 0x33f   : > { %1700 = vst.msk [vmem:[#allocation3] sm:$0x1] %vm3543_vm11, %v1695_v37  ;;  %vm3434_vm11 = vcmp.lt.s32.totalorder %v1658_v52, 112 }
 0x342   : > { %v1725_v38 = vpop.permute.xlu0 %1724 }
 0x346   : > { %v1703_v25 = vpop.permute.xlu0 %1702 }
 0x347   : > { %1708 = vst.msk [vmem:[#allocation3] sm:$0x1] %vm3545_vm0, %v1703_v25  ;;  %vm3448_vm0 = vcmp.ge.s32.totalorder %v1658_v52, 112 }
 0x348   : > { %1730 = vst.msk [vmem:[#allocation3] sm:$0x1] %vm3544_vm1, %v1725_v38  ;;  %vm3549_vm1 = vmand %vm3429_vm5, %vm3434_vm11 }
 0x349   : > { %vm1760_vm3 = vmand %vm3448_vm0, %vm3453_vm8  ;;  %vm3596_vm8 = vnez %v3583_v46 }
 0x34a   : > { %v1740_v51 = vpop.permute.xlu0 %1739 }
 0x34b   : > { %1745 = vst.msk [vmem:[#allocation3] sm:$0x1] %vm3547_vm4, %v1740_v51  ;;  %vm3592_vm4 = vmand %vm3339_vm6, %vm3344_vm7 }
 0x34c   : > { %vm3594_vm6 = vmand %vm3377_vm12, %vm3382_vm13 }
 0x34d   : > { %vm3595_vm7 = vmand %vm3387_vm14, %vm3392_vm15 }
 0x34e   : > { %v1748_v35 = vpop.permute.xlu0 %1747 }
 0x34f   : > { %1753 = vst.msk [vmem:[#allocation3] sm:$0x1] %vm3549_vm1, %v1748_v35  ;;  %v1787_v15 = vpop.permute.xlu1 %1786  ;;  %vm3593_vm1 = vmand %vm3353_vm9, %vm3358_vm10 }
 0x350   : > { %1789 = vst.msk [vmem:[#allocation3 + $0x1] sm:$0x1] %vm3592_vm4, %v1787_v15  ;;  %vm3597_vm9 = vmand %vm3405_vm2, %vm3596_vm8 }
 0x351   : > { %vm3598_vm10 = vmand %vm3429_vm5, %vm3434_vm11 }
 0x352   : > { %v1756_v53 = vpop.permute.xlu0 %1755 }
 0x353   : > { %1761 = vst.msk [vmem:[#allocation3] sm:$0x1] %vm1760_vm3, %v1756_v53  ;;  %v1792_v42 = vpop.permute.xlu1 %1791 }
 0x354   : > { %1794 = vst.msk [vmem:[#allocation3 + $0x1] sm:$0x1] %vm3593_vm1, %v1792_v42 }
 0x357   : > { %v1816_v26 = vpop.permute.xlu1 %1815 }
 0x35b   : > { %v1797_v12 = vpop.permute.xlu1 %1796 }
 0x35c   : > { %1799 = vst.msk [vmem:[#allocation3 + $0x1] sm:$0x1] %vm3594_vm6, %v1797_v12 }
 0x35d   : > { %1818 = vst.msk [vmem:[#allocation3 + $0x1] sm:$0x1] %vm3595_vm7, %v1816_v26 }
 0x35f   : > { %v1828_v41 = vpop.permute.xlu1 %1827 }
 0x360   : > { %1830 = vst.msk [vmem:[#allocation3 + $0x1] sm:$0x1] %vm3597_vm9, %v1828_v41 }
 0x363   : > { %v1833_v52 = vpop.permute.xlu1 %1832 }
 0x364   : > { %1835 = vst.msk [vmem:[#allocation3 + $0x1] sm:$0x1] %vm3598_vm10, %v1833_v52 }
 0x367   : > { %v1838_v54 = vpop.permute.xlu1 %1837 }
 0x368   : > { %1840 = vst.msk [vmem:[#allocation3 + $0x1] sm:$0x1] %vm1760_vm3, %v1838_v54 }
 0x36f   : > { %v1841_v62 = vld [vmem:[#allocation3] sm:$0x3] }
 0x370   : > { %v1847_v48 = vrot.slane %v1841_v62, %v1846_v61  ;;  %v1851_v57 = vrot.slane %v1841_v62, %v1850_v20 }
 0x372   : > { %v1852_v3 = vcombine.low %v1847_v48, %v1851_v57 }
 0x374   : > { %v1854_v34 = vmul.f32 %v1852_v3, %v1842_v63 }
 0x376   : > { %1855 = vst [vmem:[%s173_s22] sm:$0xff] %v1854_v34 }
 0x377   : > { %2215 = shalt.err (!%p2212_p3)
}
 0x378   : > { %s2216_s6 = scalar_lea.hbm %s1869_s18, 128  ;;  %s2220_s17 = scalar_lea.hbm %s3538_s2, 256 }
 0x379   : > { %p2217_p12 = scmp.ne.s32.totalorder %s1869_s18, %s2216_s6  ;;  %p2221_p4 = scmp.lt.s32.totalorder %s1869_s18, %s3538_s2 }
 0x37a   : > { %p2222_p6 = scmp.lt.s32.totalorder %s2220_s17, %s2216_s6 }
 0x37b   : > { %p2218_p5 = pnand %p2217_p12, %p3599_p11 }
 0x37c   : > { %p2223_p8 = por %p2222_p6, %p2221_p4 }
 0x37d   : > { %p2219_p7 = pneg %p2218_p5 }
 0x37f   : > { %p2224_p9 = pnand %p2223_p8, %p2219_p7 }
 0x381   : > { %2227 = shalt.err (!%p2224_p9)
}
 0x382   : > { %2076 = dma.vmem_to_hbm [thread:$0]  (%p3599_p11), %s1872_s8, 128, %s1869_s18, %s1857_s30  }
 0x383 PF: > { %s1883_s26 = sand.u32 1, %s2258_s9   ;;  %p3600_p13 = scmp.ne.s32.totalorder %s3551_s16, 0 }
 0x384   : > { %p3601_p10 = scmp.ge.s32.totalorder %s2270_s12, 2  ;;  %s1884_s27 = scalar_lea.sflag [#allocation6], %s1883_s26 }
 0x386   : > { %p2087_p2 = pnand %p3601_p10, %p3600_p13 }
 0x388   : > { %p2088_p1 = pneg %p2087_p2 }
 0x38a   : > { %2253 = dma.done.wait (%p2088_p1), %s1884_s27, 128  }
 0x38b   : > { %2255 = vsyncadd (%p2088_p1), %s1884_s27, 4294967168  ;;  %p16_p0 = scmp.ge.s32.totalorder %s2364_s21, 4   ;;  %s3602_s9 = smov %s2262_s10 }
 0x38c   : > { %s3603_s10 = smov %s2266_s11  ;;  %s3604_s11 = smov %s2388_s28 }
 0x38d   : > { %s3605_s12 = smov %s2364_s21  ;;  %18 = sbr.rel (!%p16_p0) target bundleno = 6 (0x6), region = 79 }
 0x392   :  { %1889 = vsyncpa [#allocation5], 1 }
 0x393   :  { %1891 = vsyncpa [#allocation5 + $0x1], 1 }
 0x394   :  { %1892 = vsyncpa [#allocation6], 1 }
 0x395   :  { %1894 = vsyncpa [#allocation6 + $0x1], 1 }
 0x396   :  { %1895 = vsyncpa [#allocation7], 1 }
 0x397   :  { %1897 = vsyncpa [#allocation7 + $0x1], 1 }

</bundles_post_ra>
